<compile_context>
chip_gen: v7x
topology: tpu7x:2x2x1
jax: 0.10.0
libtpu: 0.0.40
codegen_flags: <defaults>
</compile_context>

<pallas_src>
import math

import jax
import jax.numpy as jnp
from jax.experimental import pallas as pl
from jax.experimental.pallas import tpu as pltpu

HIDDEN_DIM = 32            # transformer.embed_dim[2] (small synthetic value)
NUM_TEMPLATE_TOKEN = 64    # per template, per modality
NUM_SEARCH_TOKEN = 256     # per modality
FEAT_SZ_S = 16             # box_head.feat_sz
BN_EPS = 1e-5
COMB_LANES = 128           # lane-dense width of the combined search-path output
HEAD_COLS = COMB_LANES - HIDDEN_DIM   # columns reserved for the packed 1x1 heads


# ----------------------------------------------------------------------------
# Fused Pallas kernel: fusion convs + box-head conv + 1x1 heads + activations
# ----------------------------------------------------------------------------
def _tbsi_fused_kernel(search_ref, tpl_ref,
                       w_search_ref, shift_search_ref,
                       w_box_ref, shift_box_ref,
                       w_tpl_ref, shift_tpl_ref,
                       w_heads_ref, b_heads_ref,
                       comb_ref, tplf_ref,
                       pad16_ref, pad8_ref):
    # search_ref : (1, 16, 16, 2C) f32   [x_v | x_i] tokens as a 16x16 map
    # tpl_ref    : (1,  8,  8, 2C) f32   [z2_v | z2_i] (online template) 8x8 map
    # w_*_ref    : (9, Cin, Cout) bf16   BN-scale-folded conv weights (tap-major)
    # shift_*    : (1, Cout) f32         BN-folded conv bias
    # w_heads    : (C, 128-C) f32, b_heads (1, 128-C) f32  packed 1x1 heads
    # comb_ref   : (1, 16, 16, 128) f32  [ctr|size|off|0... | search_fuse(C)]
    # tplf_ref   : (1,  8,  8, C) f32    template_fuse2 output
    # pad16_ref  : (18, 18, 2C) f32 VMEM scratch (halo-padded 16x16 canvas)
    # pad8_ref   : (10, 10, 2C) f32 VMEM scratch (halo-padded 8x8 canvas)
    H, W = comb_ref.shape[1], comb_ref.shape[2]
    Ht, Wt = tplf_ref.shape[1], tplf_ref.shape[2]
    C = tplf_ref.shape[3]

    # Re-zero the halo scratches every step (tiny) so there is no cross-step
    # scratch dependence and the grid axis can be "parallel".
    pad16_ref[...] = jnp.zeros(pad16_ref.shape, jnp.float32)
    pad8_ref[...] = jnp.zeros(pad8_ref.shape, jnp.float32)

    def conv3x3(pad_ref, w_ref, shift_ref, h, w):
        # 3x3 / stride 1 / pad 1 conv as 9 shifted MXU matmuls over the padded
        # VMEM canvas, bf16 operands, f32 accumulation, folded-BN shift + ReLU.
        cout = w_ref.shape[-1]
        acc = jnp.zeros((h * w, cout), jnp.float32)
        for kh in range(3):
            for kw in range(3):
                tap = pad_ref[kh:kh + h, kw:kw + w, :]
                tap = tap.reshape(h * w, tap.shape[-1]).astype(jnp.bfloat16)
                acc = acc + jnp.dot(tap, w_ref[kh * 3 + kw],
                                    preferred_element_type=jnp.float32)
        return jnp.maximum(acc + shift_ref[...], 0.0)

    # --- 16x16 search path: tbsi_fuse_search ‖ search_fuse (one weight pack) ---
    pad16_ref[1:H + 1, 1:W + 1, :] = search_ref[0]
    y16 = conv3x3(pad16_ref, w_search_ref, shift_search_ref, H, W)   # (256, 2C)

    # --- box-head conv + fused 1x1 heads: consumes y16 directly from VMEM ---
    # (search_fuse half ignored via zero weight rows in w_box)
    pad16_ref[1:H + 1, 1:W + 1, :] = y16.reshape(H, W, y16.shape[-1])
    hfeat = conv3x3(pad16_ref, w_box_ref, shift_box_ref, H, W)       # (256, C)
    heads = jnp.dot(hfeat, w_heads_ref[...],
                    preferred_element_type=jnp.float32) + b_heads_ref[...]
    # epilogue activation: sigmoid+clamp on ctr (lane 0) and size (lanes 1,2);
    # offsets (lanes 3,4) stay raw.
    lane = jax.lax.broadcasted_iota(jnp.int32, heads.shape, 1)
    sig = 1.0 / (1.0 + jnp.exp(-heads))
    sig = jnp.clip(sig, 1e-4, 1.0 - 1e-4)
    heads = jnp.where(lane < 3, sig, heads)

    # single lane-dense 128-wide store: [heads(128-C) | search_fuse(C)]
    comb = jnp.concatenate([heads, y16[:, C:]], axis=-1)             # (256, 128)
    comb_ref[...] = comb.reshape(comb_ref.shape)

    # --- 8x8 online-template path: template_fuse2 (template_fuse1 is dead) ---
    pad8_ref[1:Ht + 1, 1:Wt + 1, :] = tpl_ref[0]
    y8 = conv3x3(pad8_ref, w_tpl_ref, shift_tpl_ref, Ht, Wt)         # (64, C)
    tplf_ref[...] = y8.reshape(tplf_ref.shape)


def tbsi_fused_maps(params, search_2c, tpl_2c):
    """One pallas_call producing the combined search-path slab + template feat."""
    fp = params["fused"]
    B, H, W, C2 = search_2c.shape                 # (B, 16, 16, 2C)
    Ht, Wt = tpl_2c.shape[1], tpl_2c.shape[2]     # (B, 8, 8, 2C)
    C = C2 // 2

    out_shape = (
        jax.ShapeDtypeStruct((B, H, W, COMB_LANES), jnp.float32),  # [heads | search_fuse]
        jax.ShapeDtypeStruct((B, Ht, Wt, C), jnp.float32),         # template_fuse2
    )
    return pl.pallas_call(
        _tbsi_fused_kernel,
        out_shape=out_shape,
        grid=(B,),
        in_specs=[
            pl.BlockSpec((1, H, W, C2), lambda b: (b, 0, 0, 0)),
            pl.BlockSpec((1, Ht, Wt, C2), lambda b: (b, 0, 0, 0)),
            pl.BlockSpec(fp["w_search"].shape, lambda b: (0, 0, 0)),
            pl.BlockSpec(fp["shift_search"].shape, lambda b: (0, 0)),
            pl.BlockSpec(fp["w_box"].shape, lambda b: (0, 0, 0)),
            pl.BlockSpec(fp["shift_box"].shape, lambda b: (0, 0)),
            pl.BlockSpec(fp["w_tpl"].shape, lambda b: (0, 0, 0)),
            pl.BlockSpec(fp["shift_tpl"].shape, lambda b: (0, 0)),
            pl.BlockSpec(fp["w_heads"].shape, lambda b: (0, 0)),
            pl.BlockSpec(fp["b_heads"].shape, lambda b: (0, 0)),
        ],
        out_specs=(
            pl.BlockSpec((1, H, W, COMB_LANES), lambda b: (b, 0, 0, 0)),
            pl.BlockSpec((1, Ht, Wt, C), lambda b: (b, 0, 0, 0)),
        ),
        scratch_shapes=[
            pltpu.VMEM((H + 2, W + 2, C2), jnp.float32),
            pltpu.VMEM((Ht + 2, Wt + 2, C2), jnp.float32),
        ],
        compiler_params=pltpu.CompilerParams(
            dimension_semantics=("parallel",)),
    )(search_2c, tpl_2c,
      fp["w_search"], fp["shift_search"],
      fp["w_box"], fp["shift_box"],
      fp["w_tpl"], fp["shift_tpl"],
      fp["w_heads"], fp["b_heads"])


# ----------------------------------------------------------------------------
# Deterministic parameter initialization (synthetic, no checkpoint)
# ----------------------------------------------------------------------------
def _conv_bn_folded(key, cin, cout):
    kw_, kb_ = jax.random.split(key)
    w = jax.random.normal(kw_, (3, 3, cin, cout), jnp.float32) / math.sqrt(9 * cin)
    b = jax.random.normal(kb_, (cout,), jnp.float32) * 0.01
    # eval-mode BatchNorm (gamma=1, beta=0, mean=0, var=1) folded exactly:
    s = 1.0 / math.sqrt(1.0 + BN_EPS)
    return w * s, b * s


def init_params(key, C=HIDDEN_DIM):
    keys = jax.random.split(key, 12)
    p = {}
    # backbone stub: patch embedding (patch=2, 3 channels per modality)
    p["patch_embed_v"] = {"w": jax.random.normal(keys[0], (12, C), jnp.float32) * 0.1,
                          "b": jnp.zeros((C,), jnp.float32)}
    p["patch_embed_i"] = {"w": jax.random.normal(keys[1], (12, C), jnp.float32) * 0.1,
                          "b": jnp.zeros((C,), jnp.float32)}

    w_ts, sh_ts = _conv_bn_folded(keys[2], 2 * C, C)   # tbsi_fuse_search
    w_t1, sh_t1 = _conv_bn_folded(keys[3], 2 * C, C)   # template_fuse1 (dead in forward)
    w_t2, sh_t2 = _conv_bn_folded(keys[4], 2 * C, C)   # template_fuse2
    w_sf, sh_sf = _conv_bn_folded(keys[5], 2 * C, C)   # search_fuse
    w_sb, sh_sb = _conv_bn_folded(keys[6], 4 * C, C)   # score_branch_template_fuse (unused in forward)
    w_bx, sh_bx = _conv_bn_folded(keys[7], C, C)       # box-head conv

    w_ctr = jax.random.normal(keys[8], (C, 1), jnp.float32) * 0.1
    w_size = jax.random.normal(keys[9], (C, 2), jnp.float32) * 0.1
    w_off = jax.random.normal(keys[10], (C, 2), jnp.float32) * 0.1

    fused = {}
    # tbsi_fuse_search ‖ search_fuse share the same input -> pack along Cout.
    w_s_pack = jnp.concatenate([w_ts, w_sf], axis=-1)                      # (3,3,2C,2C)
    fused["w_search"] = w_s_pack.reshape(9, 2 * C, 2 * C).astype(jnp.bfloat16)
    fused["shift_search"] = jnp.concatenate([sh_ts, sh_sf]).reshape(1, 2 * C)
    # box-head conv consumes the packed [opt|search] map; zero rows drop the search half.
    w_b_ext = jnp.concatenate([w_bx, jnp.zeros_like(w_bx)], axis=2)        # (3,3,2C,C)
    fused["w_box"] = w_b_ext.reshape(9, 2 * C, C).astype(jnp.bfloat16)
    fused["shift_box"] = sh_bx.reshape(1, C)
    # template_fuse2 only (template_fuse1 output is never consumed in the reference).
    fused["w_tpl"] = w_t2.reshape(9, 2 * C, C).astype(jnp.bfloat16)
    fused["shift_tpl"] = sh_t2.reshape(1, C)
    # 1x1 box-head branches packed into one matmul occupying the head columns
    # of the 128-lane combined output: [ctr | size(2) | off(2) | 0...].
    w_heads = jnp.zeros((C, HEAD_COLS), jnp.float32)
    w_heads = w_heads.at[:, 0:1].set(w_ctr).at[:, 1:3].set(w_size).at[:, 3:5].set(w_off)
    b_heads = jnp.zeros((1, HEAD_COLS), jnp.float32)
    fused["w_heads"] = w_heads
    fused["b_heads"] = b_heads
    p["fused"] = fused

    # kept for parameter parity with the reference module (unused in forward())
    p["template_fuse1"] = {"w": w_t1.astype(jnp.bfloat16), "shift": sh_t1.reshape(1, C)}
    p["score_branch_template_fuse"] = {"w": w_sb.astype(jnp.bfloat16),
                                       "shift": sh_sb.reshape(1, C)}
    # score_branch stand-in head
    p["w_score"] = jax.random.normal(keys[11], (2 * C, 1), jnp.float32) * 0.1
    p["b_score"] = jnp.zeros((1,), jnp.float32)
    return p


# ----------------------------------------------------------------------------
# Backbone stub (the transformer is an external injected module)
# ----------------------------------------------------------------------------
def _patch_embed(x_nchw, w, b, patch=2):
    B, Cc, Hh, Ww = x_nchw.shape
    x = x_nchw.reshape(B, Cc, Hh // patch, patch, Ww // patch, patch)
    x = x.transpose(0, 2, 4, 1, 3, 5)
    x = x.reshape(B, (Hh // patch) * (Ww // patch), Cc * patch * patch)
    return x @ w + b


def backbone_stub(params, template, template_online, search):
    # TODO(synk): the full TBSI ViT backbone (attention blocks, TBSI fusion,
    # candidate elimination) is an external injected module; stubbed here as a
    # deterministic per-modality patch embedding producing the token layout
    # [z_v(64), z2_v(64), x_v(256), z_i(64), z2_i(64), x_i(256)].
    def split(x):
        return x[:, :3], x[:, 3:]
    z_v, z_i = split(template)
    z2_v, z2_i = split(template_online)
    x_v, x_i = split(search)
    pe_v, pe_i = params["patch_embed_v"], params["patch_embed_i"]
    tok = lambda x, pe: _patch_embed(x, pe["w"], pe["b"])
    tokens = jnp.concatenate(
        [tok(z_v, pe_v), tok(z2_v, pe_v), tok(x_v, pe_v),
         tok(z_i, pe_i), tok(z2_i, pe_i), tok(x_i, pe_i)], axis=1)
    return tokens, {}


# ----------------------------------------------------------------------------
# Heads (wrapper-level decode on tiny tensors; activations already in-kernel)
# ----------------------------------------------------------------------------
def _decode_center_head(comb):
    # comb: (B, H, W, 128); lanes 0..4 are the (already activated) head maps.
    B, H, W, _ = comb.shape
    score_map_ctr = comb[..., 0:1]       # sigmoid + clamp applied in-kernel
    size_map = comb[..., 1:3]            # sigmoid + clamp applied in-kernel
    offset_map = comb[..., 3:5]          # raw
    flat = score_map_ctr.reshape(B, -1)
    idx = jnp.argmax(flat, axis=1)
    idx_y = idx // W
    idx_x = idx % W
    size = size_map.reshape(B, -1, 2)[jnp.arange(B), idx]
    offset = offset_map.reshape(B, -1, 2)[jnp.arange(B), idx]
    cx = (idx_x.astype(jnp.float32) + offset[:, 0]) / W
    cy = (idx_y.astype(jnp.float32) + offset[:, 1]) / H
    bbox = jnp.stack([cx, cy, size[:, 0], size[:, 1]], axis=1)
    return score_map_ctr, bbox, size_map, offset_map


def score_branch_stub(params, template_feat, search_feat, gt_bboxes):
    # TODO(synk): score_branch is an external injected module (PrRoIPool +
    # attention score decoder); simplified stand-in: ROI-masked mean pooling on
    # the gt box + template global pooling + linear head.
    B, Hs, Ws, C = search_feat.shape
    xs = (jnp.arange(Ws, dtype=jnp.float32) + 0.5) / Ws
    ys = (jnp.arange(Hs, dtype=jnp.float32) + 0.5) / Hs
    x1, y1, x2, y2 = (gt_bboxes[:, i] for i in range(4))
    in_x = (xs[None, None, :] >= x1[:, None, None]) & (xs[None, None, :] <= x2[:, None, None])
    in_y = (ys[None, :, None] >= y1[:, None, None]) & (ys[None, :, None] <= y2[:, None, None])
    mask = (in_x & in_y).astype(jnp.float32)[..., None]                      # (B,Hs,Ws,1)
    roi = (search_feat * mask).sum(axis=(1, 2)) / (mask.sum(axis=(1, 2)) + 1e-6)
    tpl = template_feat.mean(axis=(1, 2))
    feat = jnp.concatenate([tpl, roi], axis=1)                               # (B, 2C)
    return feat @ params["w_score"] + params["b_score"]                      # (B, 1)


def box_cxcywh_to_xyxy(boxes):
    cx, cy, w, h = boxes[:, 0], boxes[:, 1], boxes[:, 2], boxes[:, 3]
    return jnp.stack([cx - 0.5 * w, cy - 0.5 * h, cx + 0.5 * w, cy + 0.5 * h], axis=1)


# ----------------------------------------------------------------------------
# TBSITrack.forward (forward_head + forward_score fused around one kernel)
# ----------------------------------------------------------------------------
def tbsi_track_forward(params, template, search, template_online, gt_bboxes=None):
    tokens, aux_dict = backbone_stub(params, template, template_online, search)
    B, L, C = tokens.shape
    ntt, nst = NUM_TEMPLATE_TOKEN, NUM_SEARCH_TOKEN

    # Token slices (identical indexing to the reference forward_head / forward_score).
    z2_v = tokens[:, ntt:2 * ntt]
    x_v = tokens[:, 2 * ntt:2 * ntt + nst]            # == enc_opt1 / search_v
    z2_i = tokens[:, -ntt - nst:-nst]
    x_i = tokens[:, -nst:]                            # == enc_opt2 / search_i

    search_2c = jnp.concatenate([x_v, x_i], axis=-1).reshape(B, FEAT_SZ_S, FEAT_SZ_S, 2 * C)
    tpl_onl_2c = jnp.concatenate([z2_v, z2_i], axis=-1).reshape(B, 8, 8, 2 * C)
    # NOTE: the reference also computes template_fuse1(template_initial) but never
    # uses its result; that dead computation is eliminated here.

    # Single fused Pallas kernel: all live conv+BN+ReLU fusions, box-head conv,
    # its 1x1 heads and their sigmoid/clamp (intermediates never touch HBM).
    comb, template_online_feat = tbsi_fused_maps(params, search_2c, tpl_onl_2c)
    search_feat = comb[..., COMB_LANES - C:]          # search_fuse output (B,16,16,C)

    score_map_ctr, bbox, size_map, offset_map = _decode_center_head(comb)
    out = {"pred_boxes": bbox.reshape(B, 1, 4), "score_map": score_map_ctr,
           "size_map": size_map, "offset_map": offset_map}

    if gt_bboxes is None:
        gt_bboxes = box_cxcywh_to_xyxy(out["pred_boxes"].reshape(-1, 4))
    cls_logits = score_branch_stub(params, template_online_feat, search_feat, gt_bboxes)

    out.update(aux_dict)
    out["cls_logits"] = cls_logits
    out["backbone_feat"] = tokens
    return out


# ----------------------------------------------------------------------------
if __name__ == "__main__":
    key = jax.random.PRNGKey(0)
    kp, kt, kto, ks = jax.random.split(key, 4)
    params = init_params(kp)

    B = 2
    # RGB-T inputs (3 RGB + 3 TIR channels), patch size 2 in the stub backbone:
    #   template/template_online -> 8x8 = 64 tokens per modality
    #   search                   -> 16x16 = 256 tokens per modality
    template = jax.random.normal(kt, (B, 6, 16, 16), jnp.float32)
    template_online = jax.random.normal(kto, (B, 6, 16, 16), jnp.float32)
    search = jax.random.normal(ks, (B, 6, 32, 32), jnp.float32)

    out = jax.jit(tbsi_track_forward)(params, template, search, template_online)
    jax.block_until_ready(out)

    assert out["pred_boxes"].shape == (B, 1, 4)
    assert out["cls_logits"].shape == (B, 1)
    assert out["score_map"].shape == (B, FEAT_SZ_S, FEAT_SZ_S, 1)
    assert out["size_map"].shape == (B, FEAT_SZ_S, FEAT_SZ_S, 2)
    assert out["offset_map"].shape == (B, FEAT_SZ_S, FEAT_SZ_S, 2)
    assert out["backbone_feat"].shape == (B, 768, HIDDEN_DIM)
    print("KERNEL_OK")
</pallas_src>

<mosaic_0001>
module attributes {stable_mosaic.version = 11 : i64} {
  func.func @_tbsi_fused_kernel(%arg0: i32, %arg1: memref<1x16x16x64xf32, #tpu.memory_space<vmem>>, %arg2: memref<1x8x8x64xf32, #tpu.memory_space<vmem>>, %arg3: memref<9x64x64xbf16, #tpu.memory_space<vmem>>, %arg4: memref<1x64xf32, #tpu.memory_space<vmem>>, %arg5: memref<9x64x32xbf16, #tpu.memory_space<vmem>>, %arg6: memref<1x32xf32, #tpu.memory_space<vmem>>, %arg7: memref<9x64x32xbf16, #tpu.memory_space<vmem>>, %arg8: memref<1x32xf32, #tpu.memory_space<vmem>>, %arg9: memref<32x96xf32, #tpu.memory_space<vmem>>, %arg10: memref<1x96xf32, #tpu.memory_space<vmem>>, %arg11: memref<1x16x16x128xf32, #tpu.memory_space<vmem>>, %arg12: memref<1x8x8x32xf32, #tpu.memory_space<vmem>>, %arg13: memref<18x18x64xf32, #tpu.memory_space<vmem>>, %arg14: memref<10x10x64xf32, #tpu.memory_space<vmem>>) attributes {dimension_semantics = [#tpu.dimension_semantics<parallel>], iteration_bounds = array<i64: 2>, scalar_prefetch = 0 : i64, scratch_operands = 2 : i64, tpu.core_type = #tpu.core_type<tc>, window_params = [{transform_indices = @transform_0, window_bounds = array<i64: 1, 16, 16, 64>}, {transform_indices = @transform_1, window_bounds = array<i64: 1, 8, 8, 64>}, {pipeline_mode = #tpu.pipeline_mode<synchronous>, transform_indices = @transform_2, window_bounds = array<i64: 9, 64, 64>}, {pipeline_mode = #tpu.pipeline_mode<synchronous>, transform_indices = @transform_3, window_bounds = array<i64: 1, 64>}, {pipeline_mode = #tpu.pipeline_mode<synchronous>, transform_indices = @transform_4, window_bounds = array<i64: 9, 64, 32>}, {pipeline_mode = #tpu.pipeline_mode<synchronous>, transform_indices = @transform_5, window_bounds = array<i64: 1, 32>}, {pipeline_mode = #tpu.pipeline_mode<synchronous>, transform_indices = @transform_6, window_bounds = array<i64: 9, 64, 32>}, {pipeline_mode = #tpu.pipeline_mode<synchronous>, transform_indices = @transform_7, window_bounds = array<i64: 1, 32>}, {pipeline_mode = #tpu.pipeline_mode<synchronous>, transform_indices = @transform_8, window_bounds = array<i64: 32, 96>}, {pipeline_mode = #tpu.pipeline_mode<synchronous>, transform_indices = @transform_9, window_bounds = array<i64: 1, 96>}, {transform_indices = @transform_10, window_bounds = array<i64: 1, 16, 16, 128>}, {transform_indices = @transform_11, window_bounds = array<i64: 1, 8, 8, 32>}]} {
    %cst = arith.constant 0.000000e+00 : f32
    %0 = vector.broadcast %cst : f32 to vector<18x18x64xf32>
    %c0 = arith.constant 0 : index
    %c0_0 = arith.constant 0 : index
    %c0_1 = arith.constant 0 : index
    %1 = vector.load %arg13[%c0, %c0_0, %c0_1] : memref<18x18x64xf32, #tpu.memory_space<vmem>>, vector<18x18x64xf32>
    tpu.vector_store %arg13[%c0, %c0_0, %c0_1], %0 {strides = array<i32>} : memref<18x18x64xf32, #tpu.memory_space<vmem>>, vector<18x18x64xf32>,
    %cst_2 = arith.constant 0.000000e+00 : f32
    %2 = vector.broadcast %cst_2 : f32 to vector<10x10x64xf32>
    %c0_3 = arith.constant 0 : index
    %c0_4 = arith.constant 0 : index
    %c0_5 = arith.constant 0 : index
    %3 = vector.load %arg14[%c0_3, %c0_4, %c0_5] : memref<10x10x64xf32, #tpu.memory_space<vmem>>, vector<10x10x64xf32>
    tpu.vector_store %arg14[%c0_3, %c0_4, %c0_5], %2 {strides = array<i32>} : memref<10x10x64xf32, #tpu.memory_space<vmem>>, vector<10x10x64xf32>,
    %c0_6 = arith.constant 0 : index
    %c0_7 = arith.constant 0 : index
    %c0_8 = arith.constant 0 : index
    %c0_9 = arith.constant 0 : index
    %4 = vector.load %arg1[%c0_6, %c0_7, %c0_8, %c0_9] : memref<1x16x16x64xf32, #tpu.memory_space<vmem>>, vector<1x16x16x64xf32>
    %5 = vector.shape_cast %4 : vector<1x16x16x64xf32> to vector<16x16x64xf32>
    %c1 = arith.constant 1 : index
    %c1_10 = arith.constant 1 : index
    %c0_11 = arith.constant 0 : index
    %6 = vector.load %arg13[%c1, %c1_10, %c0_11] : memref<18x18x64xf32, #tpu.memory_space<vmem>>, vector<16x16x64xf32>
    tpu.vector_store %arg13[%c1, %c1_10, %c0_11], %5 {strides = array<i32>} : memref<18x18x64xf32, #tpu.memory_space<vmem>>, vector<16x16x64xf32>,
    %cst_12 = arith.constant 0.000000e+00 : f32
    %7 = vector.broadcast %cst_12 : f32 to vector<256x64xf32>
    %c0_13 = arith.constant 0 : index
    %c0_14 = arith.constant 0 : index
    %c0_15 = arith.constant 0 : index
    %8 = vector.load %arg13[%c0_13, %c0_14, %c0_15] : memref<18x18x64xf32, #tpu.memory_space<vmem>>, vector<16x16x64xf32>
    %9 = vector.shape_cast %8 : vector<16x16x64xf32> to vector<256x64xf32>
    %10 = arith.truncf %9 : vector<256x64xf32> to vector<256x64xbf16>
    %c0_16 = arith.constant 0 : index
    %c0_17 = arith.constant 0 : index
    %c0_18 = arith.constant 0 : index
    %11 = vector.load %arg3[%c0_16, %c0_17, %c0_18] : memref<9x64x64xbf16, #tpu.memory_space<vmem>>, vector<1x64x64xbf16>
    %12 = vector.shape_cast %11 : vector<1x64x64xbf16> to vector<64x64xbf16>
    %cst_19 = arith.constant dense<0.000000e+00> : vector<256x64xf32>
    %13 = tpu.matmul %10, %12, %cst_19 {dimension_numbers = #tpu.dot_dimension_numbers<[1], [0], [0], [1], [0, 0, 1, 1], [], []>} : vector<256x64xbf16>, vector<64x64xbf16>, vector<256x64xf32> -> vector<256x64xf32>
    %14 = arith.addf %7, %13 : vector<256x64xf32>
    %c0_20 = arith.constant 0 : index
    %c1_21 = arith.constant 1 : index
    %c0_22 = arith.constant 0 : index
    %15 = vector.load %arg13[%c0_20, %c1_21, %c0_22] : memref<18x18x64xf32, #tpu.memory_space<vmem>>, vector<16x16x64xf32>
    %16 = vector.shape_cast %15 : vector<16x16x64xf32> to vector<256x64xf32>
    %17 = arith.truncf %16 : vector<256x64xf32> to vector<256x64xbf16>
    %c1_23 = arith.constant 1 : index
    %c0_24 = arith.constant 0 : index
    %c0_25 = arith.constant 0 : index
    %18 = vector.load %arg3[%c1_23, %c0_24, %c0_25] : memref<9x64x64xbf16, #tpu.memory_space<vmem>>, vector<1x64x64xbf16>
    %19 = vector.shape_cast %18 : vector<1x64x64xbf16> to vector<64x64xbf16>
    %cst_26 = arith.constant dense<0.000000e+00> : vector<256x64xf32>
    %20 = tpu.matmul %17, %19, %cst_26 {dimension_numbers = #tpu.dot_dimension_numbers<[1], [0], [0], [1], [0, 0, 1, 1], [], []>} : vector<256x64xbf16>, vector<64x64xbf16>, vector<256x64xf32> -> vector<256x64xf32>
    %21 = arith.addf %14, %20 : vector<256x64xf32>
    %c0_27 = arith.constant 0 : index
    %c2 = arith.constant 2 : index
    %c0_28 = arith.constant 0 : index
    %22 = vector.load %arg13[%c0_27, %c2, %c0_28] : memref<18x18x64xf32, #tpu.memory_space<vmem>>, vector<16x16x64xf32>
    %23 = vector.shape_cast %22 : vector<16x16x64xf32> to vector<256x64xf32>
    %24 = arith.truncf %23 : vector<256x64xf32> to vector<256x64xbf16>
    %c2_29 = arith.constant 2 : index
    %c0_30 = arith.constant 0 : index
    %c0_31 = arith.constant 0 : index
    %25 = vector.load %arg3[%c2_29, %c0_30, %c0_31] : memref<9x64x64xbf16, #tpu.memory_space<vmem>>, vector<1x64x64xbf16>
    %26 = vector.shape_cast %25 : vector<1x64x64xbf16> to vector<64x64xbf16>
    %cst_32 = arith.constant dense<0.000000e+00> : vector<256x64xf32>
    %27 = tpu.matmul %24, %26, %cst_32 {dimension_numbers = #tpu.dot_dimension_numbers<[1], [0], [0], [1], [0, 0, 1, 1], [], []>} : vector<256x64xbf16>, vector<64x64xbf16>, vector<256x64xf32> -> vector<256x64xf32>
    %28 = arith.addf %21, %27 : vector<256x64xf32>
    %c1_33 = arith.constant 1 : index
    %c0_34 = arith.constant 0 : index
    %c0_35 = arith.constant 0 : index
    %29 = vector.load %arg13[%c1_33, %c0_34, %c0_35] : memref<18x18x64xf32, #tpu.memory_space<vmem>>, vector<16x16x64xf32>
    %30 = vector.shape_cast %29 : vector<16x16x64xf32> to vector<256x64xf32>
    %31 = arith.truncf %30 : vector<256x64xf32> to vector<256x64xbf16>
    %c3 = arith.constant 3 : index
    %c0_36 = arith.constant 0 : index
    %c0_37 = arith.constant 0 : index
    %32 = vector.load %arg3[%c3, %c0_36, %c0_37] : memref<9x64x64xbf16, #tpu.memory_space<vmem>>, vector<1x64x64xbf16>
    %33 = vector.shape_cast %32 : vector<1x64x64xbf16> to vector<64x64xbf16>
    %cst_38 = arith.constant dense<0.000000e+00> : vector<256x64xf32>
    %34 = tpu.matmul %31, %33, %cst_38 {dimension_numbers = #tpu.dot_dimension_numbers<[1], [0], [0], [1], [0, 0, 1, 1], [], []>} : vector<256x64xbf16>, vector<64x64xbf16>, vector<256x64xf32> -> vector<256x64xf32>
    %35 = arith.addf %28, %34 : vector<256x64xf32>
    %c1_39 = arith.constant 1 : index
    %c1_40 = arith.constant 1 : index
    %c0_41 = arith.constant 0 : index
    %36 = vector.load %arg13[%c1_39, %c1_40, %c0_41] : memref<18x18x64xf32, #tpu.memory_space<vmem>>, vector<16x16x64xf32>
    %37 = vector.shape_cast %36 : vector<16x16x64xf32> to vector<256x64xf32>
    %38 = arith.truncf %37 : vector<256x64xf32> to vector<256x64xbf16>
    %c4 = arith.constant 4 : index
    %c0_42 = arith.constant 0 : index
    %c0_43 = arith.constant 0 : index
    %39 = vector.load %arg3[%c4, %c0_42, %c0_43] : memref<9x64x64xbf16, #tpu.memory_space<vmem>>, vector<1x64x64xbf16>
    %40 = vector.shape_cast %39 : vector<1x64x64xbf16> to vector<64x64xbf16>
    %cst_44 = arith.constant dense<0.000000e+00> : vector<256x64xf32>
    %41 = tpu.matmul %38, %40, %cst_44 {dimension_numbers = #tpu.dot_dimension_numbers<[1], [0], [0], [1], [0, 0, 1, 1], [], []>} : vector<256x64xbf16>, vector<64x64xbf16>, vector<256x64xf32> -> vector<256x64xf32>
    %42 = arith.addf %35, %41 : vector<256x64xf32>
    %c1_45 = arith.constant 1 : index
    %c2_46 = arith.constant 2 : index
    %c0_47 = arith.constant 0 : index
    %43 = vector.load %arg13[%c1_45, %c2_46, %c0_47] : memref<18x18x64xf32, #tpu.memory_space<vmem>>, vector<16x16x64xf32>
    %44 = vector.shape_cast %43 : vector<16x16x64xf32> to vector<256x64xf32>
    %45 = arith.truncf %44 : vector<256x64xf32> to vector<256x64xbf16>
    %c5 = arith.constant 5 : index
    %c0_48 = arith.constant 0 : index
    %c0_49 = arith.constant 0 : index
    %46 = vector.load %arg3[%c5, %c0_48, %c0_49] : memref<9x64x64xbf16, #tpu.memory_space<vmem>>, vector<1x64x64xbf16>
    %47 = vector.shape_cast %46 : vector<1x64x64xbf16> to vector<64x64xbf16>
    %cst_50 = arith.constant dense<0.000000e+00> : vector<256x64xf32>
    %48 = tpu.matmul %45, %47, %cst_50 {dimension_numbers = #tpu.dot_dimension_numbers<[1], [0], [0], [1], [0, 0, 1, 1], [], []>} : vector<256x64xbf16>, vector<64x64xbf16>, vector<256x64xf32> -> vector<256x64xf32>
    %49 = arith.addf %42, %48 : vector<256x64xf32>
    %c2_51 = arith.constant 2 : index
    %c0_52 = arith.constant 0 : index
    %c0_53 = arith.constant 0 : index
    %50 = vector.load %arg13[%c2_51, %c0_52, %c0_53] : memref<18x18x64xf32, #tpu.memory_space<vmem>>, vector<16x16x64xf32>
    %51 = vector.shape_cast %50 : vector<16x16x64xf32> to vector<256x64xf32>
    %52 = arith.truncf %51 : vector<256x64xf32> to vector<256x64xbf16>
    %c6 = arith.constant 6 : index
    %c0_54 = arith.constant 0 : index
    %c0_55 = arith.constant 0 : index
    %53 = vector.load %arg3[%c6, %c0_54, %c0_55] : memref<9x64x64xbf16, #tpu.memory_space<vmem>>, vector<1x64x64xbf16>
    %54 = vector.shape_cast %53 : vector<1x64x64xbf16> to vector<64x64xbf16>
    %cst_56 = arith.constant dense<0.000000e+00> : vector<256x64xf32>
    %55 = tpu.matmul %52, %54, %cst_56 {dimension_numbers = #tpu.dot_dimension_numbers<[1], [0], [0], [1], [0, 0, 1, 1], [], []>} : vector<256x64xbf16>, vector<64x64xbf16>, vector<256x64xf32> -> vector<256x64xf32>
    %56 = arith.addf %49, %55 : vector<256x64xf32>
    %c2_57 = arith.constant 2 : index
    %c1_58 = arith.constant 1 : index
    %c0_59 = arith.constant 0 : index
    %57 = vector.load %arg13[%c2_57, %c1_58, %c0_59] : memref<18x18x64xf32, #tpu.memory_space<vmem>>, vector<16x16x64xf32>
    %58 = vector.shape_cast %57 : vector<16x16x64xf32> to vector<256x64xf32>
    %59 = arith.truncf %58 : vector<256x64xf32> to vector<256x64xbf16>
    %c7 = arith.constant 7 : index
    %c0_60 = arith.constant 0 : index
    %c0_61 = arith.constant 0 : index
    %60 = vector.load %arg3[%c7, %c0_60, %c0_61] : memref<9x64x64xbf16, #tpu.memory_space<vmem>>, vector<1x64x64xbf16>
    %61 = vector.shape_cast %60 : vector<1x64x64xbf16> to vector<64x64xbf16>
    %cst_62 = arith.constant dense<0.000000e+00> : vector<256x64xf32>
    %62 = tpu.matmul %59, %61, %cst_62 {dimension_numbers = #tpu.dot_dimension_numbers<[1], [0], [0], [1], [0, 0, 1, 1], [], []>} : vector<256x64xbf16>, vector<64x64xbf16>, vector<256x64xf32> -> vector<256x64xf32>
    %63 = arith.addf %56, %62 : vector<256x64xf32>
    %c2_63 = arith.constant 2 : index
    %c2_64 = arith.constant 2 : index
    %c0_65 = arith.constant 0 : index
    %64 = vector.load %arg13[%c2_63, %c2_64, %c0_65] : memref<18x18x64xf32, #tpu.memory_space<vmem>>, vector<16x16x64xf32>
    %65 = vector.shape_cast %64 : vector<16x16x64xf32> to vector<256x64xf32>
    %66 = arith.truncf %65 : vector<256x64xf32> to vector<256x64xbf16>
    %c8 = arith.constant 8 : index
    %c0_66 = arith.constant 0 : index
    %c0_67 = arith.constant 0 : index
    %67 = vector.load %arg3[%c8, %c0_66, %c0_67] : memref<9x64x64xbf16, #tpu.memory_space<vmem>>, vector<1x64x64xbf16>
    %68 = vector.shape_cast %67 : vector<1x64x64xbf16> to vector<64x64xbf16>
    %cst_68 = arith.constant dense<0.000000e+00> : vector<256x64xf32>
    %69 = tpu.matmul %66, %68, %cst_68 {dimension_numbers = #tpu.dot_dimension_numbers<[1], [0], [0], [1], [0, 0, 1, 1], [], []>} : vector<256x64xbf16>, vector<64x64xbf16>, vector<256x64xf32> -> vector<256x64xf32>
    %70 = arith.addf %63, %69 : vector<256x64xf32>
    %c0_69 = arith.constant 0 : index
    %c0_70 = arith.constant 0 : index
    %71 = vector.load %arg4[%c0_69, %c0_70] : memref<1x64xf32, #tpu.memory_space<vmem>>, vector<1x64xf32>
    %72 = vector.broadcast %71 : vector<1x64xf32> to vector<256x64xf32>
    %73 = arith.addf %70, %72 : vector<256x64xf32>
    %cst_71 = arith.constant 0.000000e+00 : f32
    %74 = vector.broadcast %cst_71 : f32 to vector<256x64xf32>
    %75 = arith.maximumf %73, %74 : vector<256x64xf32>
    %76 = vector.shape_cast %75 : vector<256x64xf32> to vector<16x16x64xf32>
    %c1_72 = arith.constant 1 : index
    %c1_73 = arith.constant 1 : index
    %c0_74 = arith.constant 0 : index
    %77 = vector.load %arg13[%c1_72, %c1_73, %c0_74] : memref<18x18x64xf32, #tpu.memory_space<vmem>>, vector<16x16x64xf32>
    tpu.vector_store %arg13[%c1_72, %c1_73, %c0_74], %76 {strides = array<i32>} : memref<18x18x64xf32, #tpu.memory_space<vmem>>, vector<16x16x64xf32>,
    %cst_75 = arith.constant 0.000000e+00 : f32
    %78 = vector.broadcast %cst_75 : f32 to vector<256x32xf32>
    %c0_76 = arith.constant 0 : index
    %c0_77 = arith.constant 0 : index
    %c0_78 = arith.constant 0 : index
    %79 = vector.load %arg13[%c0_76, %c0_77, %c0_78] : memref<18x18x64xf32, #tpu.memory_space<vmem>>, vector<16x16x64xf32>
    %80 = vector.shape_cast %79 : vector<16x16x64xf32> to vector<256x64xf32>
    %81 = arith.truncf %80 : vector<256x64xf32> to vector<256x64xbf16>
    %c0_79 = arith.constant 0 : index
    %c0_80 = arith.constant 0 : index
    %c0_81 = arith.constant 0 : index
    %82 = vector.load %arg5[%c0_79, %c0_80, %c0_81] : memref<9x64x32xbf16, #tpu.memory_space<vmem>>, vector<1x64x32xbf16>
    %83 = vector.shape_cast %82 : vector<1x64x32xbf16> to vector<64x32xbf16>
    %cst_82 = arith.constant dense<0.000000e+00> : vector<256x32xf32>
    %84 = tpu.matmul %81, %83, %cst_82 {dimension_numbers = #tpu.dot_dimension_numbers<[1], [0], [0], [1], [0, 0, 1, 1], [], []>} : vector<256x64xbf16>, vector<64x32xbf16>, vector<256x32xf32> -> vector<256x32xf32>
    %85 = arith.addf %78, %84 : vector<256x32xf32>
    %c0_83 = arith.constant 0 : index
    %c1_84 = arith.constant 1 : index
    %c0_85 = arith.constant 0 : index
    %86 = vector.load %arg13[%c0_83, %c1_84, %c0_85] : memref<18x18x64xf32, #tpu.memory_space<vmem>>, vector<16x16x64xf32>
    %87 = vector.shape_cast %86 : vector<16x16x64xf32> to vector<256x64xf32>
    %88 = arith.truncf %87 : vector<256x64xf32> to vector<256x64xbf16>
    %c1_86 = arith.constant 1 : index
    %c0_87 = arith.constant 0 : index
    %c0_88 = arith.constant 0 : index
    %89 = vector.load %arg5[%c1_86, %c0_87, %c0_88] : memref<9x64x32xbf16, #tpu.memory_space<vmem>>, vector<1x64x32xbf16>
    %90 = vector.shape_cast %89 : vector<1x64x32xbf16> to vector<64x32xbf16>
    %cst_89 = arith.constant dense<0.000000e+00> : vector<256x32xf32>
    %91 = tpu.matmul %88, %90, %cst_89 {dimension_numbers = #tpu.dot_dimension_numbers<[1], [0], [0], [1], [0, 0, 1, 1], [], []>} : vector<256x64xbf16>, vector<64x32xbf16>, vector<256x32xf32> -> vector<256x32xf32>
    %92 = arith.addf %85, %91 : vector<256x32xf32>
    %c0_90 = arith.constant 0 : index
    %c2_91 = arith.constant 2 : index
    %c0_92 = arith.constant 0 : index
    %93 = vector.load %arg13[%c0_90, %c2_91, %c0_92] : memref<18x18x64xf32, #tpu.memory_space<vmem>>, vector<16x16x64xf32>
    %94 = vector.shape_cast %93 : vector<16x16x64xf32> to vector<256x64xf32>
    %95 = arith.truncf %94 : vector<256x64xf32> to vector<256x64xbf16>
    %c2_93 = arith.constant 2 : index
    %c0_94 = arith.constant 0 : index
    %c0_95 = arith.constant 0 : index
    %96 = vector.load %arg5[%c2_93, %c0_94, %c0_95] : memref<9x64x32xbf16, #tpu.memory_space<vmem>>, vector<1x64x32xbf16>
    %97 = vector.shape_cast %96 : vector<1x64x32xbf16> to vector<64x32xbf16>
    %cst_96 = arith.constant dense<0.000000e+00> : vector<256x32xf32>
    %98 = tpu.matmul %95, %97, %cst_96 {dimension_numbers = #tpu.dot_dimension_numbers<[1], [0], [0], [1], [0, 0, 1, 1], [], []>} : vector<256x64xbf16>, vector<64x32xbf16>, vector<256x32xf32> -> vector<256x32xf32>
    %99 = arith.addf %92, %98 : vector<256x32xf32>
    %c1_97 = arith.constant 1 : index
    %c0_98 = arith.constant 0 : index
    %c0_99 = arith.constant 0 : index
    %100 = vector.load %arg13[%c1_97, %c0_98, %c0_99] : memref<18x18x64xf32, #tpu.memory_space<vmem>>, vector<16x16x64xf32>
    %101 = vector.shape_cast %100 : vector<16x16x64xf32> to vector<256x64xf32>
    %102 = arith.truncf %101 : vector<256x64xf32> to vector<256x64xbf16>
    %c3_100 = arith.constant 3 : index
    %c0_101 = arith.constant 0 : index
    %c0_102 = arith.constant 0 : index
    %103 = vector.load %arg5[%c3_100, %c0_101, %c0_102] : memref<9x64x32xbf16, #tpu.memory_space<vmem>>, vector<1x64x32xbf16>
    %104 = vector.shape_cast %103 : vector<1x64x32xbf16> to vector<64x32xbf16>
    %cst_103 = arith.constant dense<0.000000e+00> : vector<256x32xf32>
    %105 = tpu.matmul %102, %104, %cst_103 {dimension_numbers = #tpu.dot_dimension_numbers<[1], [0], [0], [1], [0, 0, 1, 1], [], []>} : vector<256x64xbf16>, vector<64x32xbf16>, vector<256x32xf32> -> vector<256x32xf32>
    %106 = arith.addf %99, %105 : vector<256x32xf32>
    %c1_104 = arith.constant 1 : index
    %c1_105 = arith.constant 1 : index
    %c0_106 = arith.constant 0 : index
    %107 = vector.load %arg13[%c1_104, %c1_105, %c0_106] : memref<18x18x64xf32, #tpu.memory_space<vmem>>, vector<16x16x64xf32>
    %108 = vector.shape_cast %107 : vector<16x16x64xf32> to vector<256x64xf32>
    %109 = arith.truncf %108 : vector<256x64xf32> to vector<256x64xbf16>
    %c4_107 = arith.constant 4 : index
    %c0_108 = arith.constant 0 : index
    %c0_109 = arith.constant 0 : index
    %110 = vector.load %arg5[%c4_107, %c0_108, %c0_109] : memref<9x64x32xbf16, #tpu.memory_space<vmem>>, vector<1x64x32xbf16>
    %111 = vector.shape_cast %110 : vector<1x64x32xbf16> to vector<64x32xbf16>
    %cst_110 = arith.constant dense<0.000000e+00> : vector<256x32xf32>
    %112 = tpu.matmul %109, %111, %cst_110 {dimension_numbers = #tpu.dot_dimension_numbers<[1], [0], [0], [1], [0, 0, 1, 1], [], []>} : vector<256x64xbf16>, vector<64x32xbf16>, vector<256x32xf32> -> vector<256x32xf32>
    %113 = arith.addf %106, %112 : vector<256x32xf32>
    %c1_111 = arith.constant 1 : index
    %c2_112 = arith.constant 2 : index
    %c0_113 = arith.constant 0 : index
    %114 = vector.load %arg13[%c1_111, %c2_112, %c0_113] : memref<18x18x64xf32, #tpu.memory_space<vmem>>, vector<16x16x64xf32>
    %115 = vector.shape_cast %114 : vector<16x16x64xf32> to vector<256x64xf32>
    %116 = arith.truncf %115 : vector<256x64xf32> to vector<256x64xbf16>
    %c5_114 = arith.constant 5 : index
    %c0_115 = arith.constant 0 : index
    %c0_116 = arith.constant 0 : index
    %117 = vector.load %arg5[%c5_114, %c0_115, %c0_116] : memref<9x64x32xbf16, #tpu.memory_space<vmem>>, vector<1x64x32xbf16>
    %118 = vector.shape_cast %117 : vector<1x64x32xbf16> to vector<64x32xbf16>
    %cst_117 = arith.constant dense<0.000000e+00> : vector<256x32xf32>
    %119 = tpu.matmul %116, %118, %cst_117 {dimension_numbers = #tpu.dot_dimension_numbers<[1], [0], [0], [1], [0, 0, 1, 1], [], []>} : vector<256x64xbf16>, vector<64x32xbf16>, vector<256x32xf32> -> vector<256x32xf32>
    %120 = arith.addf %113, %119 : vector<256x32xf32>
    %c2_118 = arith.constant 2 : index
    %c0_119 = arith.constant 0 : index
    %c0_120 = arith.constant 0 : index
    %121 = vector.load %arg13[%c2_118, %c0_119, %c0_120] : memref<18x18x64xf32, #tpu.memory_space<vmem>>, vector<16x16x64xf32>
    %122 = vector.shape_cast %121 : vector<16x16x64xf32> to vector<256x64xf32>
    %123 = arith.truncf %122 : vector<256x64xf32> to vector<256x64xbf16>
    %c6_121 = arith.constant 6 : index
    %c0_122 = arith.constant 0 : index
    %c0_123 = arith.constant 0 : index
    %124 = vector.load %arg5[%c6_121, %c0_122, %c0_123] : memref<9x64x32xbf16, #tpu.memory_space<vmem>>, vector<1x64x32xbf16>
    %125 = vector.shape_cast %124 : vector<1x64x32xbf16> to vector<64x32xbf16>
    %cst_124 = arith.constant dense<0.000000e+00> : vector<256x32xf32>
    %126 = tpu.matmul %123, %125, %cst_124 {dimension_numbers = #tpu.dot_dimension_numbers<[1], [0], [0], [1], [0, 0, 1, 1], [], []>} : vector<256x64xbf16>, vector<64x32xbf16>, vector<256x32xf32> -> vector<256x32xf32>
    %127 = arith.addf %120, %126 : vector<256x32xf32>
    %c2_125 = arith.constant 2 : index
    %c1_126 = arith.constant 1 : index
    %c0_127 = arith.constant 0 : index
    %128 = vector.load %arg13[%c2_125, %c1_126, %c0_127] : memref<18x18x64xf32, #tpu.memory_space<vmem>>, vector<16x16x64xf32>
    %129 = vector.shape_cast %128 : vector<16x16x64xf32> to vector<256x64xf32>
    %130 = arith.truncf %129 : vector<256x64xf32> to vector<256x64xbf16>
    %c7_128 = arith.constant 7 : index
    %c0_129 = arith.constant 0 : index
    %c0_130 = arith.constant 0 : index
    %131 = vector.load %arg5[%c7_128, %c0_129, %c0_130] : memref<9x64x32xbf16, #tpu.memory_space<vmem>>, vector<1x64x32xbf16>
    %132 = vector.shape_cast %131 : vector<1x64x32xbf16> to vector<64x32xbf16>
    %cst_131 = arith.constant dense<0.000000e+00> : vector<256x32xf32>
    %133 = tpu.matmul %130, %132, %cst_131 {dimension_numbers = #tpu.dot_dimension_numbers<[1], [0], [0], [1], [0, 0, 1, 1], [], []>} : vector<256x64xbf16>, vector<64x32xbf16>, vector<256x32xf32> -> vector<256x32xf32>
    %134 = arith.addf %127, %133 : vector<256x32xf32>
    %c2_132 = arith.constant 2 : index
    %c2_133 = arith.constant 2 : index
    %c0_134 = arith.constant 0 : index
    %135 = vector.load %arg13[%c2_132, %c2_133, %c0_134] : memref<18x18x64xf32, #tpu.memory_space<vmem>>, vector<16x16x64xf32>
    %136 = vector.shape_cast %135 : vector<16x16x64xf32> to vector<256x64xf32>
    %137 = arith.truncf %136 : vector<256x64xf32> to vector<256x64xbf16>
    %c8_135 = arith.constant 8 : index
    %c0_136 = arith.constant 0 : index
    %c0_137 = arith.constant 0 : index
    %138 = vector.load %arg5[%c8_135, %c0_136, %c0_137] : memref<9x64x32xbf16, #tpu.memory_space<vmem>>, vector<1x64x32xbf16>
    %139 = vector.shape_cast %138 : vector<1x64x32xbf16> to vector<64x32xbf16>
    %cst_138 = arith.constant dense<0.000000e+00> : vector<256x32xf32>
    %140 = tpu.matmul %137, %139, %cst_138 {dimension_numbers = #tpu.dot_dimension_numbers<[1], [0], [0], [1], [0, 0, 1, 1], [], []>} : vector<256x64xbf16>, vector<64x32xbf16>, vector<256x32xf32> -> vector<256x32xf32>
    %141 = arith.addf %134, %140 : vector<256x32xf32>
    %c0_139 = arith.constant 0 : index
    %c0_140 = arith.constant 0 : index
    %142 = vector.load %arg6[%c0_139, %c0_140] : memref<1x32xf32, #tpu.memory_space<vmem>>, vector<1x32xf32>
    %143 = vector.broadcast %142 : vector<1x32xf32> to vector<256x32xf32>
    %144 = arith.addf %141, %143 : vector<256x32xf32>
    %cst_141 = arith.constant 0.000000e+00 : f32
    %145 = vector.broadcast %cst_141 : f32 to vector<256x32xf32>
    %146 = arith.maximumf %144, %145 : vector<256x32xf32>
    %c0_142 = arith.constant 0 : index
    %c0_143 = arith.constant 0 : index
    %147 = vector.load %arg9[%c0_142, %c0_143] : memref<32x96xf32, #tpu.memory_space<vmem>>, vector<32x96xf32>
    %cst_144 = arith.constant dense<0.000000e+00> : vector<256x96xf32>
    %148 = tpu.matmul %146, %147, %cst_144 {dimension_numbers = #tpu.dot_dimension_numbers<[1], [0], [0], [1], [0, 0, 1, 1], [], []>} : vector<256x32xf32>, vector<32x96xf32>, vector<256x96xf32> -> vector<256x96xf32>
    %c0_145 = arith.constant 0 : index
    %c0_146 = arith.constant 0 : index
    %149 = vector.load %arg10[%c0_145, %c0_146] : memref<1x96xf32, #tpu.memory_space<vmem>>, vector<1x96xf32>
    %150 = vector.broadcast %149 : vector<1x96xf32> to vector<256x96xf32>
    %151 = arith.addf %148, %150 : vector<256x96xf32>
    %152 = tpu.iota {dimensions = array<i32: 1>} : vector<256x96xi32>
    %cst_147 = arith.constant 0.000000e+00 : f32
    %153 = vector.broadcast %cst_147 : f32 to vector<256x96xf32>
    %154 = arith.subf %153, %151 : vector<256x96xf32>
    %155 = math.exp %154 : vector<256x96xf32>
    %cst_148 = arith.constant 1.000000e+00 : f32
    %156 = vector.broadcast %cst_148 : f32 to vector<256x96xf32>
    %157 = arith.addf %156, %155 : vector<256x96xf32>
    %cst_149 = arith.constant 1.000000e+00 : f32
    %158 = vector.broadcast %cst_149 : f32 to vector<256x96xf32>
    %159 = arith.divf %158, %157 : vector<256x96xf32>
    %cst_150 = arith.constant 9.99999974E-5 : f32
    %cst_151 = arith.constant 0.999899983 : f32
    %160 = vector.broadcast %cst_150 : f32 to vector<256x96xf32>
    %161 = arith.maximumf %160, %159 : vector<256x96xf32>
    %162 = vector.broadcast %cst_151 : f32 to vector<256x96xf32>
    %163 = arith.minimumf %162, %161 : vector<256x96xf32>
    %c3_i32 = arith.constant 3 : i32
    %164 = vector.broadcast %c3_i32 : i32 to vector<256x96xi32>
    %165 = arith.cmpi slt, %152, %164 : vector<256x96xi32>
    %166 = arith.select %165, %163, %151 : vector<256x96xi1>, vector<256x96xf32>
    %167 = vector.extract_strided_slice %75 {offsets = [0, 32], sizes = [256, 32], strides = [1, 1]} : vector<256x64xf32> to vector<256x32xf32>
    %168 = tpu.concatenate %166, %167 in 1 : vector<256x96xf32>, vector<256x32xf32> -> vector<256x128xf32>
    %169 = vector.shape_cast %168 : vector<256x128xf32> to vector<1x16x16x128xf32>
    %c0_152 = arith.constant 0 : index
    %c0_153 = arith.constant 0 : index
    %c0_154 = arith.constant 0 : index
    %c0_155 = arith.constant 0 : index
    %170 = vector.load %arg11[%c0_152, %c0_153, %c0_154, %c0_155] : memref<1x16x16x128xf32, #tpu.memory_space<vmem>>, vector<1x16x16x128xf32>
    tpu.vector_store %arg11[%c0_152, %c0_153, %c0_154, %c0_155], %169 {strides = array<i32>} : memref<1x16x16x128xf32, #tpu.memory_space<vmem>>, vector<1x16x16x128xf32>,
    %c0_156 = arith.constant 0 : index
    %c0_157 = arith.constant 0 : index
    %c0_158 = arith.constant 0 : index
    %c0_159 = arith.constant 0 : index
    %171 = vector.load %arg2[%c0_156, %c0_157, %c0_158, %c0_159] : memref<1x8x8x64xf32, #tpu.memory_space<vmem>>, vector<1x8x8x64xf32>
    %172 = vector.shape_cast %171 : vector<1x8x8x64xf32> to vector<8x8x64xf32>
    %c1_160 = arith.constant 1 : index
    %c1_161 = arith.constant 1 : index
    %c0_162 = arith.constant 0 : index
    %173 = vector.load %arg14[%c1_160, %c1_161, %c0_162] : memref<10x10x64xf32, #tpu.memory_space<vmem>>, vector<8x8x64xf32>
    tpu.vector_store %arg14[%c1_160, %c1_161, %c0_162], %172 {strides = array<i32>} : memref<10x10x64xf32, #tpu.memory_space<vmem>>, vector<8x8x64xf32>,
    %cst_163 = arith.constant 0.000000e+00 : f32
    %174 = vector.broadcast %cst_163 : f32 to vector<64x32xf32>
    %c0_164 = arith.constant 0 : index
    %c0_165 = arith.constant 0 : index
    %c0_166 = arith.constant 0 : index
    %175 = vector.load %arg14[%c0_164, %c0_165, %c0_166] : memref<10x10x64xf32, #tpu.memory_space<vmem>>, vector<8x8x64xf32>
    %176 = vector.shape_cast %175 : vector<8x8x64xf32> to vector<64x64xf32>
    %177 = arith.truncf %176 : vector<64x64xf32> to vector<64x64xbf16>
    %c0_167 = arith.constant 0 : index
    %c0_168 = arith.constant 0 : index
    %c0_169 = arith.constant 0 : index
    %178 = vector.load %arg7[%c0_167, %c0_168, %c0_169] : memref<9x64x32xbf16, #tpu.memory_space<vmem>>, vector<1x64x32xbf16>
    %179 = vector.shape_cast %178 : vector<1x64x32xbf16> to vector<64x32xbf16>
    %cst_170 = arith.constant dense<0.000000e+00> : vector<64x32xf32>
    %180 = tpu.matmul %177, %179, %cst_170 {dimension_numbers = #tpu.dot_dimension_numbers<[1], [0], [0], [1], [0, 0, 1, 1], [], []>} : vector<64x64xbf16>, vector<64x32xbf16>, vector<64x32xf32> -> vector<64x32xf32>
    %181 = arith.addf %174, %180 : vector<64x32xf32>
    %c0_171 = arith.constant 0 : index
    %c1_172 = arith.constant 1 : index
    %c0_173 = arith.constant 0 : index
    %182 = vector.load %arg14[%c0_171, %c1_172, %c0_173] : memref<10x10x64xf32, #tpu.memory_space<vmem>>, vector<8x8x64xf32>
    %183 = vector.shape_cast %182 : vector<8x8x64xf32> to vector<64x64xf32>
    %184 = arith.truncf %183 : vector<64x64xf32> to vector<64x64xbf16>
    %c1_174 = arith.constant 1 : index
    %c0_175 = arith.constant 0 : index
    %c0_176 = arith.constant 0 : index
    %185 = vector.load %arg7[%c1_174, %c0_175, %c0_176] : memref<9x64x32xbf16, #tpu.memory_space<vmem>>, vector<1x64x32xbf16>
    %186 = vector.shape_cast %185 : vector<1x64x32xbf16> to vector<64x32xbf16>
    %cst_177 = arith.constant dense<0.000000e+00> : vector<64x32xf32>
    %187 = tpu.matmul %184, %186, %cst_177 {dimension_numbers = #tpu.dot_dimension_numbers<[1], [0], [0], [1], [0, 0, 1, 1], [], []>} : vector<64x64xbf16>, vector<64x32xbf16>, vector<64x32xf32> -> vector<64x32xf32>
    %188 = arith.addf %181, %187 : vector<64x32xf32>
    %c0_178 = arith.constant 0 : index
    %c2_179 = arith.constant 2 : index
    %c0_180 = arith.constant 0 : index
    %189 = vector.load %arg14[%c0_178, %c2_179, %c0_180] : memref<10x10x64xf32, #tpu.memory_space<vmem>>, vector<8x8x64xf32>
    %190 = vector.shape_cast %189 : vector<8x8x64xf32> to vector<64x64xf32>
    %191 = arith.truncf %190 : vector<64x64xf32> to vector<64x64xbf16>
    %c2_181 = arith.constant 2 : index
    %c0_182 = arith.constant 0 : index
    %c0_183 = arith.constant 0 : index
    %192 = vector.load %arg7[%c2_181, %c0_182, %c0_183] : memref<9x64x32xbf16, #tpu.memory_space<vmem>>, vector<1x64x32xbf16>
    %193 = vector.shape_cast %192 : vector<1x64x32xbf16> to vector<64x32xbf16>
    %cst_184 = arith.constant dense<0.000000e+00> : vector<64x32xf32>
    %194 = tpu.matmul %191, %193, %cst_184 {dimension_numbers = #tpu.dot_dimension_numbers<[1], [0], [0], [1], [0, 0, 1, 1], [], []>} : vector<64x64xbf16>, vector<64x32xbf16>, vector<64x32xf32> -> vector<64x32xf32>
    %195 = arith.addf %188, %194 : vector<64x32xf32>
    %c1_185 = arith.constant 1 : index
    %c0_186 = arith.constant 0 : index
    %c0_187 = arith.constant 0 : index
    %196 = vector.load %arg14[%c1_185, %c0_186, %c0_187] : memref<10x10x64xf32, #tpu.memory_space<vmem>>, vector<8x8x64xf32>
    %197 = vector.shape_cast %196 : vector<8x8x64xf32> to vector<64x64xf32>
    %198 = arith.truncf %197 : vector<64x64xf32> to vector<64x64xbf16>
    %c3_188 = arith.constant 3 : index
    %c0_189 = arith.constant 0 : index
    %c0_190 = arith.constant 0 : index
    %199 = vector.load %arg7[%c3_188, %c0_189, %c0_190] : memref<9x64x32xbf16, #tpu.memory_space<vmem>>, vector<1x64x32xbf16>
    %200 = vector.shape_cast %199 : vector<1x64x32xbf16> to vector<64x32xbf16>
    %cst_191 = arith.constant dense<0.000000e+00> : vector<64x32xf32>
    %201 = tpu.matmul %198, %200, %cst_191 {dimension_numbers = #tpu.dot_dimension_numbers<[1], [0], [0], [1], [0, 0, 1, 1], [], []>} : vector<64x64xbf16>, vector<64x32xbf16>, vector<64x32xf32> -> vector<64x32xf32>
    %202 = arith.addf %195, %201 : vector<64x32xf32>
    %c1_192 = arith.constant 1 : index
    %c1_193 = arith.constant 1 : index
    %c0_194 = arith.constant 0 : index
    %203 = vector.load %arg14[%c1_192, %c1_193, %c0_194] : memref<10x10x64xf32, #tpu.memory_space<vmem>>, vector<8x8x64xf32>
    %204 = vector.shape_cast %203 : vector<8x8x64xf32> to vector<64x64xf32>
    %205 = arith.truncf %204 : vector<64x64xf32> to vector<64x64xbf16>
    %c4_195 = arith.constant 4 : index
    %c0_196 = arith.constant 0 : index
    %c0_197 = arith.constant 0 : index
    %206 = vector.load %arg7[%c4_195, %c0_196, %c0_197] : memref<9x64x32xbf16, #tpu.memory_space<vmem>>, vector<1x64x32xbf16>
    %207 = vector.shape_cast %206 : vector<1x64x32xbf16> to vector<64x32xbf16>
    %cst_198 = arith.constant dense<0.000000e+00> : vector<64x32xf32>
    %208 = tpu.matmul %205, %207, %cst_198 {dimension_numbers = #tpu.dot_dimension_numbers<[1], [0], [0], [1], [0, 0, 1, 1], [], []>} : vector<64x64xbf16>, vector<64x32xbf16>, vector<64x32xf32> -> vector<64x32xf32>
    %209 = arith.addf %202, %208 : vector<64x32xf32>
    %c1_199 = arith.constant 1 : index
    %c2_200 = arith.constant 2 : index
    %c0_201 = arith.constant 0 : index
    %210 = vector.load %arg14[%c1_199, %c2_200, %c0_201] : memref<10x10x64xf32, #tpu.memory_space<vmem>>, vector<8x8x64xf32>
    %211 = vector.shape_cast %210 : vector<8x8x64xf32> to vector<64x64xf32>
    %212 = arith.truncf %211 : vector<64x64xf32> to vector<64x64xbf16>
    %c5_202 = arith.constant 5 : index
    %c0_203 = arith.constant 0 : index
    %c0_204 = arith.constant 0 : index
    %213 = vector.load %arg7[%c5_202, %c0_203, %c0_204] : memref<9x64x32xbf16, #tpu.memory_space<vmem>>, vector<1x64x32xbf16>
    %214 = vector.shape_cast %213 : vector<1x64x32xbf16> to vector<64x32xbf16>
    %cst_205 = arith.constant dense<0.000000e+00> : vector<64x32xf32>
    %215 = tpu.matmul %212, %214, %cst_205 {dimension_numbers = #tpu.dot_dimension_numbers<[1], [0], [0], [1], [0, 0, 1, 1], [], []>} : vector<64x64xbf16>, vector<64x32xbf16>, vector<64x32xf32> -> vector<64x32xf32>
    %216 = arith.addf %209, %215 : vector<64x32xf32>
    %c2_206 = arith.constant 2 : index
    %c0_207 = arith.constant 0 : index
    %c0_208 = arith.constant 0 : index
    %217 = vector.load %arg14[%c2_206, %c0_207, %c0_208] : memref<10x10x64xf32, #tpu.memory_space<vmem>>, vector<8x8x64xf32>
    %218 = vector.shape_cast %217 : vector<8x8x64xf32> to vector<64x64xf32>
    %219 = arith.truncf %218 : vector<64x64xf32> to vector<64x64xbf16>
    %c6_209 = arith.constant 6 : index
    %c0_210 = arith.constant 0 : index
    %c0_211 = arith.constant 0 : index
    %220 = vector.load %arg7[%c6_209, %c0_210, %c0_211] : memref<9x64x32xbf16, #tpu.memory_space<vmem>>, vector<1x64x32xbf16>
    %221 = vector.shape_cast %220 : vector<1x64x32xbf16> to vector<64x32xbf16>
    %cst_212 = arith.constant dense<0.000000e+00> : vector<64x32xf32>
    %222 = tpu.matmul %219, %221, %cst_212 {dimension_numbers = #tpu.dot_dimension_numbers<[1], [0], [0], [1], [0, 0, 1, 1], [], []>} : vector<64x64xbf16>, vector<64x32xbf16>, vector<64x32xf32> -> vector<64x32xf32>
    %223 = arith.addf %216, %222 : vector<64x32xf32>
    %c2_213 = arith.constant 2 : index
    %c1_214 = arith.constant 1 : index
    %c0_215 = arith.constant 0 : index
    %224 = vector.load %arg14[%c2_213, %c1_214, %c0_215] : memref<10x10x64xf32, #tpu.memory_space<vmem>>, vector<8x8x64xf32>
    %225 = vector.shape_cast %224 : vector<8x8x64xf32> to vector<64x64xf32>
    %226 = arith.truncf %225 : vector<64x64xf32> to vector<64x64xbf16>
    %c7_216 = arith.constant 7 : index
    %c0_217 = arith.constant 0 : index
    %c0_218 = arith.constant 0 : index
    %227 = vector.load %arg7[%c7_216, %c0_217, %c0_218] : memref<9x64x32xbf16, #tpu.memory_space<vmem>>, vector<1x64x32xbf16>
    %228 = vector.shape_cast %227 : vector<1x64x32xbf16> to vector<64x32xbf16>
    %cst_219 = arith.constant dense<0.000000e+00> : vector<64x32xf32>
    %229 = tpu.matmul %226, %228, %cst_219 {dimension_numbers = #tpu.dot_dimension_numbers<[1], [0], [0], [1], [0, 0, 1, 1], [], []>} : vector<64x64xbf16>, vector<64x32xbf16>, vector<64x32xf32> -> vector<64x32xf32>
    %230 = arith.addf %223, %229 : vector<64x32xf32>
    %c2_220 = arith.constant 2 : index
    %c2_221 = arith.constant 2 : index
    %c0_222 = arith.constant 0 : index
    %231 = vector.load %arg14[%c2_220, %c2_221, %c0_222] : memref<10x10x64xf32, #tpu.memory_space<vmem>>, vector<8x8x64xf32>
    %232 = vector.shape_cast %231 : vector<8x8x64xf32> to vector<64x64xf32>
    %233 = arith.truncf %232 : vector<64x64xf32> to vector<64x64xbf16>
    %c8_223 = arith.constant 8 : index
    %c0_224 = arith.constant 0 : index
    %c0_225 = arith.constant 0 : index
    %234 = vector.load %arg7[%c8_223, %c0_224, %c0_225] : memref<9x64x32xbf16, #tpu.memory_space<vmem>>, vector<1x64x32xbf16>
    %235 = vector.shape_cast %234 : vector<1x64x32xbf16> to vector<64x32xbf16>
    %cst_226 = arith.constant dense<0.000000e+00> : vector<64x32xf32>
    %236 = tpu.matmul %233, %235, %cst_226 {dimension_numbers = #tpu.dot_dimension_numbers<[1], [0], [0], [1], [0, 0, 1, 1], [], []>} : vector<64x64xbf16>, vector<64x32xbf16>, vector<64x32xf32> -> vector<64x32xf32>
    %237 = arith.addf %230, %236 : vector<64x32xf32>
    %c0_227 = arith.constant 0 : index
    %c0_228 = arith.constant 0 : index
    %238 = vector.load %arg8[%c0_227, %c0_228] : memref<1x32xf32, #tpu.memory_space<vmem>>, vector<1x32xf32>
    %239 = vector.broadcast %238 : vector<1x32xf32> to vector<64x32xf32>
    %240 = arith.addf %237, %239 : vector<64x32xf32>
    %cst_229 = arith.constant 0.000000e+00 : f32
    %241 = vector.broadcast %cst_229 : f32 to vector<64x32xf32>
    %242 = arith.maximumf %240, %241 : vector<64x32xf32>
    %243 = vector.shape_cast %242 : vector<64x32xf32> to vector<1x8x8x32xf32>
    %c0_230 = arith.constant 0 : index
    %c0_231 = arith.constant 0 : index
    %c0_232 = arith.constant 0 : index
    %c0_233 = arith.constant 0 : index
    %244 = vector.load %arg12[%c0_230, %c0_231, %c0_232, %c0_233] : memref<1x8x8x32xf32, #tpu.memory_space<vmem>>, vector<1x8x8x32xf32>
    tpu.vector_store %arg12[%c0_230, %c0_231, %c0_232, %c0_233], %243 {strides = array<i32>} : memref<1x8x8x32xf32, #tpu.memory_space<vmem>>, vector<1x8x8x32xf32>,
    return
  }
  func.func @transform_0(%arg0: i32) -> (i32, i32, i32, i32) {
    %c0_i32 = arith.constant 0 : i32
    %c0_i32_0 = arith.constant 0 : i32
    %c0_i32_1 = arith.constant 0 : i32
    %c0_i32_2 = arith.constant 0 : i32
    return %arg0, %c0_i32, %c0_i32_0, %c0_i32_1 : i32, i32, i32, i32
  }
  func.func @transform_1(%arg0: i32) -> (i32, i32, i32, i32) {
    %c0_i32 = arith.constant 0 : i32
    %c0_i32_0 = arith.constant 0 : i32
    %c0_i32_1 = arith.constant 0 : i32
    %c0_i32_2 = arith.constant 0 : i32
    return %arg0, %c0_i32, %c0_i32_0, %c0_i32_1 : i32, i32, i32, i32
  }
  func.func @transform_2(%arg0: i32) -> (i32, i32, i32) {
    %c0_i32 = arith.constant 0 : i32
    %c0_i32_0 = arith.constant 0 : i32
    %c0_i32_1 = arith.constant 0 : i32
    %c0_i32_2 = arith.constant 0 : i32
    return %c0_i32, %c0_i32_0, %c0_i32_1 : i32, i32, i32
  }
  func.func @transform_3(%arg0: i32) -> (i32, i32) {
    %c0_i32 = arith.constant 0 : i32
    %c0_i32_0 = arith.constant 0 : i32
    %c0_i32_1 = arith.constant 0 : i32
    return %c0_i32, %c0_i32_0 : i32, i32
  }
  func.func @transform_4(%arg0: i32) -> (i32, i32, i32) {
    %c0_i32 = arith.constant 0 : i32
    %c0_i32_0 = arith.constant 0 : i32
    %c0_i32_1 = arith.constant 0 : i32
    %c0_i32_2 = arith.constant 0 : i32
    return %c0_i32, %c0_i32_0, %c0_i32_1 : i32, i32, i32
  }
  func.func @transform_5(%arg0: i32) -> (i32, i32) {
    %c0_i32 = arith.constant 0 : i32
    %c0_i32_0 = arith.constant 0 : i32
    %c0_i32_1 = arith.constant 0 : i32
    return %c0_i32, %c0_i32_0 : i32, i32
  }
  func.func @transform_6(%arg0: i32) -> (i32, i32, i32) {
    %c0_i32 = arith.constant 0 : i32
    %c0_i32_0 = arith.constant 0 : i32
    %c0_i32_1 = arith.constant 0 : i32
    %c0_i32_2 = arith.constant 0 : i32
    return %c0_i32, %c0_i32_0, %c0_i32_1 : i32, i32, i32
  }
  func.func @transform_7(%arg0: i32) -> (i32, i32) {
    %c0_i32 = arith.constant 0 : i32
    %c0_i32_0 = arith.constant 0 : i32
    %c0_i32_1 = arith.constant 0 : i32
    return %c0_i32, %c0_i32_0 : i32, i32
  }
  func.func @transform_8(%arg0: i32) -> (i32, i32) {
    %c0_i32 = arith.constant 0 : i32
    %c0_i32_0 = arith.constant 0 : i32
    %c0_i32_1 = arith.constant 0 : i32
    return %c0_i32, %c0_i32_0 : i32, i32
  }
  func.func @transform_9(%arg0: i32) -> (i32, i32) {
    %c0_i32 = arith.constant 0 : i32
    %c0_i32_0 = arith.constant 0 : i32
    %c0_i32_1 = arith.constant 0 : i32
    return %c0_i32, %c0_i32_0 : i32, i32
  }
  func.func @transform_10(%arg0: i32) -> (i32, i32, i32, i32) {
    %c0_i32 = arith.constant 0 : i32
    %c0_i32_0 = arith.constant 0 : i32
    %c0_i32_1 = arith.constant 0 : i32
    %c0_i32_2 = arith.constant 0 : i32
    return %arg0, %c0_i32, %c0_i32_0, %c0_i32_1 : i32, i32, i32, i32
  }
  func.func @transform_11(%arg0: i32) -> (i32, i32, i32, i32) {
    %c0_i32 = arith.constant 0 : i32
    %c0_i32_0 = arith.constant 0 : i32
    %c0_i32_1 = arith.constant 0 : i32
    %c0_i32_2 = arith.constant 0 : i32
    return %arg0, %c0_i32, %c0_i32_0, %c0_i32_1 : i32, i32, i32, i32
  }
}

</mosaic_0001>

<bundles_post_ra>
// kernel: tbsi_track_forward.1
= control target key start
LH: loop header
LB: loop body
LE: loop exit
PB: predicated region body
PF: predicated region fallthrough
CT: control target
= control target key end

     0   :  { %s11497_s17 = smov 0   ;;  %s13569_s0 = inlined_call_operand.vmem [shape: f32[2,16,16,64], index: 0, kind: input, shape index: {}]   ;;  %s13570_s1 = inlined_call_operand.vmem [shape: f32[2,8,8,64], index: 1, kind: input, shape index: {}]   ;;  %s13571_s2 = inlined_call_operand.vmem [shape: bf16[9,64,64], index: 2, kind: input, shape index: {}]   ;;  %s13572_s3 = inlined_call_operand.vmem [shape: f32[1,64], index: 3, kind: input, shape index: {}]   ;;  %s13573_s4 = inlined_call_operand.vmem [shape: bf16[9,64,32], index: 4, kind: input, shape index: {}]   ;;  %s13574_s5 = inlined_call_operand.vmem [shape: f32[1,32], index: 5, kind: input, shape index: {}]   ;;  %s13575_s6 = inlined_call_operand.vmem [shape: bf16[9,64,32], index: 6, kind: input, shape index: {}]   ;;  %s13576_s7 = inlined_call_operand.vmem [shape: f32[1,32], index: 7, kind: input, shape index: {}]   ;;  %s13577_s8 = inlined_call_operand.vmem [shape: f32[32,96], index: 8, kind: input, shape index: {}]   ;;  %s13578_s9 = inlined_call_operand.vmem [shape: f32[1,96], index: 9, kind: input, shape index: {}]   ;;  %s13579_s10 = inlined_call_operand.vmem [shape: f32[2,16,16,128], index: 10, kind: output, shape index: {0}]   ;;  %s13580_s11 = inlined_call_operand.vmem [shape: f32[2,8,8,32], index: 11, kind: output, shape index: {1}]  }
   0x1 LB: > { %s8522_s18 = sadd.s32 4294967295, %s11433_s17   ;;  %p8526_p0 = scmp.ge.s32.totalorder %s11433_s17, 1  ;;  %s11433_s17 = sphi %s11497_s17, %s22_s17  }
   0x2   : > { %p350_p1 = scmp.lt.s32.totalorder %s11433_s17, 3 }
   0x4   : > { %p351_p2 = pnand %p8526_p0, %p350_p1 }
   0x6   : > { %354 = sbr.rel (%p351_p2) target bundleno = 1859 (0x743), region = 60 }
   0xd   : > { %v11191_v0 = vld [vmem:[%s13571_s2 + $0x20] sm:$0xff]   ;;  %vm421_vm0 = vcmask 523264   ;;  %v11511_v1 = vld [vmem:[%s13571_s2 + $0x28] sm:$0xff]   ;;  %v11435_v2 = vmov 0.0   ;;  %vm424_vm1 = vcmask 517120   ;;  %p400_p3 = scmp.lt.s32.totalorder %s8522_s18, 1 }
   0xe   : > { %9669 = vmatprep.subr.bf16.mxu0 %v11191_v0  ;;  %422 = vst.msk [vmem:[#allocation2] sm:$0xff] %vm421_vm0, %v11435_v2  ;;  %423 = vst.msk [vmem:[#allocation2 + $0x8] sm:$0xff] %vm421_vm0, %v11435_v2  ;;  %v11193_v3 = vld [vmem:[%s13571_s2 + $0x30] sm:$0xff]   ;;  %v11194_v4 = vld [vmem:[%s13571_s2 + $0x38] sm:$0xff]   ;;  %s11436_s27 = smov 64   ;;  %vm6414_vm2 = vcmask 261120  }
   0xf   : > { %426 = vst.msk [vmem:[#allocation2 + $0x18] sm:$0xff] %vm421_vm0, %v11435_v2  ;;  %427 = vst.msk [vmem:[#allocation2 + $0x20] sm:$0xff] %vm421_vm0, %v11435_v2  ;;  %9670 = vmatpush3.bf16.msra.mxu0 %v11191_v0  ;;  %s13592_s18 = smov (!%p400_p3, %s8522_s18), 1  ;;  %v11195_v9 = vld [vmem:[%s13571_s2] sm:$0xff]   ;;  %v11196_v28 = vld [vmem:[%s13571_s2 + $0x8] sm:$0xff]   ;;  %vm7155_vm4 = vcmask 785408  }
  0x10   : > { %429 = vst.msk [vmem:[#allocation2 + $0x30] sm:$0xff] %vm421_vm0, %v11435_v2  ;;  %430 = vst.msk [vmem:[#allocation2 + $0x38] sm:$0xff] %vm421_vm0, %v11435_v2  ;;  %9671 = vmatprep.subr.bf16.mxu0 %v11511_v1  ;;  %s9197_s25 = sshll.u32 %s13592_s18, 8  ;;  %v11197_v44 = vld [vmem:[%s13571_s2 + $0x10] sm:$0xff]   ;;  %v11198_v49 = vld [vmem:[%s13571_s2 + $0x18] sm:$0xff]   ;;  %s9198_s19 = sshll.u32 %s13592_s18, 6 }
  0x11   : > { %432 = vst.msk [vmem:[#allocation2 + $0x48] sm:$0xff] %vm421_vm0, %v11435_v2  ;;  %433 = vst.msk [vmem:[#allocation2 + $0x50] sm:$0xff] %vm421_vm0, %v11435_v2  ;;  %s11681_s30 = scalar_lea.vmem %s13569_s0, %s9197_s25  ;;  %v11199_v58 = vld [vmem:[%s13571_s2 + $0x40] sm:$0xff]   ;;  %s12772_s22 = scalar_lea.vmem %s13570_s1, %s9198_s19 }
  0x12   : > { %435 = vst.msk [vmem:[#allocation2 + $0x60] sm:$0xff] %vm421_vm0, %v11435_v2  ;;  %436 = vst.msk [vmem:[#allocation2 + $0x68] sm:$0xff] %vm421_vm0, %v11435_v2  ;;  %v497_v6 = vld [vmem:[%s11681_s30] sm:$0xff]  ;;  %v498_v7 = vld [vmem:[%s11681_s30 + $0x8] sm:$0xff]  ;;  %s419_s26 = scalar_lea.vmem %s13580_s11, %s9198_s19  ;;  %s13303_s12 = scalar_lea.vmem %s13579_s10, %s9197_s25 }
  0x13   : > { %438 = vst.msk [vmem:[#allocation2 + $0x78] sm:$0xff] %vm421_vm0, %v11435_v2  ;;  %439 = vst.msk [vmem:[#allocation2 + $0x80] sm:$0xff] %vm421_vm0, %v11435_v2  ;;  %9672 = vmatpush3.bf16.msra.mxu0 %v11511_v1  ;;  %v499_v10 = vld [vmem:[%s11681_s30 + $0x10] sm:$0xff]  ;;  %v500_v11 = vld [vmem:[%s11681_s30 + $0x18] sm:$0xff] }
  0x14   : > { %441 = vst.msk [vmem:[#allocation2 + $0x90] sm:$0xff] %vm421_vm0, %v11435_v2  ;;  %442 = vst.msk [vmem:[#allocation2 + $0x98] sm:$0xff] %vm421_vm0, %v11435_v2  ;;  %9673 = vmatprep.subr.bf16.mxu0 %v11193_v3  ;;  %v501_v13 = vld [vmem:[%s11681_s30 + $0x20] sm:$0xff]  ;;  %v502_v14 = vld [vmem:[%s11681_s30 + $0x28] sm:$0xff] }
  0x15   : > { %444 = vst.msk [vmem:[#allocation2 + $0xa8] sm:$0xff] %vm421_vm0, %v11435_v2  ;;  %445 = vst.msk [vmem:[#allocation2 + $0xb0] sm:$0xff] %vm421_vm0, %v11435_v2  ;;  %v618_v5 = vld [vmem:[#allocation2 + $0x1] sm:$0xff]  ;;  %v503_v15 = vld [vmem:[%s11681_s30 + $0x30] sm:$0xff] }
  0x16   : > { %447 = vst.msk [vmem:[#allocation2 + $0xc0] sm:$0xff] %vm421_vm0, %v11435_v2  ;;  %448 = vst.msk [vmem:[#allocation2 + $0xc8] sm:$0xff] %vm421_vm0, %v11435_v2  ;;  %v504_v16 = vld [vmem:[%s11681_s30 + $0x38] sm:$0xff]  ;;  %v505_v17 = vld [vmem:[%s11681_s30 + $0x40] sm:$0xff] }
  0x17   : > { %450 = vst.msk [vmem:[#allocation2 + $0xd8] sm:$0xff] %vm421_vm0, %v11435_v2  ;;  %451 = vst.msk [vmem:[#allocation2 + $0xe0] sm:$0xff] %vm421_vm0, %v11435_v2  ;;  %9674 = vmatpush3.bf16.msra.mxu0 %v11193_v3  ;;  %v506_v18 = vld [vmem:[%s11681_s30 + $0x48] sm:$0xff]  ;;  %v507_v19 = vld [vmem:[%s11681_s30 + $0x50] sm:$0xff] }
  0x18   : > { %453 = vst.msk [vmem:[#allocation2 + $0xf0] sm:$0xff] %vm421_vm0, %v11435_v2  ;;  %454 = vst.msk [vmem:[#allocation2 + $0xf8] sm:$0xff] %vm421_vm0, %v11435_v2  ;;  %9675 = vmatprep.subr.bf16.mxu0 %v11194_v4  ;;  %v508_v20 = vld [vmem:[%s11681_s30 + $0x58] sm:$0xff]  ;;  %v509_v21 = vld [vmem:[%s11681_s30 + $0x60] sm:$0xff] }
  0x19   : > { %456 = vst.msk [vmem:[#allocation2 + $0x108] sm:$0xff] %vm421_vm0, %v11435_v2  ;;  %457 = vst.msk [vmem:[#allocation2 + $0x110] sm:$0xff] %vm421_vm0, %v11435_v2  ;;  %v510_v22 = vld [vmem:[%s11681_s30 + $0x68] sm:$0xff]  ;;  %v511_v23 = vld [vmem:[%s11681_s30 + $0x70] sm:$0xff] }
  0x1a   : > { %459 = vst.msk [vmem:[#allocation2 + $0x120] sm:$0xff] %vm421_vm0, %v11435_v2  ;;  %460 = vst.msk [vmem:[#allocation2 + $0x128] sm:$0xff] %vm421_vm0, %v11435_v2  ;;  %v512_v24 = vld [vmem:[%s11681_s30 + $0x78] sm:$0xff]  ;;  %v513_v25 = vld [vmem:[%s11681_s30 + $0x80] sm:$0xff] }
  0x1b   : > { %462 = vst.msk [vmem:[#allocation2 + $0x138] sm:$0xff] %vm421_vm0, %v11435_v2  ;;  %463 = vst.msk [vmem:[#allocation2 + $0x140] sm:$0xff] %vm421_vm0, %v11435_v2  ;;  %9676 = vmatpush3.bf16.msra.mxu0 %v11194_v4  ;;  %v514_v26 = vld [vmem:[%s11681_s30 + $0x88] sm:$0xff]  ;;  %v515_v27 = vld [vmem:[%s11681_s30 + $0x90] sm:$0xff] }
  0x1c   : > { %465 = vst.msk [vmem:[#allocation2 + $0x150] sm:$0xff] %vm421_vm0, %v11435_v2  ;;  %466 = vst.msk [vmem:[#allocation2 + $0x158] sm:$0xff] %vm421_vm0, %v11435_v2  ;;  %9709 = vmatprep.subr.bf16.mxu0 %v11195_v9  ;;  %v516_v29 = vld [vmem:[%s11681_s30 + $0x98] sm:$0xff]  ;;  %v517_v30 = vld [vmem:[%s11681_s30 + $0xa0] sm:$0xff] }
  0x1d   : > { %468 = vst.msk [vmem:[#allocation2 + $0x168] sm:$0xff] %vm421_vm0, %v11435_v2  ;;  %469 = vst.msk [vmem:[#allocation2 + $0x170] sm:$0xff] %vm421_vm0, %v11435_v2  ;;  %v518_v31 = vld [vmem:[%s11681_s30 + $0xa8] sm:$0xff]  ;;  %v519_v34 = vld [vmem:[%s11681_s30 + $0xb0] sm:$0xff] }
  0x1e   : > { %471 = vst.msk [vmem:[#allocation2 + $0x180] sm:$0xff] %vm421_vm0, %v11435_v2  ;;  %472 = vst.msk [vmem:[#allocation2 + $0x188] sm:$0xff] %vm421_vm0, %v11435_v2  ;;  %v520_v38 = vld [vmem:[%s11681_s30 + $0xb8] sm:$0xff]  ;;  %v521_v47 = vld [vmem:[%s11681_s30 + $0xc0] sm:$0xff] }
  0x1f   : > { %474 = vst.msk [vmem:[#allocation2 + $0x198] sm:$0xff] %vm421_vm0, %v11435_v2  ;;  %475 = vst.msk [vmem:[#allocation2 + $0x1a0] sm:$0xff] %vm421_vm0, %v11435_v2  ;;  %v522_v48 = vld [vmem:[%s11681_s30 + $0xc8] sm:$0xff]  ;;  %v523_v50 = vld [vmem:[%s11681_s30 + $0xd0] sm:$0xff] }
  0x20   : > { %477 = vst.msk [vmem:[#allocation3] sm:$0xff] %vm421_vm0, %v11435_v2  ;;  %479 = vst.msk [vmem:[#allocation3 + $0x10] sm:$0xff] %vm421_vm0, %v11435_v2  ;;  %v524_v51 = vld [vmem:[%s11681_s30 + $0xd8] sm:$0xff]  ;;  %v525_v52 = vld [vmem:[%s11681_s30 + $0xe0] sm:$0xff] }
  0x21   : > { %481 = vst.msk [vmem:[#allocation3 + $0x20] sm:$0xff] %vm421_vm0, %v11435_v2  ;;  %483 = vst.msk [vmem:[#allocation3 + $0x30] sm:$0xff] %vm421_vm0, %v11435_v2  ;;  %v526_v53 = vld [vmem:[%s11681_s30 + $0xe8] sm:$0xff] }
  0x22   : > { %485 = vst.msk [vmem:[#allocation3 + $0x40] sm:$0xff] %vm421_vm0, %v11435_v2  ;;  %487 = vst.msk [vmem:[#allocation3 + $0x50] sm:$0xff] %vm421_vm0, %v11435_v2 }
  0x23   : > { %489 = vst.msk [vmem:[#allocation3 + $0x60] sm:$0xff] %vm421_vm0, %v11435_v2  ;;  %491 = vst.msk [vmem:[#allocation3 + $0x70] sm:$0xff] %vm421_vm0, %v11435_v2 }
  0x24   : > { %493 = vst.msk [vmem:[#allocation3 + $0x80] sm:$0xff] %vm421_vm0, %v11435_v2  ;;  %495 = vst.msk [vmem:[#allocation3 + $0x90] sm:$0xff] %vm421_vm0, %v11435_v2 }
  0x25   : > { %425 = vst.msk [vmem:[#allocation2 + $0x10] sm:$0x3] %vm424_vm1, %v11435_v2  ;;  %428 = vst.msk [vmem:[#allocation2 + $0x28] sm:$0x3] %vm424_vm1, %v11435_v2 }
  0x26   : > { %431 = vst.msk [vmem:[#allocation2 + $0x40] sm:$0x3] %vm424_vm1, %v11435_v2  ;;  %434 = vst.msk [vmem:[#allocation2 + $0x58] sm:$0x3] %vm424_vm1, %v11435_v2 }
  0x27   : > { %437 = vst.msk [vmem:[#allocation2 + $0x70] sm:$0x3] %vm424_vm1, %v11435_v2  ;;  %440 = vst.msk [vmem:[#allocation2 + $0x88] sm:$0x3] %vm424_vm1, %v11435_v2 }
  0x28   : > { %443 = vst.msk [vmem:[#allocation2 + $0xa0] sm:$0x3] %vm424_vm1, %v11435_v2  ;;  %446 = vst.msk [vmem:[#allocation2 + $0xb8] sm:$0x3] %vm424_vm1, %v11435_v2 }
  0x29   : > { %449 = vst.msk [vmem:[#allocation2 + $0xd0] sm:$0x3] %vm424_vm1, %v11435_v2  ;;  %452 = vst.msk [vmem:[#allocation2 + $0xe8] sm:$0x3] %vm424_vm1, %v11435_v2 }
  0x2a   : > { %455 = vst.msk [vmem:[#allocation2 + $0x100] sm:$0x3] %vm424_vm1, %v11435_v2  ;;  %458 = vst.msk [vmem:[#allocation2 + $0x118] sm:$0x3] %vm424_vm1, %v11435_v2 }
  0x2b   : > { %461 = vst.msk [vmem:[#allocation2 + $0x130] sm:$0x3] %vm424_vm1, %v11435_v2  ;;  %464 = vst.msk [vmem:[#allocation2 + $0x148] sm:$0x3] %vm424_vm1, %v11435_v2 }
  0x2c   : > { %467 = vst.msk [vmem:[#allocation2 + $0x160] sm:$0x3] %vm424_vm1, %v11435_v2  ;;  %470 = vst.msk [vmem:[#allocation2 + $0x178] sm:$0x3] %vm424_vm1, %v11435_v2  ;;  %v619_v8 = vld [vmem:[#allocation2 + $0x9] sm:$0xff] }
  0x2d   : > { %473 = vst.msk [vmem:[#allocation2 + $0x190] sm:$0x3] %vm424_vm1, %v11435_v2  ;;  %476 = vst.msk [vmem:[#allocation2 + $0x1a8] sm:$0x3] %vm424_vm1, %v11435_v2  ;;  %v650_v12 = vpack.c.bf16 %v619_v8, %v618_v5 }
  0x2e   : > { %478 = vst.msk [vmem:[#allocation3 + $0x8] sm:$0x3] %vm424_vm1, %v11435_v2  ;;  %480 = vst.msk [vmem:[#allocation3 + $0x18] sm:$0x3] %vm424_vm1, %v11435_v2 }
  0x2f   : > { %482 = vst.msk [vmem:[#allocation3 + $0x28] sm:$0x3] %vm424_vm1, %v11435_v2  ;;  %484 = vst.msk [vmem:[#allocation3 + $0x38] sm:$0x3] %vm424_vm1, %v11435_v2  ;;  %9677 = vmatprep.mubr.msk.bf16.mxu0 %vm421_vm0, %v650_v12 }
  0x30   : > { %486 = vst.msk [vmem:[#allocation3 + $0x48] sm:$0x3] %vm424_vm1, %v11435_v2  ;;  %488 = vst.msk [vmem:[#allocation3 + $0x58] sm:$0x3] %vm424_vm1, %v11435_v2 }
  0x31   : > { %490 = vst.msk [vmem:[#allocation3 + $0x68] sm:$0x3] %vm424_vm1, %v11435_v2  ;;  %492 = vst.msk [vmem:[#allocation3 + $0x78] sm:$0x3] %vm424_vm1, %v11435_v2 }
  0x32   : > { %494 = vst.msk [vmem:[#allocation3 + $0x88] sm:$0x3] %vm424_vm1, %v11435_v2  ;;  %496 = vst.msk [vmem:[#allocation3 + $0x98] sm:$0x3] %vm424_vm1, %v11435_v2 }
  0x33   : > { %530 = vst.msk [vmem:[#allocation2 + $0x19] sm:$0xff] %vm421_vm0, %v497_v6  ;;  %531 = vst.msk [vmem:[#allocation2 + $0x21] sm:$0xff] %vm421_vm0, %v498_v7 }
  0x34   : > { %532 = vst.msk [vmem:[#allocation2 + $0x31] sm:$0xff] %vm421_vm0, %v499_v10  ;;  %533 = vst.msk [vmem:[#allocation2 + $0x39] sm:$0xff] %vm421_vm0, %v500_v11 }
  0x35   : > { %534 = vst.msk [vmem:[#allocation2 + $0x49] sm:$0xff] %vm421_vm0, %v501_v13  ;;  %535 = vst.msk [vmem:[#allocation2 + $0x51] sm:$0xff] %vm421_vm0, %v502_v14 }
  0x36   : > { %536 = vst.msk [vmem:[#allocation2 + $0x61] sm:$0xff] %vm421_vm0, %v503_v15  ;;  %537 = vst.msk [vmem:[#allocation2 + $0x69] sm:$0xff] %vm421_vm0, %v504_v16 }
  0x37   : > { %538 = vst.msk [vmem:[#allocation2 + $0x79] sm:$0xff] %vm421_vm0, %v505_v17  ;;  %539 = vst.msk [vmem:[#allocation2 + $0x81] sm:$0xff] %vm421_vm0, %v506_v18 }
  0x38   : > { %540 = vst.msk [vmem:[#allocation2 + $0x91] sm:$0xff] %vm421_vm0, %v507_v19  ;;  %541 = vst.msk [vmem:[#allocation2 + $0x99] sm:$0xff] %vm421_vm0, %v508_v20 }
  0x39   : > { %542 = vst.msk [vmem:[#allocation2 + $0xa9] sm:$0xff] %vm421_vm0, %v509_v21  ;;  %543 = vst.msk [vmem:[#allocation2 + $0xb1] sm:$0xff] %vm421_vm0, %v510_v22  ;;  %v562_v21 = vld [vmem:[#allocation2] sm:$0xff]  ;;  %v563_v22 = vld [vmem:[#allocation2 + $0x8] sm:$0xff] }
  0x3a   : > { %544 = vst.msk [vmem:[#allocation2 + $0xc1] sm:$0xff] %vm421_vm0, %v511_v23  ;;  %545 = vst.msk [vmem:[#allocation2 + $0xc9] sm:$0xff] %vm421_vm0, %v512_v24  ;;  %v620_v32 = vld [vmem:[#allocation2 + $0x19] sm:$0xff]  ;;  %v621_v33 = vld [vmem:[#allocation2 + $0x21] sm:$0xff] }
  0x3b   : > { %546 = vst.msk [vmem:[#allocation2 + $0xd9] sm:$0xff] %vm421_vm0, %v513_v25  ;;  %547 = vst.msk [vmem:[#allocation2 + $0xe1] sm:$0xff] %vm421_vm0, %v514_v26  ;;  %v11735_v35 = vpack.c.bf16 %v621_v33, %v620_v32  ;;  %v622_v36 = vld [vmem:[#allocation2 + $0x31] sm:$0xff]  ;;  %v623_v37 = vld [vmem:[#allocation2 + $0x39] sm:$0xff]  ;;  %v594_v26 = vpack.c.bf16 %v563_v22, %v562_v21 }
  0x3c   : > { %548 = vst.msk [vmem:[#allocation2 + $0xf1] sm:$0xff] %vm421_vm0, %v515_v27  ;;  %549 = vst.msk [vmem:[#allocation2 + $0xf9] sm:$0xff] %vm421_vm0, %v516_v29  ;;  %v11739_v39 = vpack.c.bf16 %v623_v37, %v622_v36  ;;  %v624_v40 = vld [vmem:[#allocation2 + $0x49] sm:$0xff]  ;;  %v625_v41 = vld [vmem:[#allocation2 + $0x51] sm:$0xff] }
  0x3d   : > { %550 = vst.msk [vmem:[#allocation2 + $0x109] sm:$0xff] %vm421_vm0, %v517_v30  ;;  %551 = vst.msk [vmem:[#allocation2 + $0x111] sm:$0xff] %vm421_vm0, %v518_v31  ;;  %9678 = vmatmul.mubr.msk.bf16.vlgmr.msra.gmra.mrb[0].mxu0 %vm421_vm0, %v11735_v35  ;;  %v626_v42 = vld [vmem:[#allocation2 + $0x61] sm:$0xff]  ;;  %v627_v43 = vld [vmem:[#allocation2 + $0x69] sm:$0xff]  ;;  %v11749_v45 = vpack.c.bf16 %v625_v41, %v624_v40 }
  0x3e   : > { %552 = vst.msk [vmem:[#allocation2 + $0x121] sm:$0xff] %vm421_vm0, %v519_v34  ;;  %553 = vst.msk [vmem:[#allocation2 + $0x129] sm:$0xff] %vm421_vm0, %v520_v38  ;;  %9710 = vmatpush3.bf16.msra.mxu0 %v11195_v9  ;;  %9681 = vmatprep.mubr.msk.bf16.mxu0 %vm421_vm0, %v11739_v39  ;;  %v11751_v46 = vpack.c.bf16 %v627_v43, %v626_v42  ;;  %v628_v54 = vld [vmem:[#allocation2 + $0x79] sm:$0xff]  ;;  %v629_v55 = vld [vmem:[#allocation2 + $0x81] sm:$0xff] }
  0x3f   : > { %9711 = vmatprep.subr.bf16.mxu0 %v11196_v28  ;;  %554 = vst.msk [vmem:[#allocation2 + $0x139] sm:$0xff] %vm421_vm0, %v521_v47  ;;  %555 = vst.msk [vmem:[#allocation2 + $0x141] sm:$0xff] %vm421_vm0, %v522_v48  ;;  %v630_v56 = vld [vmem:[#allocation2 + $0x91] sm:$0xff]  ;;  %v631_v57 = vld [vmem:[#allocation2 + $0x99] sm:$0xff]  ;;  %v11775_v59 = vpack.c.bf16 %v629_v55, %v628_v54 }
  0x40   : > { %556 = vst.msk [vmem:[#allocation2 + $0x151] sm:$0xff] %vm421_vm0, %v523_v50  ;;  %557 = vst.msk [vmem:[#allocation2 + $0x159] sm:$0xff] %vm421_vm0, %v524_v51  ;;  %v11777_v60 = vpack.c.bf16 %v631_v57, %v630_v56  ;;  %v632_v61 = vld [vmem:[#allocation2 + $0xa9] sm:$0xff]  ;;  %v633_v62 = vld [vmem:[#allocation2 + $0xb1] sm:$0xff] }
  0x41   : > { %558 = vst.msk [vmem:[#allocation2 + $0x169] sm:$0xff] %vm421_vm0, %v525_v52  ;;  %559 = vst.msk [vmem:[#allocation2 + $0x171] sm:$0xff] %vm421_vm0, %v526_v53  ;;  %v634_v63 = vld [vmem:[#allocation2 + $0xc1] sm:$0xff]  ;;  %v635_v0 = vld [vmem:[#allocation2 + $0xc9] sm:$0xff]  ;;  %v11783_v1 = vpack.c.bf16 %v633_v62, %v632_v61 }
  0x42   : > { %9712 = vmatpush3.bf16.msra.mxu0 %v11196_v28  ;;  %v11785_v2 = vpack.c.bf16 %v635_v0, %v634_v63  ;;  %v636_v3 = vld [vmem:[#allocation2 + $0xd9] sm:$0xff]  ;;  %v637_v4 = vld [vmem:[#allocation2 + $0xe1] sm:$0xff]  ;;  %v566_v29 = vld [vmem:[#allocation2 + $0x30] sm:$0xff] }
  0x43   : > { %9713 = vmatprep.subr.bf16.mxu0 %v11197_v44  ;;  %v638_v5 = vld [vmem:[#allocation2 + $0xf1] sm:$0xff]  ;;  %v639_v6 = vld [vmem:[#allocation2 + $0xf9] sm:$0xff]  ;;  %v11791_v7 = vpack.c.bf16 %v637_v4, %v636_v3  ;;  %v11200_v32 = vld [vmem:[%s13571_s2 + $0x48] sm:$0xff]  }
  0x44   : > { %v11793_v8 = vpack.c.bf16 %v639_v6, %v638_v5  ;;  %v640_v9 = vld [vmem:[#allocation2 + $0x109] sm:$0xff]  ;;  %v641_v10 = vld [vmem:[#allocation2 + $0x111] sm:$0xff]  ;;  %v565_v28 = vld [vmem:[#allocation2 + $0x20] sm:$0xff] }
  0x45   : > { %9682 = vmatmul.mubr.msk.bf16.gmra.mrb[4].mxu0 %vm421_vm0, %v11749_v45  ;;  %v642_v11 = vld [vmem:[#allocation2 + $0x121] sm:$0xff]  ;;  %v643_v12 = vld [vmem:[#allocation2 + $0x129] sm:$0xff]  ;;  %v11799_v13 = vpack.c.bf16 %v641_v10, %v640_v9  ;;  %v564_v27 = vld [vmem:[#allocation2 + $0x18] sm:$0xff] }
  0x46   : > { %9685 = vmatprep.mubr.msk.bf16.mxu0 %vm421_vm0, %v11751_v46  ;;  %9714 = vmatpush3.bf16.msra.mxu0 %v11197_v44  ;;  %v11801_v14 = vpack.c.bf16 %v643_v12, %v642_v11  ;;  %v644_v15 = vld [vmem:[#allocation2 + $0x139] sm:$0xff]  ;;  %v645_v16 = vld [vmem:[#allocation2 + $0x141] sm:$0xff]  ;;  %v11820_v31 = vpack.c.bf16 %v565_v28, %v564_v27  ;;  %v569_v36 = vld [vmem:[#allocation2 + $0x50] sm:$0xff] }
  0x47   : > { %9715 = vmatprep.subr.bf16.mxu0 %v11198_v49  ;;  %v646_v17 = vld [vmem:[#allocation2 + $0x151] sm:$0xff]  ;;  %v647_v18 = vld [vmem:[#allocation2 + $0x159] sm:$0xff]  ;;  %v11807_v19 = vpack.c.bf16 %v645_v16, %v644_v15  ;;  %v568_v34 = vld [vmem:[#allocation2 + $0x48] sm:$0xff] }
  0x48   : > { %v11809_v20 = vpack.c.bf16 %v647_v18, %v646_v17  ;;  %v648_v23 = vld [vmem:[#allocation2 + $0x169] sm:$0xff]  ;;  %v649_v24 = vld [vmem:[#allocation2 + $0x171] sm:$0xff]  ;;  %v570_v37 = vld [vmem:[#allocation2 + $0x60] sm:$0xff]  ;;  %v11834_v41 = vpack.c.bf16 %v569_v36, %v568_v34 }
  0x49   : > { %v11815_v25 = vpack.c.bf16 %v649_v24, %v648_v23  ;;  %v567_v30 = vld [vmem:[#allocation2 + $0x38] sm:$0xff]  ;;  %v571_v38 = vld [vmem:[#allocation2 + $0x68] sm:$0xff]  ;;  %v11201_v40 = vld [vmem:[%s13571_s2 + $0x50] sm:$0xff]  }
  0x4a   : > { %9716 = vmatpush3.bf16.msra.mxu0 %v11198_v49  ;;  %v11825_v33 = vpack.c.bf16 %v567_v30, %v566_v29  ;;  %v11202_v42 = vld [vmem:[%s13571_s2 + $0x58] sm:$0xff]   ;;  %v11839_v43 = vpack.c.bf16 %v571_v38, %v570_v37  ;;  %v573_v47 = vld [vmem:[#allocation2 + $0x80] sm:$0xff]  ;;  %v574_v48 = vld [vmem:[#allocation2 + $0x90] sm:$0xff] }
  0x4b   : > { %9749 = vmatprep.subr.bf16.mxu0 %v11199_v58  ;;  %v572_v44 = vld [vmem:[#allocation2 + $0x78] sm:$0xff]  ;;  %v11203_v50 = vld [vmem:[%s13571_s2 + $0x60] sm:$0xff]   ;;  %v576_v53 = vld [vmem:[#allocation2 + $0xa8] sm:$0xff] }
  0x4c   : > { %v575_v49 = vld [vmem:[#allocation2 + $0x98] sm:$0xff]  ;;  %v11848_v51 = vpack.c.bf16 %v573_v47, %v572_v44  ;;  %v577_v54 = vld [vmem:[#allocation2 + $0xb0] sm:$0xff]  ;;  %v578_v55 = vld [vmem:[#allocation2 + $0xc0] sm:$0xff] }
  0x4d   : > { %9686 = vmatmul.mubr.msk.bf16.gmra.mrb[8].mxu0 %vm421_vm0, %v11775_v59  ;;  %v11850_v52 = vpack.c.bf16 %v575_v49, %v574_v48  ;;  %v579_v56 = vld [vmem:[#allocation2 + $0xc8] sm:$0xff]  ;;  %v11856_v57 = vpack.c.bf16 %v577_v54, %v576_v53  ;;  %v580_v61 = vld [vmem:[#allocation2 + $0xd8] sm:$0xff]  ;;  %v581_v62 = vld [vmem:[#allocation2 + $0xe0] sm:$0xff] }
  0x4e   : > { %9689 = vmatprep.mubr.msk.bf16.mxu0 %vm421_vm0, %v11777_v60  ;;  %v582_v63 = vld [vmem:[#allocation2 + $0xf0] sm:$0xff]  ;;  %v583_v0 = vld [vmem:[#allocation2 + $0xf8] sm:$0xff]  ;;  %v11864_v3 = vpack.c.bf16 %v581_v62, %v580_v61  ;;  %v584_v5 = vld [vmem:[#allocation2 + $0x108] sm:$0xff] }
  0x4f   : > { %v11866_v4 = vpack.c.bf16 %v583_v0, %v582_v63  ;;  %v585_v6 = vld [vmem:[#allocation2 + $0x110] sm:$0xff]  ;;  %v586_v9 = vld [vmem:[#allocation2 + $0x120] sm:$0xff]  ;;  %v587_v10 = vld [vmem:[#allocation2 + $0x128] sm:$0xff] }
  0x50   : > { %v11872_v11 = vpack.c.bf16 %v585_v6, %v584_v5  ;;  %v11874_v12 = vpack.c.bf16 %v587_v10, %v586_v9  ;;  %v588_v15 = vld [vmem:[#allocation2 + $0x138] sm:$0xff]  ;;  %v589_v16 = vld [vmem:[#allocation2 + $0x140] sm:$0xff]  ;;  %v590_v17 = vld [vmem:[#allocation2 + $0x150] sm:$0xff] }
  0x51   : > { %v591_v18 = vld [vmem:[#allocation2 + $0x158] sm:$0xff]  ;;  %v11880_v21 = vpack.c.bf16 %v589_v16, %v588_v15  ;;  %v527_v23 = vld [vmem:[%s11681_s30 + $0xf0] sm:$0xff]  ;;  %v1141_v28 = vld [vmem:[#allocation2 + $0x2] sm:$0xff] }
  0x52   : > { %v11882_v22 = vpack.c.bf16 %v591_v18, %v590_v17  ;;  %v528_v24 = vld [vmem:[%s11681_s30 + $0xf8] sm:$0xff]  ;;  %560 = vst.msk [vmem:[#allocation2 + $0x181] sm:$0xff] %vm421_vm0, %v527_v23  ;;  %v593_v27 = vld [vmem:[#allocation2 + $0x170] sm:$0xff]  ;;  %v1144_v36 = vld [vmem:[#allocation2 + $0x22] sm:$0xff] }
  0x53   : > { %561 = vst.msk [vmem:[#allocation2 + $0x189] sm:$0xff] %vm421_vm0, %v528_v24  ;;  %v1142_v29 = vld [vmem:[#allocation2 + $0xa] sm:$0xff]  ;;  %v1143_v34 = vld [vmem:[#allocation2 + $0x1a] sm:$0xff]  ;;  %v1145_v37 = vld [vmem:[#allocation2 + $0x32] sm:$0xff] }
  0x54   : > { %v1146_v38 = vld [vmem:[#allocation2 + $0x3a] sm:$0xff]  ;;  %v11204_v44 = vld [vmem:[%s13571_s2 + $0x68] sm:$0xff]   ;;  %v1148_v48 = vld [vmem:[#allocation2 + $0x52] sm:$0xff] }
  0x55   : > { %9690 = vmatmul.mubr.msk.bf16.gmra.mrb[12].mxu0 %vm421_vm0, %v11783_v1  ;;  %v1147_v47 = vld [vmem:[#allocation2 + $0x4a] sm:$0xff]  ;;  %v1149_v49 = vld [vmem:[#allocation2 + $0x62] sm:$0xff]  ;;  %v1151_v61 = vld [vmem:[#allocation2 + $0x7a] sm:$0xff] }
  0x56   : > { %9693 = vmatprep.mubr.msk.bf16.mxu0 %vm421_vm0, %v11785_v2  ;;  %v1150_v53 = vld [vmem:[#allocation2 + $0x6a] sm:$0xff]  ;;  %v1152_v62 = vld [vmem:[#allocation2 + $0x82] sm:$0xff]  ;;  %v1153_v63 = vld [vmem:[#allocation2 + $0x92] sm:$0xff] }
  0x57   : > { %v11205_v54 = vld [vmem:[%s13571_s2 + $0x70] sm:$0xff]   ;;  %v1154_v0 = vld [vmem:[#allocation2 + $0x9a] sm:$0xff]  ;;  %v11925_v6 = vpack.c.bf16 %v1152_v62, %v1151_v61  ;;  %v1157_v16 = vld [vmem:[#allocation2 + $0xc2] sm:$0xff] }
  0x58   : > { %v11207_v5 = vld [vmem:[%s13571_s2 + $0x80] sm:$0xff]   ;;  %v11927_v9 = vpack.c.bf16 %v1154_v0, %v1153_v63  ;;  %v1155_v10 = vld [vmem:[#allocation2 + $0xaa] sm:$0xff]  ;;  %v1156_v15 = vld [vmem:[#allocation2 + $0xb2] sm:$0xff] }
  0x59   : > { %v1158_v17 = vld [vmem:[#allocation2 + $0xca] sm:$0xff]  ;;  %v11933_v18 = vpack.c.bf16 %v1156_v15, %v1155_v10  ;;  %v1159_v24 = vld [vmem:[#allocation2 + $0xda] sm:$0xff]  ;;  %v1172_v63 = vld [vmem:[#allocation2 + $0x172] sm:$0xff] }
  0x5a   : > { %v11935_v23 = vpack.c.bf16 %v1158_v17, %v1157_v16  ;;  %v1171_v62 = vld [vmem:[#allocation2 + $0x16a] sm:$0xff]  ;;  %v1493_v16 = vld [vmem:[#allocation2 + $0x180] sm:$0xff] }
  0x5b   : > { %v11965_v0 = vpack.c.bf16 %v1172_v63, %v1171_v62  ;;  %v11208_v10 = vld [vmem:[%s13571_s2 + $0x88] sm:$0xff]   ;;  %v11209_v15 = vld [vmem:[%s13571_s2 + $0x90] sm:$0xff]  }
  0x5c   : > { %v1494_v17 = vld [vmem:[#allocation2 + $0x188] sm:$0xff] }
  0x5d   : > { %9694 = vmatmul.mubr.msk.bf16.gmra.mrb[16].mxu0 %vm421_vm0, %v11791_v7  ;;  %v2764_v62 = vld [vmem:[#allocation2 + $0xc1] sm:$0xff]  ;;  %v2765_v63 = vld [vmem:[#allocation2 + $0xc9] sm:$0xff] }
  0x5e   : > { %9697 = vmatprep.mubr.msk.bf16.mxu0 %vm421_vm0, %v11793_v8 }
  0x65   : > { %9698 = vmatmul.mubr.msk.bf16.gmra.mrb[20].mxu0 %vm421_vm0, %v11799_v13 }
  0x66   : > { %9701 = vmatprep.mubr.msk.bf16.mxu0 %vm421_vm0, %v11801_v14 }
  0x6d   : > { %9702 = vmatmul.mubr.msk.bf16.gmra.mrb[24].mxu0 %vm421_vm0, %v11807_v19 }
  0x6e   : > { %9705 = vmatprep.mubr.msk.bf16.mxu0 %vm421_vm0, %v11809_v20 }
  0x75   : > { %9706 = vmatmul.mubr.msk.bf16.gmra.mrb[28].mxu0 %vm421_vm0, %v11815_v25 }
  0x76   : > { %9717 = vmatprep.mubr.msk.bf16.mxu0 %vm421_vm0, %v594_v26  ;;  %v592_v26 = vld [vmem:[#allocation2 + $0x168] sm:$0xff] }
  0x77   : > { %v11892_v30 = vpack.c.bf16 %v593_v27, %v592_v26  ;;  %v1160_v26 = vld [vmem:[#allocation2 + $0xe2] sm:$0xff]  ;;  %v1161_v27 = vld [vmem:[#allocation2 + $0xf2] sm:$0xff] }
  0x7d   : > { %9718 = vmatmul.mubr.msk.bf16.vlgmr.msra.gmra.mrb[0].mxu0 %vm421_vm0, %v11820_v31 }
  0x7e   : > { %9750 = vmatpush3.bf16.msra.mxu0 %v11199_v58  ;;  %9721 = vmatprep.mubr.msk.bf16.mxu0 %vm421_vm0, %v11825_v33  ;;  %v11858_v58 = vpack.c.bf16 %v579_v56, %v578_v55  ;;  %v11911_v55 = vpack.c.bf16 %v1148_v48, %v1147_v47  ;;  %v11913_v56 = vpack.c.bf16 %v1150_v53, %v1149_v49  ;;  %v1167_v48 = vld [vmem:[#allocation2 + $0x13a] sm:$0xff]  ;;  %v1168_v49 = vld [vmem:[#allocation2 + $0x142] sm:$0xff]  ;;  %v1169_v53 = vld [vmem:[#allocation2 + $0x152] sm:$0xff] }
  0x7f   : > { %9751 = vmatprep.subr.bf16.mxu0 %v11200_v32 }
  0x82   : > { %9752 = vmatpush3.bf16.msra.mxu0 %v11200_v32  ;;  %v1173_v32 = vpack.c.bf16 %v1142_v29, %v1141_v28  ;;  %v1162_v28 = vld [vmem:[#allocation2 + $0xfa] sm:$0xff]  ;;  %v11941_v29 = vpack.c.bf16 %v1160_v26, %v1159_v24  ;;  %v12011_v24 = vpack.c.bf16 %v1494_v17, %v1493_v16  ;;  %v11212_v26 = vld [vmem:[%s13571_s2 + $0xa8] sm:$0xff]   ;;  %v2768_v16 = vld [vmem:[#allocation2 + $0xf1] sm:$0xff] }
  0x83   : > { %9753 = vmatprep.subr.bf16.mxu0 %v11201_v40  ;;  %v2769_v17 = vld [vmem:[#allocation2 + $0xf9] sm:$0xff] }
  0x85   : > { %9722 = vmatmul.mubr.msk.bf16.gmra.mrb[4].mxu0 %vm421_vm0, %v11834_v41 }
  0x86   : > { %9725 = vmatprep.mubr.msk.bf16.mxu0 %vm421_vm0, %v11839_v43  ;;  %9754 = vmatpush3.bf16.msra.mxu0 %v11201_v40  ;;  %v11897_v40 = vpack.c.bf16 %v1144_v36, %v1143_v34  ;;  %v1163_v34 = vld [vmem:[#allocation2 + $0x10a] sm:$0xff]  ;;  %v1164_v36 = vld [vmem:[#allocation2 + $0x112] sm:$0xff] }
  0x87   : > { %9755 = vmatprep.subr.bf16.mxu0 %v11202_v42 }
  0x8a   : > { %9756 = vmatpush3.bf16.msra.mxu0 %v11202_v42  ;;  %v11899_v42 = vpack.c.bf16 %v1146_v38, %v1145_v37  ;;  %v1165_v37 = vld [vmem:[#allocation2 + $0x122] sm:$0xff]  ;;  %v1166_v38 = vld [vmem:[#allocation2 + $0x12a] sm:$0xff] }
  0x8b   : > { %9789 = vmatprep.subr.bf16.mxu0 %v11203_v50  ;;  %v11951_v47 = vpack.c.bf16 %v1166_v38, %v1165_v37  ;;  %v11225_v37 = vld [vmem:[%s13571_s2 + $0x110] sm:$0xff]  }
  0x8d   : > { %9726 = vmatmul.mubr.msk.bf16.gmra.mrb[8].mxu0 %vm421_vm0, %v11848_v51 }
  0x8e   : > { %9729 = vmatprep.mubr.msk.bf16.mxu0 %vm421_vm0, %v11850_v52 }
  0x95   : > { %9730 = vmatmul.mubr.msk.bf16.gmra.mrb[12].mxu0 %vm421_vm0, %v11856_v57 }
  0x96   : > { %9733 = vmatprep.mubr.msk.bf16.mxu0 %vm421_vm0, %v11858_v58 }
  0x9d   : > { %9734 = vmatmul.mubr.msk.bf16.gmra.mrb[16].mxu0 %vm421_vm0, %v11864_v3 }
  0x9e   : > { %9737 = vmatprep.mubr.msk.bf16.mxu0 %vm421_vm0, %v11866_v4 }
  0xa5   : > { %9738 = vmatmul.mubr.msk.bf16.gmra.mrb[20].mxu0 %vm421_vm0, %v11872_v11 }
  0xa6   : > { %9741 = vmatprep.mubr.msk.bf16.mxu0 %vm421_vm0, %v11874_v12 }
  0xad   : > { %9742 = vmatmul.mubr.msk.bf16.gmra.mrb[24].mxu0 %vm421_vm0, %v11880_v21 }
  0xae   : > { %9745 = vmatprep.mubr.msk.bf16.mxu0 %vm421_vm0, %v11882_v22 }
  0xb5   : > { %9746 = vmatmul.mubr.msk.bf16.gmra.mrb[28].mxu0 %vm421_vm0, %v11892_v30 }
  0xb6   : > { %9757 = vmatprep.mubr.msk.bf16.mxu0 %vm421_vm0, %v1173_v32  ;;  %v11943_v32 = vpack.c.bf16 %v1162_v28, %v1161_v27  ;;  %v11213_v27 = vld [vmem:[%s13571_s2 + $0xb0] sm:$0xff]   ;;  %v2759_v28 = vld [vmem:[#allocation2 + $0x81] sm:$0xff] }
  0xbd   : > { %9758 = vmatmul.mubr.msk.bf16.vlgmr.msra.gmra.mrb[0].mxu0 %vm421_vm0, %v11897_v40 }
  0xbe   : > { %9790 = vmatpush3.bf16.msra.mxu0 %v11203_v50  ;;  %9761 = vmatprep.mubr.msk.bf16.mxu0 %vm421_vm0, %v11899_v42  ;;  %v11206_v50 = vld [vmem:[%s13571_s2 + $0x78] sm:$0xff]  }
  0xbf   : > { %9791 = vmatprep.subr.bf16.mxu0 %v11204_v44 }
  0xc2   : > { %9792 = vmatpush3.bf16.msra.mxu0 %v11204_v44  ;;  %v11949_v44 = vpack.c.bf16 %v1164_v36, %v1163_v34  ;;  %v2760_v34 = vld [vmem:[#allocation2 + $0x91] sm:$0xff]  ;;  %v2761_v36 = vld [vmem:[#allocation2 + $0x99] sm:$0xff] }
  0xc3   : > { %9793 = vmatprep.subr.bf16.mxu0 %v11205_v54 }
  0xc5   : > { %9762 = vmatmul.mubr.msk.bf16.gmra.mrb[4].mxu0 %vm421_vm0, %v11911_v55 }
  0xc6   : > { %9765 = vmatprep.mubr.msk.bf16.mxu0 %vm421_vm0, %v11913_v56  ;;  %9794 = vmatpush3.bf16.msra.mxu0 %v11205_v54  ;;  %v1170_v54 = vld [vmem:[#allocation2 + $0x15a] sm:$0xff] }
  0xc7   : > { %9795 = vmatprep.subr.bf16.mxu0 %v11206_v50  ;;  %v11959_v61 = vpack.c.bf16 %v1170_v54, %v1169_v53  ;;  %v2762_v53 = vld [vmem:[#allocation2 + $0xa9] sm:$0xff]  ;;  %v2763_v54 = vld [vmem:[#allocation2 + $0xb1] sm:$0xff] }
  0xca   : > { %9796 = vmatpush3.bf16.msra.mxu0 %v11206_v50  ;;  %v11957_v50 = vpack.c.bf16 %v1168_v49, %v1167_v48  ;;  %v2788_v48 = vpack.c.bf16 %v2761_v36, %v2760_v34  ;;  %v11226_v49 = vld [vmem:[%s13571_s2 + $0x118] sm:$0xff]  }
  0xcb   : > { %9829 = vmatprep.subr.bf16.mxu0 %v11207_v5 }
  0xcd   : > { %9766 = vmatmul.mubr.msk.bf16.gmra.mrb[8].mxu0 %vm421_vm0, %v11925_v6 }
  0xce   : > { %9769 = vmatprep.mubr.msk.bf16.mxu0 %vm421_vm0, %v11927_v9 }
  0xd5   : > { %9770 = vmatmul.mubr.msk.bf16.gmra.mrb[12].mxu0 %vm421_vm0, %v11933_v18 }
  0xd6   : > { %9773 = vmatprep.mubr.msk.bf16.mxu0 %vm421_vm0, %v11935_v23 }
  0xdd   : > { %9774 = vmatmul.mubr.msk.bf16.gmra.mrb[16].mxu0 %vm421_vm0, %v11941_v29 }
  0xde   : > { %9777 = vmatprep.mubr.msk.bf16.mxu0 %vm421_vm0, %v11943_v32 }
  0xe5   : > { %9778 = vmatmul.mubr.msk.bf16.gmra.mrb[20].mxu0 %vm421_vm0, %v11949_v44 }
  0xe6   : > { %9781 = vmatprep.mubr.msk.bf16.mxu0 %vm421_vm0, %v11951_v47 }
  0xed   : > { %9782 = vmatmul.mubr.msk.bf16.gmra.mrb[24].mxu0 %vm421_vm0, %v11957_v50 }
  0xee   : > { %9785 = vmatprep.mubr.msk.bf16.mxu0 %vm421_vm0, %v11959_v61 }
  0xf5   : > { %9786 = vmatmul.mubr.msk.bf16.gmra.mrb[28].mxu0 %vm421_vm0, %v11965_v0 }
  0xf6   : > { %9797 = vmatprep.mubr.msk.bf16.mxu0 %vm421_vm0, %v11820_v31  ;;  %v11210_v31 = vld [vmem:[%s13571_s2 + $0x98] sm:$0xff]  }
  0xfd   : > { %9798 = vmatmul.mubr.msk.bf16.vlgmr.msra.gmra.mrb[0].mxu0 %vm421_vm0, %v11825_v33 }
  0xfe   : > { %9830 = vmatpush3.bf16.msra.mxu0 %v11207_v5  ;;  %9801 = vmatprep.mubr.msk.bf16.mxu0 %vm421_vm0, %v11834_v41  ;;  %v11211_v5 = vld [vmem:[%s13571_s2 + $0xa0] sm:$0xff]  }
  0xff   : > { %9831 = vmatprep.subr.bf16.mxu0 %v11208_v10 }
 0x102   : > { %9832 = vmatpush3.bf16.msra.mxu0 %v11208_v10  ;;  %v2789_v10 = vpack.c.bf16 %v2763_v54, %v2762_v53 }
 0x103   : > { %9833 = vmatprep.subr.bf16.mxu0 %v11209_v15 }
 0x105   : > { %9802 = vmatmul.mubr.msk.bf16.gmra.mrb[4].mxu0 %vm421_vm0, %v11839_v43 }
 0x106   : > { %9805 = vmatprep.mubr.msk.bf16.mxu0 %vm421_vm0, %v11848_v51  ;;  %9834 = vmatpush3.bf16.msra.mxu0 %v11209_v15  ;;  %v2790_v15 = vpack.c.bf16 %v2765_v63, %v2764_v62 }
 0x107   : > { %9835 = vmatprep.subr.bf16.mxu0 %v11210_v31 }
 0x10a   : > { %9836 = vmatpush3.bf16.msra.mxu0 %v11210_v31  ;;  %v2766_v31 = vld [vmem:[#allocation2 + $0xd9] sm:$0xff] }
 0x10b   : > { %9869 = vmatprep.subr.bf16.mxu0 %v11211_v5 }
 0x10d   : > { %9806 = vmatmul.mubr.msk.bf16.gmra.mrb[8].mxu0 %vm421_vm0, %v11850_v52 }
 0x10e   : > { %9809 = vmatprep.mubr.msk.bf16.mxu0 %vm421_vm0, %v11856_v57 }
 0x115   : > { %9810 = vmatmul.mubr.msk.bf16.gmra.mrb[12].mxu0 %vm421_vm0, %v11858_v58 }
 0x116   : > { %9813 = vmatprep.mubr.msk.bf16.mxu0 %vm421_vm0, %v11864_v3 }
 0x11d   : > { %9814 = vmatmul.mubr.msk.bf16.gmra.mrb[16].mxu0 %vm421_vm0, %v11866_v4 }
 0x11e   : > { %9817 = vmatprep.mubr.msk.bf16.mxu0 %vm421_vm0, %v11872_v11 }
 0x125   : > { %9818 = vmatmul.mubr.msk.bf16.gmra.mrb[20].mxu0 %vm421_vm0, %v11874_v12 }
 0x126   : > { %9821 = vmatprep.mubr.msk.bf16.mxu0 %vm421_vm0, %v11880_v21 }
 0x12d   : > { %9822 = vmatmul.mubr.msk.bf16.gmra.mrb[24].mxu0 %vm421_vm0, %v11882_v22 }
 0x12e   : > { %9825 = vmatprep.mubr.msk.bf16.mxu0 %vm421_vm0, %v11892_v30 }
 0x135   : > { %9826 = vmatmul.mubr.msk.bf16.gmra.mrb[28].mxu0 %vm421_vm0, %v12011_v24 }
 0x136   : > { %9837 = vmatprep.mubr.msk.bf16.mxu0 %vm421_vm0, %v11735_v35  ;;  %v11214_v35 = vld [vmem:[%s13571_s2 + $0xb8] sm:$0xff]  }
 0x13d   : > { %9838 = vmatmul.mubr.msk.bf16.vlgmr.msra.gmra.mrb[0].mxu0 %vm421_vm0, %v11739_v39  ;;  %v11215_v39 = vld [vmem:[%s13571_s2 + $0xc0] sm:$0xff]  }
 0x13e   : > { %9870 = vmatpush3.bf16.msra.mxu0 %v11211_v5  ;;  %9841 = vmatprep.mubr.msk.bf16.mxu0 %vm421_vm0, %v11749_v45  ;;  %v1815_v45 = vld [vmem:[#allocation2 + $0x181] sm:$0xff] }
 0x13f   : > { %9871 = vmatprep.subr.bf16.mxu0 %v11212_v26  ;;  %v2767_v5 = vld [vmem:[#allocation2 + $0xe1] sm:$0xff] }
 0x142   : > { %9872 = vmatpush3.bf16.msra.mxu0 %v11212_v26  ;;  %v2792_v26 = vpack.c.bf16 %v2769_v17, %v2768_v16 }
 0x143   : > { %9873 = vmatprep.subr.bf16.mxu0 %v11213_v27 }
 0x145   : > { %9842 = vmatmul.mubr.msk.bf16.gmra.mrb[4].mxu0 %vm421_vm0, %v11751_v46  ;;  %v1816_v46 = vld [vmem:[#allocation2 + $0x189] sm:$0xff] }
 0x146   : > { %9845 = vmatprep.mubr.msk.bf16.mxu0 %vm421_vm0, %v11775_v59  ;;  %9874 = vmatpush3.bf16.msra.mxu0 %v11213_v27  ;;  %v12057_v59 = vpack.c.bf16 %v1816_v46, %v1815_v45  ;;  %v2770_v27 = vld [vmem:[#allocation2 + $0x109] sm:$0xff] }
 0x147   : > { %9875 = vmatprep.subr.bf16.mxu0 %v11214_v35  ;;  %v2773_v45 = vld [vmem:[#allocation2 + $0x129] sm:$0xff] }
 0x14a   : > { %9876 = vmatpush3.bf16.msra.mxu0 %v11214_v35  ;;  %v2771_v35 = vld [vmem:[#allocation2 + $0x111] sm:$0xff] }
 0x14b   : > { %9909 = vmatprep.subr.bf16.mxu0 %v11215_v39  ;;  %v2793_v46 = vpack.c.bf16 %v2771_v35, %v2770_v27 }
 0x14d   : > { %9846 = vmatmul.mubr.msk.bf16.gmra.mrb[8].mxu0 %vm421_vm0, %v11777_v60  ;;  %v11216_v60 = vld [vmem:[%s13571_s2 + $0xc8] sm:$0xff]  }
 0x14e   : > { %9849 = vmatprep.mubr.msk.bf16.mxu0 %vm421_vm0, %v11783_v1  ;;  %v11217_v1 = vld [vmem:[%s13571_s2 + $0xd0] sm:$0xff]  }
 0x155   : > { %9850 = vmatmul.mubr.msk.bf16.gmra.mrb[12].mxu0 %vm421_vm0, %v11785_v2  ;;  %v11218_v2 = vld [vmem:[%s13571_s2 + $0xd8] sm:$0xff]  }
 0x156   : > { %9853 = vmatprep.mubr.msk.bf16.mxu0 %vm421_vm0, %v11791_v7  ;;  %v11219_v7 = vld [vmem:[%s13571_s2 + $0xe0] sm:$0xff]  }
 0x15d   : > { %9854 = vmatmul.mubr.msk.bf16.gmra.mrb[16].mxu0 %vm421_vm0, %v11793_v8  ;;  %v2137_v8 = vld [vmem:[#allocation2 + $0x182] sm:$0xff] }
 0x15e   : > { %9857 = vmatprep.mubr.msk.bf16.mxu0 %vm421_vm0, %v11799_v13  ;;  %v2138_v13 = vld [vmem:[#allocation2 + $0x18a] sm:$0xff] }
 0x165   : > { %9858 = vmatmul.mubr.msk.bf16.gmra.mrb[20].mxu0 %vm421_vm0, %v11801_v14  ;;  %v12103_v14 = vpack.c.bf16 %v2138_v13, %v2137_v8  ;;  %v2777_v8 = vld [vmem:[#allocation2 + $0x159] sm:$0xff] }
 0x166   : > { %9861 = vmatprep.mubr.msk.bf16.mxu0 %vm421_vm0, %v11807_v19  ;;  %v11220_v19 = vld [vmem:[%s13571_s2 + $0xe8] sm:$0xff]  }
 0x16d   : > { %9862 = vmatmul.mubr.msk.bf16.gmra.mrb[24].mxu0 %vm421_vm0, %v11809_v20  ;;  %v11221_v20 = vld [vmem:[%s13571_s2 + $0xf0] sm:$0xff]  }
 0x16e   : > { %9865 = vmatprep.mubr.msk.bf16.mxu0 %vm421_vm0, %v11815_v25  ;;  %v11222_v25 = vld [vmem:[%s13571_s2 + $0xf8] sm:$0xff]  }
 0x175   : > { %9866 = vmatmul.mubr.msk.bf16.gmra.mrb[28].mxu0 %vm421_vm0, %v12057_v59 }
 0x176   : > { %9877 = vmatprep.mubr.msk.bf16.mxu0 %vm421_vm0, %v11897_v40  ;;  %v2758_v40 = vld [vmem:[#allocation2 + $0x79] sm:$0xff] }
 0x177   : > { %v2787_v38 = vpack.c.bf16 %v2759_v28, %v2758_v40 }
 0x17d   : > { %9878 = vmatmul.mubr.msk.bf16.vlgmr.msra.gmra.mrb[0].mxu0 %vm421_vm0, %v11899_v42 }
 0x17e   : > { %9910 = vmatpush3.bf16.msra.mxu0 %v11215_v39  ;;  %9881 = vmatprep.mubr.msk.bf16.mxu0 %vm421_vm0, %v11911_v55  ;;  %v2772_v39 = vld [vmem:[#allocation2 + $0x121] sm:$0xff] }
 0x17f   : > { %9911 = vmatprep.subr.bf16.mxu0 %v11216_v60 }
 0x182   : > { %9912 = vmatpush3.bf16.msra.mxu0 %v11216_v60  ;;  %v2794_v60 = vpack.c.bf16 %v2773_v45, %v2772_v39 }
 0x183   : > { %9913 = vmatprep.subr.bf16.mxu0 %v11217_v1 }
 0x185   : > { %9882 = vmatmul.mubr.msk.bf16.gmra.mrb[4].mxu0 %vm421_vm0, %v11913_v56 }
 0x186   : > { %9885 = vmatprep.mubr.msk.bf16.mxu0 %vm421_vm0, %v11925_v6  ;;  %9914 = vmatpush3.bf16.msra.mxu0 %v11217_v1  ;;  %v2774_v1 = vld [vmem:[#allocation2 + $0x139] sm:$0xff] }
 0x187   : > { %9915 = vmatprep.subr.bf16.mxu0 %v11218_v2 }
 0x18a   : > { %9916 = vmatpush3.bf16.msra.mxu0 %v11218_v2  ;;  %v2775_v2 = vld [vmem:[#allocation2 + $0x141] sm:$0xff] }
 0x18b   : > { %9949 = vmatprep.subr.bf16.mxu0 %v11219_v7  ;;  %v2795_v13 = vpack.c.bf16 %v2775_v2, %v2774_v1 }
 0x18d   : > { %9886 = vmatmul.mubr.msk.bf16.gmra.mrb[8].mxu0 %vm421_vm0, %v11927_v9 }
 0x18e   : > { %9889 = vmatprep.mubr.msk.bf16.mxu0 %vm421_vm0, %v11933_v18 }
 0x195   : > { %9890 = vmatmul.mubr.msk.bf16.gmra.mrb[12].mxu0 %vm421_vm0, %v11935_v23 }
 0x196   : > { %9893 = vmatprep.mubr.msk.bf16.mxu0 %vm421_vm0, %v11941_v29 }
 0x19d   : > { %9894 = vmatmul.mubr.msk.bf16.gmra.mrb[16].mxu0 %vm421_vm0, %v11943_v32 }
 0x19e   : > { %9897 = vmatprep.mubr.msk.bf16.mxu0 %vm421_vm0, %v11949_v44 }
 0x1a5   : > { %9898 = vmatmul.mubr.msk.bf16.gmra.mrb[20].mxu0 %vm421_vm0, %v11951_v47 }
 0x1a6   : > { %9901 = vmatprep.mubr.msk.bf16.mxu0 %vm421_vm0, %v11957_v50 }
 0x1ad   : > { %9902 = vmatmul.mubr.msk.bf16.gmra.mrb[24].mxu0 %vm421_vm0, %v11959_v61 }
 0x1ae   : > { %9905 = vmatprep.mubr.msk.bf16.mxu0 %vm421_vm0, %v11965_v0 }
 0x1b5   : > { %9906 = vmatmul.mubr.msk.bf16.gmra.mrb[28].mxu0 %vm421_vm0, %v12103_v14 }
 0x1b6   : > { %9917 = vmatprep.mubr.msk.bf16.mxu0 %vm421_vm0, %v11825_v33  ;;  %v11223_v33 = vld [vmem:[%s13571_s2 + $0x100] sm:$0xff]  }
 0x1bd   : > { %9918 = vmatmul.mubr.msk.bf16.vlgmr.msra.gmra.mrb[0].mxu0 %vm421_vm0, %v11834_v41  ;;  %v2460_v41 = vld [vmem:[#allocation2 + $0x198] sm:$0xff] }
 0x1be   : > { %9950 = vmatpush3.bf16.msra.mxu0 %v11219_v7  ;;  %9921 = vmatprep.mubr.msk.bf16.mxu0 %vm421_vm0, %v11839_v43  ;;  %v2461_v43 = vld [vmem:[#allocation2 + $0x1a0] sm:$0xff]  ;;  %v2776_v7 = vld [vmem:[#allocation2 + $0x151] sm:$0xff] }
 0x1bf   : > { %9951 = vmatprep.subr.bf16.mxu0 %v11220_v19 }
 0x1c2   : > { %9952 = vmatpush3.bf16.msra.mxu0 %v11220_v19  ;;  %v2796_v19 = vpack.c.bf16 %v2777_v8, %v2776_v7 }
 0x1c3   : > { %9953 = vmatprep.subr.bf16.mxu0 %v11221_v20 }
 0x1c5   : > { %9922 = vmatmul.mubr.msk.bf16.gmra.mrb[4].mxu0 %vm421_vm0, %v11848_v51  ;;  %v2752_v51 = vld [vmem:[#allocation2 + $0x31] sm:$0xff] }
 0x1c6   : > { %9925 = vmatprep.mubr.msk.bf16.mxu0 %vm421_vm0, %v11850_v52  ;;  %9954 = vmatpush3.bf16.msra.mxu0 %v11221_v20  ;;  %v2753_v52 = vld [vmem:[#allocation2 + $0x39] sm:$0xff]  ;;  %v2778_v20 = vld [vmem:[#allocation2 + $0x169] sm:$0xff] }
 0x1c7   : > { %9955 = vmatprep.subr.bf16.mxu0 %v11222_v25 }
 0x1ca   : > { %9956 = vmatpush3.bf16.msra.mxu0 %v11222_v25  ;;  %v2779_v25 = vld [vmem:[#allocation2 + $0x171] sm:$0xff] }
 0x1cb   : > { %9989 = vmatprep.subr.bf16.mxu0 %v11223_v33 }
 0x1cd   : > { %9926 = vmatmul.mubr.msk.bf16.gmra.mrb[8].mxu0 %vm421_vm0, %v11856_v57  ;;  %v2477_v57 = vpack.c.bf16 %v2461_v43, %v2460_v41  ;;  %v2782_v41 = vld [vmem:[#allocation2 + $0x199] sm:$0xff]  ;;  %v2783_v43 = vld [vmem:[#allocation2 + $0x1a1] sm:$0xff] }
 0x1ce   : > { %9929 = vmatprep.mubr.msk.bf16.mxu0 %vm421_vm0, %v11858_v58  ;;  %v2784_v58 = vpack.c.bf16 %v2753_v52, %v2752_v51  ;;  %v2799_v51 = vpack.c.bf16 %v2783_v43, %v2782_v41 }
 0x1d5   : > { %9930 = vmatmul.mubr.msk.bf16.gmra.mrb[12].mxu0 %vm421_vm0, %v11864_v3  ;;  %v2754_v3 = vld [vmem:[#allocation2 + $0x49] sm:$0xff] }
 0x1d6   : > { %9933 = vmatprep.mubr.msk.bf16.mxu0 %vm421_vm0, %v11866_v4  ;;  %v2755_v4 = vld [vmem:[#allocation2 + $0x51] sm:$0xff] }
 0x1dd   : > { %9934 = vmatmul.mubr.msk.bf16.gmra.mrb[16].mxu0 %vm421_vm0, %v11872_v11  ;;  %v2756_v11 = vld [vmem:[#allocation2 + $0x61] sm:$0xff] }
 0x1de   : > { %9937 = vmatprep.mubr.msk.bf16.mxu0 %vm421_vm0, %v11874_v12  ;;  %v2757_v12 = vld [vmem:[#allocation2 + $0x69] sm:$0xff] }
 0x1e5   : > { %9938 = vmatmul.mubr.msk.bf16.gmra.mrb[20].mxu0 %vm421_vm0, %v11880_v21  ;;  %v2785_v21 = vpack.c.bf16 %v2755_v4, %v2754_v3 }
 0x1e6   : > { %9941 = vmatprep.mubr.msk.bf16.mxu0 %vm421_vm0, %v11882_v22  ;;  %v2786_v22 = vpack.c.bf16 %v2757_v12, %v2756_v11 }
 0x1ed   : > { %9942 = vmatmul.mubr.msk.bf16.gmra.mrb[24].mxu0 %vm421_vm0, %v11892_v30  ;;  %v11224_v30 = vld [vmem:[%s13571_s2 + $0x108] sm:$0xff]  }
 0x1ee   : > { %9945 = vmatprep.mubr.msk.bf16.mxu0 %vm421_vm0, %v12011_v24  ;;  %v2791_v24 = vpack.c.bf16 %v2767_v5, %v2766_v31 }
 0x1f5   : > { %9946 = vmatmul.mubr.msk.bf16.gmra.mrb[28].mxu0 %vm421_vm0, %v2477_v57 }
 0x1f6   : > { %9957 = vmatprep.mubr.msk.bf16.mxu0 %vm421_vm0, %v2784_v58 }
 0x1fd   : > { %9958 = vmatmul.mubr.msk.bf16.vlgmr.msra.gmra.mrb[0].mxu0 %vm421_vm0, %v2785_v21 }
 0x1fe   : > { %9990 = vmatpush3.bf16.msra.mxu0 %v11223_v33  ;;  %9961 = vmatprep.mubr.msk.bf16.mxu0 %vm421_vm0, %v2786_v22  ;;  %v2797_v33 = vpack.c.bf16 %v2779_v25, %v2778_v20 }
 0x1ff   : > { %9991 = vmatprep.subr.bf16.mxu0 %v11224_v30 }
 0x202   : > { %9992 = vmatpush3.bf16.msra.mxu0 %v11224_v30 }
 0x203   : > { %9993 = vmatprep.subr.bf16.mxu0 %v11225_v37 }
 0x205   : > { %9962 = vmatmul.mubr.msk.bf16.gmra.mrb[4].mxu0 %vm421_vm0, %v2787_v38 }
 0x206   : > { %9965 = vmatprep.mubr.msk.bf16.mxu0 %vm421_vm0, %v2788_v48  ;;  %9994 = vmatpush3.bf16.msra.mxu0 %v11225_v37 }
 0x207   : > { %9995 = vmatprep.subr.bf16.mxu0 %v11226_v49 }
 0x20a   : > { %9996 = vmatpush3.bf16.msra.mxu0 %v11226_v49 }
 0x20d   : > { %9966 = vmatmul.mubr.msk.bf16.gmra.mrb[8].mxu0 %vm421_vm0, %v2789_v10 }
 0x20e   : > { %9969 = vmatprep.mubr.msk.bf16.mxu0 %vm421_vm0, %v2790_v15 }
 0x215   : > { %9970 = vmatmul.mubr.msk.bf16.gmra.mrb[12].mxu0 %vm421_vm0, %v2791_v24 }
 0x216   : > { %9973 = vmatprep.mubr.msk.bf16.mxu0 %vm421_vm0, %v2792_v26 }
 0x21d   : > { %9974 = vmatmul.mubr.msk.bf16.gmra.mrb[16].mxu0 %vm421_vm0, %v2793_v46 }
 0x21e   : > { %9977 = vmatprep.mubr.msk.bf16.mxu0 %vm421_vm0, %v2794_v60 }
 0x225   : > { %9978 = vmatmul.mubr.msk.bf16.gmra.mrb[20].mxu0 %vm421_vm0, %v2795_v13 }
 0x226   : > { %9981 = vmatprep.mubr.msk.bf16.mxu0 %vm421_vm0, %v2796_v19 }
 0x22d   : > { %9982 = vmatmul.mubr.msk.bf16.gmra.mrb[24].mxu0 %vm421_vm0, %v2797_v33 }
 0x22e   : > { %9985 = vmatprep.mubr.msk.bf16.mxu0 %vm421_vm0, %v12057_v59 }
 0x235   : > { %9986 = vmatmul.mubr.msk.bf16.gmra.mrb[28].mxu0 %vm421_vm0, %v2799_v51 }
 0x236   : > { %9997 = vmatprep.mubr.msk.bf16.mxu0 %vm421_vm0, %v11899_v42  ;;  %v3104_v42 = vld [vmem:[#allocation2 + $0x19a] sm:$0xff] }
 0x23d   : > { %9998 = vmatmul.mubr.msk.bf16.vlgmr.msra.gmra.mrb[0].mxu0 %vm421_vm0, %v11911_v55  ;;  %v3105_v55 = vld [vmem:[#allocation2 + $0x1a2] sm:$0xff] }
 0x23e   : > { %10001 = vmatprep.mubr.msk.bf16.mxu0 %vm421_vm0, %v11913_v56  ;;  %v3121_v56 = vpack.c.bf16 %v3105_v55, %v3104_v42 }
 0x245   : > { %10002 = vmatmul.mubr.msk.bf16.gmra.mrb[4].mxu0 %vm421_vm0, %v11925_v6  ;;  %v11227_v6 = vld [vmem:[%s13573_s4 + $0x20] sm:$0xff]  }
 0x246   : > { %10005 = vmatprep.mubr.msk.bf16.mxu0 %vm421_vm0, %v11927_v9  ;;  %10029 = vmatprep.subr.bf16.mxu0 %v11227_v6  ;;  %v11228_v9 = vld [vmem:[%s13573_s4 + $0x28] sm:$0xff]  }
 0x247   : > { %10597 = vmatprep.subr.bf16.mxu1 %v11227_v6  ;;  %10030 = vmatpush3.bf16.msra.mxu0 %v11227_v6 }
 0x248   : > { %10601 = vmatpush3.bf16.msra.mxu1 %v11227_v6  ;;  %10031 = vmatprep.subr.bf16.mxu0 %v11228_v9 }
 0x249   : > { %10598 = vmatprep.subr.bf16.mxu1 %v11228_v9 }
 0x24b   : > { %10032 = vmatpush3.bf16.msra.mxu0 %v11228_v9 }
 0x24c   : > { %10602 = vmatpush3.bf16.msra.mxu1 %v11228_v9 }
 0x24d   : > { %10006 = vmatmul.mubr.msk.bf16.gmra.mrb[8].mxu0 %vm421_vm0, %v11933_v18  ;;  %v11229_v18 = vld [vmem:[%s13573_s4 + $0x30] sm:$0xff]  }
 0x24e   : > { %10009 = vmatprep.mubr.msk.bf16.mxu0 %vm421_vm0, %v11935_v23  ;;  %10033 = vmatprep.subr.bf16.mxu0 %v11229_v18  ;;  %v11230_v23 = vld [vmem:[%s13573_s4 + $0x38] sm:$0xff]  }
 0x24f   : > { %10599 = vmatprep.subr.bf16.mxu1 %v11229_v18  ;;  %10034 = vmatpush3.bf16.msra.mxu0 %v11229_v18 }
 0x250   : > { %10603 = vmatpush3.bf16.msra.mxu1 %v11229_v18  ;;  %10035 = vmatprep.subr.bf16.mxu0 %v11230_v23 }
 0x251   : > { %10600 = vmatprep.subr.bf16.mxu1 %v11230_v23 }
 0x253   : > { %10036 = vmatpush3.bf16.msra.mxu0 %v11230_v23 }
 0x254   : > { %10604 = vmatpush3.bf16.msra.mxu1 %v11230_v23 }
 0x255   : > { %10010 = vmatmul.mubr.msk.bf16.gmra.mrb[12].mxu0 %vm421_vm0, %v11941_v29  ;;  %v3555_v29 = vld [vmem:[#allocation2 + $0x1] sm:$0xff] }
 0x256   : > { %10013 = vmatprep.mubr.msk.bf16.mxu0 %vm421_vm0, %v11943_v32  ;;  %v3556_v32 = vld [vmem:[#allocation2 + $0x9] sm:$0xff] }
 0x25d   : > { %10014 = vmatmul.mubr.msk.bf16.gmra.mrb[16].mxu0 %vm421_vm0, %v11949_v44  ;;  %v3587_v44 = vpack.c.bf16 %v3556_v32, %v3555_v29 }
 0x25e   : > { %10017 = vmatprep.mubr.msk.bf16.mxu0 %vm421_vm0, %v11951_v47  ;;  %v12223_v47 = vld [vmem:[%s13573_s4] sm:$0xff]  }
 0x25f   : > { %10069 = vmatprep.subr.bf16.mxu1 %v12223_v47 }
 0x265   : > { %10018 = vmatmul.mubr.msk.bf16.gmra.mrb[20].mxu0 %vm421_vm0, %v11957_v50  ;;  %v12229_v50 = vld [vmem:[%s13572_s3] ss:$0 sm:$0xff] }
 0x266   : > { %10021 = vmatprep.mubr.msk.bf16.mxu0 %vm421_vm0, %v11959_v61 }
 0x26d   : > { %10022 = vmatmul.mubr.msk.bf16.gmra.mrb[24].mxu0 %vm421_vm0, %v11965_v0 }
 0x26e   : > { %10025 = vmatprep.mubr.msk.bf16.mxu0 %vm421_vm0, %v12103_v14 }
 0x275   : > { %10026 = vmatmul.mubr.msk.bf16.gmra.mrb[28].mxu0 %vm421_vm0, %v3121_v56 }
 0x276   : > { %10037 = vmatprep.mubr.msk.bf16.mxu0 %vm421_vm0, %v3587_v44 }
 0x310   : > { %v9999_v61 = vpop.f32.mrb[0].mxu0 }
 0x311   : > { %v3405_v0 = vadd.f32 %v9999_v61, %v12229_v50  ;;  %v3237_v59 = vpop.f32.mrb[1].mxu0 }
 0x312   : > { %v3403_v14 = vadd.f32 %v12229_v50, %v3237_v59  ;;  %v10000_v52 = vpop.f32.mrb[2].mxu0 }
 0x313   : > { %v3437_v57 = vmax.f32 %v3405_v0, 0.0  ;;  %v3406_v58 = vadd.f32 %v10000_v52, %v12229_v50  ;;  %v3240_v3 = vpop.f32.mrb[3].mxu0 }
 0x314   : > { %v3435_v4 = vmax.f32 %v3403_v14, 0.0  ;;  %v3404_v11 = vadd.f32 %v12229_v50, %v3240_v3 }
 0x315   : > { %3469 = vst.msk [vmem:[#allocation2 + $0x31] sm:$0xff] %vm421_vm0, %v3437_v57  ;;  %v3438_v12 = vmax.f32 %v3406_v58, 0.0  ;;  %7063 = vrot.lane.b32.xlu1 %v3437_v57, %s11436_s27 }
 0x316   : > { %3467 = vst.msk [vmem:[#allocation2 + $0x19] sm:$0xff] %vm421_vm0, %v3435_v4  ;;  %v3436_v21 = vmax.f32 %v3404_v11, 0.0  ;;  %7059 = vrot.lane.b32.xlu0 %v3435_v4, %s11436_s27 }
 0x317   : > { %3470 = vst.msk [vmem:[#allocation2 + $0x39] sm:$0xff] %vm421_vm0, %v3438_v12 }
 0x318   : > { %3468 = vst.msk [vmem:[#allocation2 + $0x21] sm:$0xff] %vm421_vm0, %v3436_v21  ;;  %v10003_v22 = vpop.f32.mrb[4].mxu0 }
 0x319   : > { %v3409_v30 = vadd.f32 %v10003_v22, %v12229_v50  ;;  %7065 = vrot.lane.b32.xlu1 %v3438_v12, %s11436_s27  ;;  %v3253_v40 = vpop.f32.mrb[5].mxu0 }
 0x31a   : > { %v3407_v28 = vadd.f32 %v12229_v50, %v3253_v40  ;;  %7061 = vrot.lane.b32.xlu0 %v3436_v21, %s11436_s27  ;;  %v10004_v34 = vpop.f32.mrb[6].mxu0 }
 0x31b   : > { %v3441_v36 = vmax.f32 %v3409_v30, 0.0  ;;  %v3410_v37 = vadd.f32 %v10004_v34, %v12229_v50  ;;  %v3256_v38 = vpop.f32.mrb[7].mxu0 }
 0x31c   : > { %v3439_v48 = vmax.f32 %v3407_v28, 0.0  ;;  %v3408_v49 = vadd.f32 %v12229_v50, %v3256_v38  ;;  %v3559_v5 = vld [vmem:[#allocation2 + $0x31] sm:$0xff] }
 0x31d   : > { %3473 = vst.msk [vmem:[#allocation2 + $0x61] sm:$0xff] %vm421_vm0, %v3441_v36  ;;  %v3442_v53 = vmax.f32 %v3410_v37, 0.0  ;;  %v3557_v63 = vld [vmem:[#allocation2 + $0x19] sm:$0xff] }
 0x31e   : > { %3471 = vst.msk [vmem:[#allocation2 + $0x49] sm:$0xff] %vm421_vm0, %v3439_v48  ;;  %v3440_v54 = vmax.f32 %v3408_v49, 0.0  ;;  %7071 = vrot.lane.b32.xlu0 %v3441_v36, %s11436_s27  ;;  %v3560_v62 = vld [vmem:[#allocation2 + $0x39] sm:$0xff] }
 0x31f   : > { %3474 = vst.msk [vmem:[#allocation2 + $0x69] sm:$0xff] %vm421_vm0, %v3442_v53  ;;  %7073 = vrot.lane.b32.xlu1 %v3442_v53, %s11436_s27  ;;  %v3558_v10 = vld [vmem:[#allocation2 + $0x21] sm:$0xff]  ;;  %v12256_v24 = vpack.c.bf16 %v3560_v62, %v3559_v5 }
 0x320   : > { %3472 = vst.msk [vmem:[#allocation2 + $0x51] sm:$0xff] %vm421_vm0, %v3440_v54  ;;  %v10007_v15 = vpop.f32.mrb[8].mxu0  ;;  %v12253_v31 = vpack.c.bf16 %v3558_v10, %v3557_v63 }
 0x321   : > { %v3413_v16 = vadd.f32 %v10007_v15, %v12229_v50  ;;  %v3269_v17 = vpop.f32.mrb[9].mxu0 }
 0x322   : > { %v3411_v26 = vadd.f32 %v12229_v50, %v3269_v17  ;;  %10038 = vmatmul.mubr.msk.bf16.vlgmr.msra.gmra.mrb[32].mxu0 %vm421_vm0, %v12253_v31  ;;  %7067 = vrot.lane.b32.xlu0 %v3439_v48, %s11436_s27  ;;  %v10008_v27 = vpop.f32.mrb[10].mxu0 }
 0x323   : > { %v3445_v35 = vmax.f32 %v3413_v16, 0.0  ;;  %v3414_v39 = vadd.f32 %v10008_v27, %v12229_v50  ;;  %10041 = vmatprep.mubr.msk.bf16.mxu0 %vm421_vm0, %v12256_v24  ;;  %7069 = vrot.lane.b32.xlu1 %v3440_v54, %s11436_s27  ;;  %v3272_v45 = vpop.f32.mrb[11].mxu0 }
 0x324   : > { %v3443_v46 = vmax.f32 %v3411_v26, 0.0  ;;  %v3412_v60 = vadd.f32 %v12229_v50, %v3272_v45  ;;  %v3563_v25 = vld [vmem:[#allocation2 + $0x61] sm:$0xff] }
 0x325   : > { %3477 = vst.msk [vmem:[#allocation2 + $0x91] sm:$0xff] %vm421_vm0, %v3445_v35  ;;  %v3446_v1 = vmax.f32 %v3414_v39, 0.0  ;;  %v3561_v8 = vld [vmem:[#allocation2 + $0x49] sm:$0xff] }
 0x326   : > { %3475 = vst.msk [vmem:[#allocation2 + $0x79] sm:$0xff] %vm421_vm0, %v3443_v46  ;;  %v3444_v2 = vmax.f32 %v3412_v60, 0.0  ;;  %7079 = vrot.lane.b32.xlu0 %v3445_v35, %s11436_s27  ;;  %v3564_v7 = vld [vmem:[#allocation2 + $0x69] sm:$0xff] }
 0x327   : > { %3478 = vst.msk [vmem:[#allocation2 + $0x99] sm:$0xff] %vm421_vm0, %v3446_v1  ;;  %7081 = vrot.lane.b32.xlu1 %v3446_v1, %s11436_s27  ;;  %v3562_v13 = vld [vmem:[#allocation2 + $0x51] sm:$0xff]  ;;  %v12276_v43 = vpack.c.bf16 %v3564_v7, %v3563_v25 }
 0x328   : > { %3476 = vst.msk [vmem:[#allocation2 + $0x81] sm:$0xff] %vm421_vm0, %v3444_v2  ;;  %v10011_v19 = vpop.f32.mrb[12].mxu0  ;;  %v12273_v20 = vpack.c.bf16 %v3562_v13, %v3561_v8 }
 0x329   : > { %v3417_v33 = vadd.f32 %v10011_v19, %v12229_v50  ;;  %v3285_v41 = vpop.f32.mrb[13].mxu0 }
 0x32a   : > { %v3415_v51 = vadd.f32 %v12229_v50, %v3285_v41  ;;  %10042 = vmatmul.mubr.msk.bf16.gmra.mrb[36].mxu0 %vm421_vm0, %v12273_v20  ;;  %7075 = vrot.lane.b32.xlu0 %v3443_v46, %s11436_s27  ;;  %v10012_v42 = vpop.f32.mrb[14].mxu0 }
 0x32b   : > { %v3449_v55 = vmax.f32 %v3417_v33, 0.0  ;;  %v3418_v56 = vadd.f32 %v10012_v42, %v12229_v50  ;;  %10045 = vmatprep.mubr.msk.bf16.mxu0 %vm421_vm0, %v12276_v43  ;;  %7077 = vrot.lane.b32.xlu1 %v3444_v2, %s11436_s27  ;;  %v3288_v6 = vpop.f32.mrb[15].mxu0 }
 0x32c   : > { %v3447_v9 = vmax.f32 %v3415_v51, 0.0  ;;  %v3416_v18 = vadd.f32 %v12229_v50, %v3288_v6  ;;  %v3567_v14 = vld [vmem:[#allocation2 + $0x91] sm:$0xff] }
 0x32d   : > { %3481 = vst.msk [vmem:[#allocation2 + $0xc1] sm:$0xff] %vm421_vm0, %v3449_v55  ;;  %v3450_v23 = vmax.f32 %v3418_v56, 0.0  ;;  %v3565_v44 = vld [vmem:[#allocation2 + $0x79] sm:$0xff] }
 0x32e   : > { %3479 = vst.msk [vmem:[#allocation2 + $0xa9] sm:$0xff] %vm421_vm0, %v3447_v9  ;;  %v3448_v29 = vmax.f32 %v3416_v18, 0.0  ;;  %7087 = vrot.lane.b32.xlu0 %v3449_v55, %s11436_s27  ;;  %v3568_v32 = vld [vmem:[#allocation2 + $0x99] sm:$0xff] }
 0x32f   : > { %3482 = vst.msk [vmem:[#allocation2 + $0xc9] sm:$0xff] %vm421_vm0, %v3450_v23  ;;  %7089 = vrot.lane.b32.xlu1 %v3450_v23, %s11436_s27  ;;  %v3566_v61 = vld [vmem:[#allocation2 + $0x81] sm:$0xff]  ;;  %v12296_v58 = vpack.c.bf16 %v3568_v32, %v3567_v14 }
 0x330   : > { %3480 = vst.msk [vmem:[#allocation2 + $0xb1] sm:$0xff] %vm421_vm0, %v3448_v29  ;;  %v10015_v0 = vpop.f32.mrb[16].mxu0  ;;  %v12293_v59 = vpack.c.bf16 %v3566_v61, %v3565_v44  ;;  %v11232_v61 = vld [vmem:[%s13573_s4 + $0x8] sm:$0xff]  }
 0x331   : > { %v3421_v52 = vadd.f32 %v10015_v0, %v12229_v50  ;;  %v3301_v57 = vpop.f32.mrb[17].mxu0 }
 0x332   : > { %v3419_v3 = vadd.f32 %v12229_v50, %v3301_v57  ;;  %10046 = vmatmul.mubr.msk.bf16.gmra.mrb[40].mxu0 %vm421_vm0, %v12293_v59  ;;  %7083 = vrot.lane.b32.xlu0 %v3447_v9, %s11436_s27  ;;  %v10016_v4 = vpop.f32.mrb[18].mxu0 }
 0x333   : > { %v3453_v11 = vmax.f32 %v3421_v52, 0.0  ;;  %v3422_v12 = vadd.f32 %v10016_v4, %v12229_v50  ;;  %10049 = vmatprep.mubr.msk.bf16.mxu0 %vm421_vm0, %v12296_v58  ;;  %7085 = vrot.lane.b32.xlu1 %v3448_v29, %s11436_s27  ;;  %v3304_v21 = vpop.f32.mrb[19].mxu0 }
 0x334   : > { %v3451_v22 = vmax.f32 %v3419_v3, 0.0  ;;  %v3420_v30 = vadd.f32 %v12229_v50, %v3304_v21  ;;  %v3571_v49 = vld [vmem:[#allocation2 + $0xc1] sm:$0xff] }
 0x335   : > { %3485 = vst.msk [vmem:[#allocation2 + $0xf1] sm:$0xff] %vm421_vm0, %v3453_v11  ;;  %v3454_v40 = vmax.f32 %v3422_v12, 0.0  ;;  %v3569_v36 = vld [vmem:[#allocation2 + $0xa9] sm:$0xff] }
 0x336   : > { %3483 = vst.msk [vmem:[#allocation2 + $0xd9] sm:$0xff] %vm421_vm0, %v3451_v22  ;;  %v3452_v28 = vmax.f32 %v3420_v30, 0.0  ;;  %7095 = vrot.lane.b32.xlu0 %v3453_v11, %s11436_s27  ;;  %v3572_v34 = vld [vmem:[#allocation2 + $0xc9] sm:$0xff] }
 0x337   : > { %3486 = vst.msk [vmem:[#allocation2 + $0xf9] sm:$0xff] %vm421_vm0, %v3454_v40  ;;  %7097 = vrot.lane.b32.xlu1 %v3454_v40, %s11436_s27  ;;  %v3570_v37 = vld [vmem:[#allocation2 + $0xb1] sm:$0xff]  ;;  %v12316_v62 = vpack.c.bf16 %v3572_v34, %v3571_v49 }
 0x338   : > { %3484 = vst.msk [vmem:[#allocation2 + $0xe1] sm:$0xff] %vm421_vm0, %v3452_v28  ;;  %v10019_v38 = vpop.f32.mrb[20].mxu0  ;;  %v12313_v48 = vpack.c.bf16 %v3570_v37, %v3569_v36  ;;  %v11233_v30 = vld [vmem:[%s13573_s4 + $0x10] sm:$0xff]  }
 0x339   : > { %v3425_v53 = vadd.f32 %v10019_v38, %v12229_v50  ;;  %v3317_v54 = vpop.f32.mrb[21].mxu0  ;;  %v11234_v38 = vld [vmem:[%s13573_s4 + $0x18] sm:$0xff]  }
 0x33a   : > { %v3423_v63 = vadd.f32 %v12229_v50, %v3317_v54  ;;  %10050 = vmatmul.mubr.msk.bf16.gmra.mrb[44].mxu0 %vm421_vm0, %v12313_v48  ;;  %7091 = vrot.lane.b32.xlu0 %v3451_v22, %s11436_s27  ;;  %v10020_v10 = vpop.f32.mrb[22].mxu0  ;;  %v3500_v54 = vld [vmem:[#allocation2 + $0x8] sm:$0xff] }
 0x33b   : > { %v3457_v15 = vmax.f32 %v3425_v53, 0.0  ;;  %v3426_v5 = vadd.f32 %v10020_v10, %v12229_v50  ;;  %10053 = vmatprep.mubr.msk.bf16.mxu0 %vm421_vm0, %v12316_v62  ;;  %7093 = vrot.lane.b32.xlu1 %v3452_v28, %s11436_s27  ;;  %v3320_v16 = vpop.f32.mrb[23].mxu0  ;;  %v3499_v53 = vld [vmem:[#allocation2] sm:$0xff] }
 0x33c   : > { %v3455_v17 = vmax.f32 %v3423_v63, 0.0  ;;  %v3424_v26 = vadd.f32 %v12229_v50, %v3320_v16  ;;  %v3575_v39 = vld [vmem:[#allocation2 + $0xf1] sm:$0xff]  ;;  %v11235_v63 = vld [vmem:[%s13573_s4 + $0x40] sm:$0xff]  }
 0x33d   : > { %3489 = vst.msk [vmem:[#allocation2 + $0x121] sm:$0xff] %vm421_vm0, %v3457_v15  ;;  %v3458_v27 = vmax.f32 %v3426_v5, 0.0  ;;  %v3573_v60 = vld [vmem:[#allocation2 + $0xd9] sm:$0xff]  ;;  %v3531_v5 = vpack.c.bf16 %v3500_v54, %v3499_v53 }
 0x33e   : > { %3487 = vst.msk [vmem:[#allocation2 + $0x109] sm:$0xff] %vm421_vm0, %v3455_v17  ;;  %v3456_v35 = vmax.f32 %v3424_v26, 0.0  ;;  %7103 = vrot.lane.b32.xlu0 %v3457_v15, %s11436_s27  ;;  %v3576_v45 = vld [vmem:[#allocation2 + $0xf9] sm:$0xff] }
 0x33f   : > { %3490 = vst.msk [vmem:[#allocation2 + $0x129] sm:$0xff] %vm421_vm0, %v3458_v27  ;;  %7105 = vrot.lane.b32.xlu1 %v3458_v27, %s11436_s27  ;;  %v12332_v46 = vpack.c.bf16 %v3576_v45, %v3575_v39  ;;  %v3574_v1 = vld [vmem:[#allocation2 + $0xe1] sm:$0xff]  ;;  %v3504_v26 = vld [vmem:[#allocation2 + $0x38] sm:$0xff]  ;;  %v3503_v39 = vld [vmem:[#allocation2 + $0x30] sm:$0xff] }
 0x340   : > { %3488 = vst.msk [vmem:[#allocation2 + $0x111] sm:$0xff] %vm421_vm0, %v3456_v35  ;;  %v10023_v2 = vpop.f32.mrb[24].mxu0  ;;  %v12335_v7 = vpack.c.bf16 %v3574_v1, %v3573_v60  ;;  %v3501_v27 = vld [vmem:[#allocation2 + $0x18] sm:$0xff]  ;;  %v11236_v45 = vld [vmem:[%s13573_s4 + $0x48] sm:$0xff]   ;;  %v12406_v60 = vpack.c.bf16 %v3504_v26, %v3503_v39  ;;  %v11237_v1 = vld [vmem:[%s13573_s4 + $0x50] sm:$0xff]  }
 0x341   : > { %v3429_v8 = vadd.f32 %v10023_v2, %v12229_v50  ;;  %v3333_v13 = vpop.f32.mrb[25].mxu0  ;;  %10057 = vmatprep.mubr.msk.bf16.mxu1 %vm421_vm0, %v12332_v46  ;;  %v3506_v2 = vld [vmem:[#allocation2 + $0x50] sm:$0xff]  ;;  %v4080_v39 = vld [vmem:[#allocation2 + $0x1a] sm:$0xff] }
 0x342   : > { %v3427_v19 = vadd.f32 %v12229_v50, %v3333_v13  ;;  %10054 = vmatmul.mubr.msk.bf16.gmra.mrb[48].mxu0 %vm421_vm0, %v12335_v7  ;;  %7099 = vrot.lane.b32.xlu0 %v3455_v17, %s11436_s27  ;;  %v10024_v25 = vpop.f32.mrb[26].mxu0  ;;  %v3502_v17 = vld [vmem:[#allocation2 + $0x20] sm:$0xff]  ;;  %v3505_v13 = vld [vmem:[#allocation2 + $0x48] sm:$0xff] }
 0x343   : > { %v3461_v33 = vmax.f32 %v3429_v8, 0.0  ;;  %v3430_v41 = vadd.f32 %v10024_v25, %v12229_v50  ;;  %7101 = vrot.lane.b32.xlu1 %v3456_v35, %s11436_s27  ;;  %v3336_v51 = vpop.f32.mrb[27].mxu0  ;;  %v12401_v35 = vpack.c.bf16 %v3502_v17, %v3501_v27  ;;  %v3508_v8 = vld [vmem:[#allocation2 + $0x68] sm:$0xff]  ;;  %v3507_v25 = vld [vmem:[#allocation2 + $0x60] sm:$0xff] }
 0x344   : > { %v3459_v42 = vmax.f32 %v3427_v19, 0.0  ;;  %v3428_v55 = vadd.f32 %v12229_v50, %v3336_v51  ;;  %v3579_v44 = vld [vmem:[#allocation2 + $0x121] sm:$0xff]  ;;  %v12415_v19 = vpack.c.bf16 %v3506_v2, %v3505_v13 }
 0x345   : > { %3493 = vst.msk [vmem:[#allocation2 + $0x151] sm:$0xff] %vm421_vm0, %v3461_v33  ;;  %v3462_v56 = vmax.f32 %v3430_v41, 0.0  ;;  %v3577_v18 = vld [vmem:[#allocation2 + $0x109] sm:$0xff]  ;;  %v12420_v41 = vpack.c.bf16 %v3508_v8, %v3507_v25  ;;  %v11239_v51 = vld [vmem:[%s13573_s4 + $0x60] sm:$0xff]  }
 0x346   : > { %3491 = vst.msk [vmem:[#allocation2 + $0x139] sm:$0xff] %vm421_vm0, %v3459_v42  ;;  %v3460_v6 = vmax.f32 %v3428_v55, 0.0  ;;  %7111 = vrot.lane.b32.xlu0 %v3461_v33, %s11436_s27  ;;  %v3580_v9 = vld [vmem:[#allocation2 + $0x129] sm:$0xff]  ;;  %v11238_v33 = vld [vmem:[%s13573_s4 + $0x58] sm:$0xff]  }
 0x347   : > { %3494 = vst.msk [vmem:[#allocation2 + $0x159] sm:$0xff] %vm421_vm0, %v3462_v56  ;;  %7113 = vrot.lane.b32.xlu1 %v3462_v56, %s11436_s27  ;;  %v3578_v23 = vld [vmem:[#allocation2 + $0x111] sm:$0xff]  ;;  %v12359_v52 = vpack.c.bf16 %v3580_v9, %v3579_v44  ;;  %v3513_v44 = vld [vmem:[#allocation2 + $0xa8] sm:$0xff]  ;;  %v4083_v2 = vld [vmem:[#allocation2 + $0x3a] sm:$0xff] }
 0x348   : > { %3492 = vst.msk [vmem:[#allocation2 + $0x141] sm:$0xff] %vm421_vm0, %v3460_v6  ;;  %v10027_v29 = vpop.f32.mrb[28].mxu0  ;;  %v12353_v32 = vpack.c.bf16 %v3578_v23, %v3577_v18  ;;  %v3512_v55 = vld [vmem:[#allocation2 + $0x98] sm:$0xff]  ;;  %v3511_v9 = vld [vmem:[#allocation2 + $0x90] sm:$0xff]  ;;  %v11240_v13 = vld [vmem:[%s13573_s4 + $0x68] sm:$0xff]  }
 0x349   : > { %v3433_v0 = vadd.f32 %v10027_v29, %v12229_v50  ;;  %v3349_v14 = vpop.f32.mrb[29].mxu0  ;;  %v3509_v56 = vld [vmem:[#allocation2 + $0x78] sm:$0xff]  ;;  %v12431_v18 = vpack.c.bf16 %v3512_v55, %v3511_v9  ;;  %v3514_v23 = vld [vmem:[#allocation2 + $0xb0] sm:$0xff]  ;;  %v3516_v29 = vld [vmem:[#allocation2 + $0xc8] sm:$0xff] }
 0x34a   : > { %v3431_v57 = vadd.f32 %v12229_v50, %v3349_v14  ;;  %10058 = vmatmul.mubr.msk.bf16.vlgmr.msra.gmra.mrb[0].mxu1 %vm421_vm0, %v12353_v32  ;;  %7107 = vrot.lane.b32.xlu0 %v3459_v42, %s11436_s27  ;;  %v10028_v3 = vpop.f32.mrb[30].mxu0  ;;  %v3510_v42 = vld [vmem:[#allocation2 + $0x80] sm:$0xff]  ;;  %v4085_v55 = vld [vmem:[#allocation2 + $0x52] sm:$0xff]  ;;  %v4087_v9 = vld [vmem:[#allocation2 + $0x6a] sm:$0xff] }
 0x34b   : > { %v3465_v4 = vmax.f32 %v3433_v0, 0.0  ;;  %v3434_v11 = vadd.f32 %v10028_v3, %v12229_v50  ;;  %10061 = vmatprep.mubr.msk.bf16.mxu1 %vm421_vm0, %v12359_v52  ;;  %10070 = vmatpush3.bf16.msra.mxu1 %v12223_v47  ;;  %v3352_v12 = vpop.f32.mrb[31].mxu0  ;;  %v3515_v0 = vld [vmem:[#allocation2 + $0xc0] sm:$0xff]  ;;  %v3520_v3 = vld [vmem:[#allocation2 + $0xf8] sm:$0xff] }
 0x34c   : > { %v3463_v21 = vmax.f32 %v3431_v57, 0.0  ;;  %7109 = vrot.lane.b32.xlu1 %v3460_v6, %s11436_s27  ;;  %v3432_v22 = vadd.f32 %v12229_v50, %v3352_v12  ;;  %10071 = vmatprep.subr.bf16.mxu1 %v11232_v61  ;;  %v3583_v37 = vld [vmem:[#allocation2 + $0x151] sm:$0xff]  ;;  %v12429_v6 = vpack.c.bf16 %v3510_v42, %v3509_v56  ;;  %v12439_v14 = vpack.c.bf16 %v3516_v29, %v3515_v0  ;;  %v3518_v57 = vld [vmem:[#allocation2 + $0xe0] sm:$0xff] }
 0x34d   : > { %3497 = vst.msk [vmem:[#allocation2 + $0x181] sm:$0xff] %vm421_vm0, %v3465_v4  ;;  %v3466_v40 = vmax.f32 %v3434_v11, 0.0  ;;  %v3581_v34 = vld [vmem:[#allocation2 + $0x139] sm:$0xff]  ;;  %v3519_v12 = vld [vmem:[#allocation2 + $0xf0] sm:$0xff]  ;;  %v4086_v56 = vld [vmem:[#allocation2 + $0x62] sm:$0xff] }
 0x34e   : > { %3495 = vst.msk [vmem:[#allocation2 + $0x169] sm:$0xff] %vm421_vm0, %v3463_v21  ;;  %v3464_v28 = vmax.f32 %v3432_v22, 0.0  ;;  %7115 = vrot.lane.b32.xlu0 %v3463_v21, %s11436_s27  ;;  %v3584_v47 = vld [vmem:[#allocation2 + $0x159] sm:$0xff]  ;;  %v12447_v21 = vpack.c.bf16 %v3520_v3, %v3519_v12  ;;  %v3522_v22 = vld [vmem:[#allocation2 + $0x110] sm:$0xff] }
 0x34f   : > { %3498 = vst.msk [vmem:[#allocation2 + $0x189] sm:$0xff] %vm421_vm0, %v3466_v40  ;;  %10072 = vmatpush3.bf16.msra.mxu1 %v11232_v61  ;;  %v3582_v36 = vld [vmem:[#allocation2 + $0x141] sm:$0xff]  ;;  %v12385_v49 = vpack.c.bf16 %v3584_v47, %v3583_v37  ;;  %v12437_v61 = vpack.c.bf16 %v3514_v23, %v3513_v44  ;;  %v3528_v37 = vld [vmem:[#allocation2 + $0x158] sm:$0xff]  ;;  %v3527_v54 = vld [vmem:[#allocation2 + $0x150] sm:$0xff]  ;;  %v12493_v44 = vpack.c.bf16 %v4087_v9, %v4086_v56 }
 0x350   : > { %3496 = vst.msk [vmem:[#allocation2 + $0x171] sm:$0xff] %vm421_vm0, %v3464_v28  ;;  %7117 = vrot.lane.b32.xlu1 %v3464_v28, %s11436_s27  ;;  %v12380_v50 = vpack.c.bf16 %v3582_v36, %v3581_v34  ;;  %10073 = vmatprep.subr.bf16.mxu1 %v11233_v30  ;;  %v3523_v47 = vld [vmem:[#allocation2 + $0x120] sm:$0xff]  ;;  %v4084_v42 = vld [vmem:[#allocation2 + $0x4a] sm:$0xff]  ;;  %v11242_v29 = vld [vmem:[%s13573_s4 + $0x78] sm:$0xff]  }
 0x351   : > { %v3526_v36 = vld [vmem:[#allocation2 + $0x140] sm:$0xff]  ;;  %v12488_v23 = vpack.c.bf16 %v4085_v55, %v4084_v42  ;;  %v4090_v3 = vld [vmem:[#allocation2 + $0x92] sm:$0xff] }
 0x352   : > { %10062 = vmatmul.mubr.msk.bf16.gmra.mrb[4].mxu1 %vm421_vm0, %v12380_v50  ;;  %7119 = vrot.lane.b32.xlu0 %v3465_v4, %s11436_s27  ;;  %v3517_v4 = vld [vmem:[#allocation2 + $0xd8] sm:$0xff]  ;;  %v4105_v55 = vld [vmem:[#allocation2 + $0x142] sm:$0xff] }
 0x353   : > { %10065 = vmatprep.mubr.msk.bf16.mxu1 %vm421_vm0, %v12385_v49  ;;  %10074 = vmatpush3.bf16.msra.mxu1 %v11233_v30  ;;  %v12445_v11 = vpack.c.bf16 %v3518_v57, %v3517_v4  ;;  %v3524_v30 = vld [vmem:[#allocation2 + $0x128] sm:$0xff]  ;;  %v4088_v0 = vld [vmem:[#allocation2 + $0x7a] sm:$0xff]  ;;  %v4106_v56 = vld [vmem:[#allocation2 + $0x152] sm:$0xff] }
 0x354   : > { %7121 = vrot.lane.b32.xlu1 %v3466_v40, %s11436_s27  ;;  %10075 = vmatprep.subr.bf16.mxu1 %v11234_v38  ;;  %v3521_v40 = vld [vmem:[#allocation2 + $0x108] sm:$0xff]  ;;  %v12455_v34 = vpack.c.bf16 %v3524_v30, %v3523_v47  ;;  %v4091_v4 = vld [vmem:[#allocation2 + $0x9a] sm:$0xff] }
 0x355   : > { %v3585_v10 = vld [vmem:[#allocation2 + $0x169] sm:$0xff]  ;;  %v12453_v28 = vpack.c.bf16 %v3522_v22, %v3521_v40  ;;  %v12504_v22 = vpack.c.bf16 %v4091_v4, %v4090_v3  ;;  %v4093_v40 = vld [vmem:[#allocation2 + $0xb2] sm:$0xff]  ;;  %v4104_v42 = vld [vmem:[#allocation2 + $0x13a] sm:$0xff] }
 0x356   : > { %v3529_v17 = vld [vmem:[#allocation2 + $0x168] sm:$0xff]  ;;  %v4107_v9 = vld [vmem:[#allocation2 + $0x15a] sm:$0xff] }
 0x357   : > { %v3586_v15 = vld [vmem:[#allocation2 + $0x171] sm:$0xff]  ;;  %10076 = vmatpush3.bf16.msra.mxu1 %v11234_v38  ;;  %v4089_v57 = vld [vmem:[#allocation2 + $0x82] sm:$0xff] }
 0x358   : > { %v12396_v16 = vpack.c.bf16 %v3586_v15, %v3585_v10  ;;  %10109 = vmatprep.subr.bf16.mxu1 %v11235_v63  ;;  %v3525_v38 = vld [vmem:[#allocation2 + $0x138] sm:$0xff]  ;;  %v4078_v10 = vld [vmem:[#allocation2 + $0x2] sm:$0xff]  ;;  %v4079_v15 = vld [vmem:[#allocation2 + $0xa] sm:$0xff]  ;;  %v12502_v12 = vpack.c.bf16 %v4089_v57, %v4088_v0  ;;  %v12536_v0 = vpack.c.bf16 %v4107_v9, %v4106_v56 }
 0x359   : > { %v12461_v53 = vpack.c.bf16 %v3526_v36, %v3525_v38  ;;  %v4110_v26 = vpack.c.bf16 %v4079_v15, %v4078_v10  ;;  %v4092_v30 = vld [vmem:[#allocation2 + $0xaa] sm:$0xff]  ;;  %v4094_v47 = vld [vmem:[#allocation2 + $0xc2] sm:$0xff]  ;;  %v4098_v15 = vld [vmem:[#allocation2 + $0xf2] sm:$0xff] }
 0x35a   : > { %10066 = vmatmul.mubr.msk.bf16.gmra.mrb[8].mxu1 %vm421_vm0, %v12396_v16  ;;  %v4095_v36 = vld [vmem:[#allocation2 + $0xca] sm:$0xff]  ;;  %v4097_v10 = vld [vmem:[#allocation2 + $0xe2] sm:$0xff]  ;;  %v4109_v3 = vld [vmem:[#allocation2 + $0x172] sm:$0xff] }
 0x35b   : > { %10077 = vmatprep.mubr.msk.bf16.mxu1 %vm421_vm0, %v3531_v5  ;;  %v3530_v5 = vld [vmem:[#allocation2 + $0x170] sm:$0xff]  ;;  %v12512_v38 = vpack.c.bf16 %v4095_v36, %v4094_v47 }
 0x35c   : > { %v12469_v27 = vpack.c.bf16 %v3530_v5, %v3529_v17  ;;  %v4099_v5 = vld [vmem:[#allocation2 + $0xfa] sm:$0xff]  ;;  %v4108_v57 = vld [vmem:[#allocation2 + $0x16a] sm:$0xff] }
 0x35d   : > { %v12542_v4 = vpack.c.bf16 %v4109_v3, %v4108_v57 }
 0x362   : > { %10078 = vmatmul.mubr.msk.bf16.vlgmr.msra.gmra.mrb[12].mxu1 %vm421_vm0, %v12401_v35 }
 0x363   : > { %10081 = vmatprep.mubr.msk.bf16.mxu1 %vm421_vm0, %v12406_v60  ;;  %10110 = vmatpush3.bf16.msra.mxu1 %v11235_v63  ;;  %v12463_v63 = vpack.c.bf16 %v3528_v37, %v3527_v54  ;;  %v12510_v37 = vpack.c.bf16 %v4093_v40, %v4092_v30  ;;  %v4096_v54 = vld [vmem:[#allocation2 + $0xda] sm:$0xff]  ;;  %v11244_v30 = vld [vmem:[%s13573_s4 + $0x88] sm:$0xff]   ;;  %v11245_v40 = vld [vmem:[%s13573_s4 + $0x90] sm:$0xff]  }
 0x364   : > { %10111 = vmatprep.subr.bf16.mxu1 %v11236_v45  ;;  %v12518_v17 = vpack.c.bf16 %v4097_v10, %v4096_v54 }
 0x367   : > { %10112 = vmatpush3.bf16.msra.mxu1 %v11236_v45  ;;  %v4081_v45 = vld [vmem:[#allocation2 + $0x22] sm:$0xff] }
 0x368   : > { %10113 = vmatprep.subr.bf16.mxu1 %v11237_v1  ;;  %v12474_v8 = vpack.c.bf16 %v4081_v45, %v4080_v39  ;;  %v4100_v39 = vld [vmem:[#allocation2 + $0x10a] sm:$0xff]  ;;  %v4101_v45 = vld [vmem:[#allocation2 + $0x112] sm:$0xff] }
 0x36a   : > { %10082 = vmatmul.mubr.msk.bf16.gmra.mrb[16].mxu1 %vm421_vm0, %v12415_v19 }
 0x36b   : > { %10085 = vmatprep.mubr.msk.bf16.mxu1 %vm421_vm0, %v12420_v41  ;;  %10114 = vmatpush3.bf16.msra.mxu1 %v11237_v1  ;;  %v4082_v1 = vld [vmem:[#allocation2 + $0x32] sm:$0xff] }
 0x36c   : > { %10115 = vmatprep.subr.bf16.mxu1 %v11238_v33  ;;  %v12479_v25 = vpack.c.bf16 %v4083_v2, %v4082_v1  ;;  %v4102_v1 = vld [vmem:[#allocation2 + $0x122] sm:$0xff]  ;;  %v4103_v2 = vld [vmem:[#allocation2 + $0x12a] sm:$0xff] }
 0x36f   : > { %10116 = vmatpush3.bf16.msra.mxu1 %v11238_v33  ;;  %v11241_v33 = vld [vmem:[%s13573_s4 + $0x70] sm:$0xff]  }
 0x370   : > { %10149 = vmatprep.subr.bf16.mxu1 %v11239_v51 }
 0x372   : > { %10086 = vmatmul.mubr.msk.bf16.gmra.mrb[20].mxu1 %vm421_vm0, %v12429_v6 }
 0x373   : > { %10089 = vmatprep.mubr.msk.bf16.mxu1 %vm421_vm0, %v12431_v18 }
 0x37a   : > { %10090 = vmatmul.mubr.msk.bf16.gmra.mrb[24].mxu1 %vm421_vm0, %v12437_v61 }
 0x37b   : > { %10093 = vmatprep.mubr.msk.bf16.mxu1 %vm421_vm0, %v12439_v14 }
 0x382   : > { %10094 = vmatmul.mubr.msk.bf16.gmra.mrb[28].mxu1 %vm421_vm0, %v12445_v11 }
 0x383   : > { %10097 = vmatprep.mubr.msk.bf16.mxu1 %vm421_vm0, %v12447_v21 }
 0x38a   : > { %10098 = vmatmul.mubr.msk.bf16.gmra.mrb[0].mxu1 %vm421_vm0, %v12453_v28 }
 0x38b   : > { %10101 = vmatprep.mubr.msk.bf16.mxu1 %vm421_vm0, %v12455_v34 }
 0x392   : > { %10102 = vmatmul.mubr.msk.bf16.gmra.mrb[4].mxu1 %vm421_vm0, %v12461_v53 }
 0x393   : > { %10105 = vmatprep.mubr.msk.bf16.mxu1 %vm421_vm0, %v12463_v63 }
 0x39a   : > { %10106 = vmatmul.mubr.msk.bf16.gmra.mrb[8].mxu1 %vm421_vm0, %v12469_v27 }
 0x39b   : > { %10117 = vmatprep.mubr.msk.bf16.mxu1 %vm421_vm0, %v4110_v26  ;;  %v12520_v26 = vpack.c.bf16 %v4099_v5, %v4098_v15 }
 0x3a2   : > { %10118 = vmatmul.mubr.msk.bf16.vlgmr.msra.gmra.mrb[12].mxu1 %vm421_vm0, %v12474_v8 }
 0x3a3   : > { %10121 = vmatprep.mubr.msk.bf16.mxu1 %vm421_vm0, %v12479_v25  ;;  %10150 = vmatpush3.bf16.msra.mxu1 %v11239_v51  ;;  %v11243_v51 = vld [vmem:[%s13573_s4 + $0x80] sm:$0xff]  }
 0x3a4   : > { %10151 = vmatprep.subr.bf16.mxu1 %v11240_v13 }
 0x3a7   : > { %10152 = vmatpush3.bf16.msra.mxu1 %v11240_v13  ;;  %v12526_v13 = vpack.c.bf16 %v4101_v45, %v4100_v39 }
 0x3a8   : > { %10153 = vmatprep.subr.bf16.mxu1 %v11241_v33 }
 0x3aa   : > { %10122 = vmatmul.mubr.msk.bf16.gmra.mrb[16].mxu1 %vm421_vm0, %v12488_v23 }
 0x3ab   : > { %10125 = vmatprep.mubr.msk.bf16.mxu1 %vm421_vm0, %v12493_v44  ;;  %10154 = vmatpush3.bf16.msra.mxu1 %v11241_v33  ;;  %v12528_v33 = vpack.c.bf16 %v4103_v2, %v4102_v1 }
 0x3ac   : > { %10155 = vmatprep.subr.bf16.mxu1 %v11242_v29 }
 0x3af   : > { %10156 = vmatpush3.bf16.msra.mxu1 %v11242_v29  ;;  %v12534_v29 = vpack.c.bf16 %v4105_v55, %v4104_v42 }
 0x3b0   : > { %10189 = vmatprep.subr.bf16.mxu1 %v11243_v51 }
 0x3b2   : > { %10126 = vmatmul.mubr.msk.bf16.gmra.mrb[20].mxu1 %vm421_vm0, %v12502_v12 }
 0x3b3   : > { %10129 = vmatprep.mubr.msk.bf16.mxu1 %vm421_vm0, %v12504_v22 }
 0x3ba   : > { %10130 = vmatmul.mubr.msk.bf16.gmra.mrb[24].mxu1 %vm421_vm0, %v12510_v37 }
 0x3bb   : > { %10133 = vmatprep.mubr.msk.bf16.mxu1 %vm421_vm0, %v12512_v38 }
 0x3c2   : > { %10134 = vmatmul.mubr.msk.bf16.gmra.mrb[28].mxu1 %vm421_vm0, %v12518_v17 }
 0x3c3   : > { %10137 = vmatprep.mubr.msk.bf16.mxu1 %vm421_vm0, %v12520_v26 }
 0x3ca   : > { %10138 = vmatmul.mubr.msk.bf16.gmra.mrb[0].mxu1 %vm421_vm0, %v12526_v13 }
 0x3cb   : > { %10141 = vmatprep.mubr.msk.bf16.mxu1 %vm421_vm0, %v12528_v33 }
 0x3d2   : > { %10142 = vmatmul.mubr.msk.bf16.gmra.mrb[4].mxu1 %vm421_vm0, %v12534_v29 }
 0x3d3   : > { %10145 = vmatprep.mubr.msk.bf16.mxu1 %vm421_vm0, %v12536_v0 }
 0x3da   : > { %10146 = vmatmul.mubr.msk.bf16.gmra.mrb[8].mxu1 %vm421_vm0, %v12542_v4 }
 0x3db   : > { %10157 = vmatprep.mubr.msk.bf16.mxu1 %vm421_vm0, %v12401_v35  ;;  %v11246_v35 = vld [vmem:[%s13573_s4 + $0x98] sm:$0xff]  }
 0x3e2   : > { %10158 = vmatmul.mubr.msk.bf16.vlgmr.msra.gmra.mrb[12].mxu1 %vm421_vm0, %v12406_v60 }
 0x3e3   : > { %10161 = vmatprep.mubr.msk.bf16.mxu1 %vm421_vm0, %v12415_v19  ;;  %10190 = vmatpush3.bf16.msra.mxu1 %v11243_v51  ;;  %v11247_v51 = vld [vmem:[%s13573_s4 + $0xa0] sm:$0xff]  }
 0x3e4   : > { %10191 = vmatprep.subr.bf16.mxu1 %v11244_v30 }
 0x3e7   : > { %10192 = vmatpush3.bf16.msra.mxu1 %v11244_v30 }
 0x3e8   : > { %10193 = vmatprep.subr.bf16.mxu1 %v11245_v40 }
 0x3ea   : > { %10162 = vmatmul.mubr.msk.bf16.gmra.mrb[16].mxu1 %vm421_vm0, %v12420_v41 }
 0x3eb   : > { %10165 = vmatprep.mubr.msk.bf16.mxu1 %vm421_vm0, %v12429_v6  ;;  %10194 = vmatpush3.bf16.msra.mxu1 %v11245_v40  ;;  %v4431_v40 = vld [vmem:[#allocation2 + $0x188] sm:$0xff] }
 0x3ec   : > { %10195 = vmatprep.subr.bf16.mxu1 %v11246_v35 }
 0x3ef   : > { %10196 = vmatpush3.bf16.msra.mxu1 %v11246_v35 }
 0x3f0   : > { %10229 = vmatprep.subr.bf16.mxu1 %v11247_v51 }
 0x3f2   : > { %10166 = vmatmul.mubr.msk.bf16.gmra.mrb[20].mxu1 %vm421_vm0, %v12431_v18 }
 0x3f3   : > { %10169 = vmatprep.mubr.msk.bf16.mxu1 %vm421_vm0, %v12437_v61 }
 0x3f5   : > { %v12572_v47 = vpop.f32.mrb[32].mxu0 }
 0x3f6   : > { %v12574_v36 = vpop.f32.mrb[33].mxu0 }
 0x3f7   : > { %v12576_v54 = vpop.f32.mrb[34].mxu0 }
 0x3f8   : > { %v12578_v10 = vpop.f32.mrb[35].mxu0 }
 0x3fa   : > { %10170 = vmatmul.mubr.msk.bf16.gmra.mrb[24].mxu1 %vm421_vm0, %v12439_v14 }
 0x3fb   : > { %10173 = vmatprep.mubr.msk.bf16.mxu1 %vm421_vm0, %v12445_v11 }
 0x3fd   : > { %v12584_v15 = vpop.f32.mrb[36].mxu0 }
 0x3fe   : > { %v12586_v5 = vpop.f32.mrb[37].mxu0 }
 0x3ff   : > { %v12588_v39 = vpop.f32.mrb[38].mxu0 }
 0x400   : > { %v12590_v45 = vpop.f32.mrb[39].mxu0 }
 0x402   : > { %10174 = vmatmul.mubr.msk.bf16.gmra.mrb[28].mxu1 %vm421_vm0, %v12447_v21 }
 0x403   : > { %10177 = vmatprep.mubr.msk.bf16.mxu1 %vm421_vm0, %v12453_v28 }
 0x405   : > { %v12596_v1 = vpop.f32.mrb[40].mxu0 }
 0x406   : > { %v12598_v2 = vpop.f32.mrb[41].mxu0 }
 0x407   : > { %v12600_v42 = vpop.f32.mrb[42].mxu0 }
 0x408   : > { %13581 = vst [vmem:[#allocation4_spill] sm:$0xff] %v12600_v42  ;;  %v12602_v55 = vpop.f32.mrb[43].mxu0 }
 0x409   : > { %13582 = vst [vmem:[#allocation5_spill] sm:$0xff] %v12602_v55 }
 0x40a   : > { %10178 = vmatmul.mubr.msk.bf16.gmra.mrb[0].mxu1 %vm421_vm0, %v12455_v34 }
 0x40b   : > { %10181 = vmatprep.mubr.msk.bf16.mxu1 %vm421_vm0, %v12461_v53 }
 0x40d   : > { %v12608_v56 = vpop.f32.mrb[44].mxu0 }
 0x40e   : > { %13583 = vst [vmem:[#allocation6_spill] sm:$0xff] %v12608_v56  ;;  %v12610_v9 = vpop.f32.mrb[45].mxu0  ;;  %v4430_v56 = vld [vmem:[#allocation2 + $0x180] sm:$0xff] }
 0x40f   : > { %13584 = vst [vmem:[#allocation7_spill] sm:$0xff] %v12610_v9  ;;  %v12612_v57 = vpop.f32.mrb[46].mxu0  ;;  %v12628_v9 = vpack.c.bf16 %v4431_v40, %v4430_v56  ;;  %v11249_v56 = vld [vmem:[%s13573_s4 + $0xb0] sm:$0xff]   ;;  %v5697_v40 = vld [vmem:[#allocation2 + $0x99] sm:$0xff] }
 0x410   : > { %v12614_v3 = vpop.f32.mrb[47].mxu0 }
 0x412   : > { %10182 = vmatmul.mubr.msk.bf16.gmra.mrb[4].mxu1 %vm421_vm0, %v12463_v63 }
 0x413   : > { %10185 = vmatprep.mubr.msk.bf16.mxu1 %vm421_vm0, %v12469_v27 }
 0x415   : > { %v12620_v30 = vpop.f32.mrb[48].mxu0 }
 0x416   : > { %13585 = vst [vmem:[#allocation8_spill] sm:$0xff] %v12620_v30  ;;  %v12622_v35 = vpop.f32.mrb[49].mxu0  ;;  %v11248_v30 = vld [vmem:[%s13573_s4 + $0xa8] sm:$0xff]  }
 0x417   : > { %v12624_v55 = vpop.f32.mrb[50].mxu0 }
 0x418   : > { %v12626_v42 = vpop.f32.mrb[51].mxu0 }
 0x41a   : > { %10186 = vmatmul.mubr.msk.bf16.gmra.mrb[8].mxu1 %vm421_vm0, %v12628_v9 }
 0x41b   : > { %10197 = vmatprep.mubr.msk.bf16.mxu1 %vm421_vm0, %v12253_v31  ;;  %v11250_v31 = vld [vmem:[%s13573_s4 + $0xb8] sm:$0xff]  }
 0x422   : > { %10198 = vmatmul.mubr.msk.bf16.vlgmr.msra.gmra.mrb[12].mxu1 %vm421_vm0, %v12256_v24  ;;  %v11251_v24 = vld [vmem:[%s13573_s4 + $0xc0] sm:$0xff]  }
 0x423   : > { %10201 = vmatprep.mubr.msk.bf16.mxu1 %vm421_vm0, %v12273_v20  ;;  %10230 = vmatpush3.bf16.msra.mxu1 %v11247_v51  ;;  %v4753_v20 = vld [vmem:[#allocation2 + $0x189] sm:$0xff] }
 0x424   : > { %10231 = vmatprep.subr.bf16.mxu1 %v11248_v30  ;;  %v7225_v51 = vld [vmem:[%s12772_s22 + $0x28] sm:$0xff] }
 0x425   : > { %7234 = vst.msk [vmem:[#allocation3 + $0x61] sm:$0xff] %vm421_vm0, %v7225_v51  ;;  %v5719_v51 = vld [vmem:[#allocation2 + $0x1a1] sm:$0xff] }
 0x427   : > { %10232 = vmatpush3.bf16.msra.mxu1 %v11248_v30  ;;  %v5695_v30 = vld [vmem:[#allocation2 + $0x81] sm:$0xff] }
 0x428   : > { %10233 = vmatprep.subr.bf16.mxu1 %v11249_v56 }
 0x42a   : > { %10202 = vmatmul.mubr.msk.bf16.gmra.mrb[16].mxu1 %vm421_vm0, %v12276_v43  ;;  %v4752_v43 = vld [vmem:[#allocation2 + $0x181] sm:$0xff] }
 0x42b   : > { %10205 = vmatprep.mubr.msk.bf16.mxu1 %vm421_vm0, %v12293_v59  ;;  %10234 = vmatpush3.bf16.msra.mxu1 %v11249_v56  ;;  %v12674_v59 = vpack.c.bf16 %v4753_v20, %v4752_v43  ;;  %v5694_v56 = vld [vmem:[#allocation2 + $0x79] sm:$0xff] }
 0x42c   : > { %10235 = vmatprep.subr.bf16.mxu1 %v11250_v31  ;;  %v11262_v20 = vld [vmem:[%s13573_s4 + $0x118] sm:$0xff]  }
 0x42f   : > { %10236 = vmatpush3.bf16.msra.mxu1 %v11250_v31  ;;  %v5723_v31 = vpack.c.bf16 %v5695_v30, %v5694_v56  ;;  %v6011_v56 = vld [vmem:[#allocation2 + $0x3a] sm:$0xff] }
 0x430   : > { %10269 = vmatprep.subr.bf16.mxu1 %v11251_v24 }
 0x432   : > { %10206 = vmatmul.mubr.msk.bf16.gmra.mrb[20].mxu1 %vm421_vm0, %v12296_v58  ;;  %v11252_v58 = vld [vmem:[%s13573_s4 + $0xc8] sm:$0xff]  }
 0x433   : > { %10209 = vmatprep.mubr.msk.bf16.mxu1 %vm421_vm0, %v12313_v48  ;;  %v11253_v48 = vld [vmem:[%s13573_s4 + $0xd0] sm:$0xff]  }
 0x43a   : > { %10210 = vmatmul.mubr.msk.bf16.gmra.mrb[24].mxu1 %vm421_vm0, %v12316_v62  ;;  %v11254_v62 = vld [vmem:[%s13573_s4 + $0xd8] sm:$0xff]  }
 0x43b   : > { %10213 = vmatprep.mubr.msk.bf16.mxu1 %vm421_vm0, %v12335_v7  ;;  %v5074_v7 = vld [vmem:[#allocation2 + $0x182] sm:$0xff] }
 0x442   : > { %10214 = vmatmul.mubr.msk.bf16.gmra.mrb[28].mxu1 %vm421_vm0, %v12332_v46  ;;  %v11255_v46 = vld [vmem:[%s13573_s4 + $0xe0] sm:$0xff]  }
 0x443   : > { %10217 = vmatprep.mubr.msk.bf16.mxu1 %vm421_vm0, %v12353_v32  ;;  %v5075_v32 = vld [vmem:[#allocation2 + $0x18a] sm:$0xff] }
 0x44a   : > { %10218 = vmatmul.mubr.msk.bf16.gmra.mrb[0].mxu1 %vm421_vm0, %v12359_v52  ;;  %v12720_v52 = vpack.c.bf16 %v5075_v32, %v5074_v7  ;;  %v5700_v32 = vld [vmem:[#allocation2 + $0xc1] sm:$0xff] }
 0x44b   : > { %10221 = vmatprep.mubr.msk.bf16.mxu1 %vm421_vm0, %v12380_v50  ;;  %v11256_v50 = vld [vmem:[%s13573_s4 + $0xe8] sm:$0xff]  }
 0x452   : > { %10222 = vmatmul.mubr.msk.bf16.gmra.mrb[4].mxu1 %vm421_vm0, %v12385_v49  ;;  %v11257_v49 = vld [vmem:[%s13573_s4 + $0xf0] sm:$0xff]  }
 0x453   : > { %10225 = vmatprep.mubr.msk.bf16.mxu1 %vm421_vm0, %v12396_v16  ;;  %v11258_v16 = vld [vmem:[%s13573_s4 + $0xf8] sm:$0xff]  }
 0x45a   : > { %10226 = vmatmul.mubr.msk.bf16.gmra.mrb[8].mxu1 %vm421_vm0, %v12674_v59 }
 0x45b   : > { %10237 = vmatprep.mubr.msk.bf16.mxu1 %vm421_vm0, %v12474_v8  ;;  %v5692_v8 = vld [vmem:[#allocation2 + $0x61] sm:$0xff] }
 0x462   : > { %10238 = vmatmul.mubr.msk.bf16.vlgmr.msra.gmra.mrb[12].mxu1 %vm421_vm0, %v12479_v25  ;;  %v11260_v25 = vld [vmem:[%s13573_s4 + $0x108] sm:$0xff]  }
 0x463   : > { %10241 = vmatprep.mubr.msk.bf16.mxu1 %vm421_vm0, %v12488_v23  ;;  %10270 = vmatpush3.bf16.msra.mxu1 %v11251_v24  ;;  %v5696_v24 = vld [vmem:[#allocation2 + $0x91] sm:$0xff] }
 0x464   : > { %10271 = vmatprep.subr.bf16.mxu1 %v11252_v58  ;;  %v5724_v43 = vpack.c.bf16 %v5697_v40, %v5696_v24  ;;  %v6010_v40 = vld [vmem:[#allocation2 + $0x32] sm:$0xff]  ;;  %v6012_v24 = vld [vmem:[#allocation2 + $0x4a] sm:$0xff] }
 0x467   : > { %10272 = vmatpush3.bf16.msra.mxu1 %v11252_v58  ;;  %v11263_v58 = vld [vmem:[%s13575_s6 + $0x20] sm:$0xff]  }
 0x468   : > { %10273 = vmatprep.subr.bf16.mxu1 %v11253_v48 }
 0x46a   : > { %10242 = vmatmul.mubr.msk.bf16.gmra.mrb[16].mxu1 %vm421_vm0, %v12493_v44  ;;  %v7223_v44 = vld [vmem:[%s12772_s22 + $0x18] sm:$0xff] }
 0x46b   : > { %10245 = vmatprep.mubr.msk.bf16.mxu1 %vm421_vm0, %v12502_v12  ;;  %10274 = vmatpush3.bf16.msra.mxu1 %v11253_v48  ;;  %v11261_v12 = vld [vmem:[%s13573_s4 + $0x110] sm:$0xff]   ;;  %7232 = vst.msk [vmem:[#allocation3 + $0x41] sm:$0xff] %vm421_vm0, %v7223_v44 }
 0x46c   : > { %10275 = vmatprep.subr.bf16.mxu1 %v11254_v62  ;;  %v5699_v48 = vld [vmem:[#allocation2 + $0xb1] sm:$0xff]  ;;  %v5714_v44 = vld [vmem:[#allocation2 + $0x169] sm:$0xff] }
 0x46f   : > { %10276 = vmatpush3.bf16.msra.mxu1 %v11254_v62  ;;  %v5701_v62 = vld [vmem:[#allocation2 + $0xc9] sm:$0xff] }
 0x470   : > { %10309 = vmatprep.subr.bf16.mxu1 %v11255_v46 }
 0x472   : > { %10246 = vmatmul.mubr.msk.bf16.gmra.mrb[20].mxu1 %vm421_vm0, %v12504_v22  ;;  %v7224_v22 = vld [vmem:[%s12772_s22 + $0x20] sm:$0xff] }
 0x473   : > { %10249 = vmatprep.mubr.msk.bf16.mxu1 %vm421_vm0, %v12510_v37  ;;  %7233 = vst.msk [vmem:[#allocation3 + $0x51] sm:$0xff] %vm421_vm0, %v7224_v22  ;;  %v5718_v22 = vld [vmem:[#allocation2 + $0x199] sm:$0xff] }
 0x474   : > { %v5735_v30 = vpack.c.bf16 %v5719_v51, %v5718_v22 }
 0x47a   : > { %10250 = vmatmul.mubr.msk.bf16.gmra.mrb[24].mxu1 %vm421_vm0, %v12512_v38 }
 0x47b   : > { %10253 = vmatprep.mubr.msk.bf16.mxu1 %vm421_vm0, %v12518_v17 }
 0x482   : > { %10254 = vmatmul.mubr.msk.bf16.gmra.mrb[28].mxu1 %vm421_vm0, %v12520_v26 }
 0x483   : > { %10257 = vmatprep.mubr.msk.bf16.mxu1 %vm421_vm0, %v12526_v13 }
 0x48a   : > { %10258 = vmatmul.mubr.msk.bf16.gmra.mrb[0].mxu1 %vm421_vm0, %v12528_v33 }
 0x48b   : > { %10261 = vmatprep.mubr.msk.bf16.mxu1 %vm421_vm0, %v12534_v29 }
 0x492   : > { %10262 = vmatmul.mubr.msk.bf16.gmra.mrb[4].mxu1 %vm421_vm0, %v12536_v0 }
 0x493   : > { %10265 = vmatprep.mubr.msk.bf16.mxu1 %vm421_vm0, %v12542_v4 }
 0x49a   : > { %10266 = vmatmul.mubr.msk.bf16.gmra.mrb[8].mxu1 %vm421_vm0, %v12720_v52 }
 0x49b   : > { %10277 = vmatprep.mubr.msk.bf16.mxu1 %vm421_vm0, %v12406_v60  ;;  %v11259_v60 = vld [vmem:[%s13573_s4 + $0x100] sm:$0xff]  }
 0x4a2   : > { %10278 = vmatmul.mubr.msk.bf16.vlgmr.msra.gmra.mrb[12].mxu1 %vm421_vm0, %v12415_v19  ;;  %v5396_v19 = vld [vmem:[#allocation2 + $0x198] sm:$0xff] }
 0x4a3   : > { %10281 = vmatprep.mubr.msk.bf16.mxu1 %vm421_vm0, %v12420_v41  ;;  %10310 = vmatpush3.bf16.msra.mxu1 %v11255_v46  ;;  %v5397_v41 = vld [vmem:[#allocation2 + $0x1a0] sm:$0xff]  ;;  %v5698_v46 = vld [vmem:[#allocation2 + $0xa9] sm:$0xff] }
 0x4a4   : > { %10311 = vmatprep.subr.bf16.mxu1 %v11256_v50  ;;  %v5725_v7 = vpack.c.bf16 %v5699_v48, %v5698_v46  ;;  %v6015_v48 = vld [vmem:[#allocation2 + $0x6a] sm:$0xff] }
 0x4a7   : > { %10312 = vmatpush3.bf16.msra.mxu1 %v11256_v50  ;;  %v5726_v50 = vpack.c.bf16 %v5701_v62, %v5700_v32  ;;  %v6016_v32 = vld [vmem:[#allocation2 + $0x7a] sm:$0xff] }
 0x4a8   : > { %10313 = vmatprep.subr.bf16.mxu1 %v11257_v49 }
 0x4aa   : > { %10282 = vmatmul.mubr.msk.bf16.gmra.mrb[16].mxu1 %vm421_vm0, %v12429_v6  ;;  %v5413_v6 = vpack.c.bf16 %v5397_v41, %v5396_v19  ;;  %v5704_v41 = vld [vmem:[#allocation2 + $0xf1] sm:$0xff] }
 0x4ab   : > { %10285 = vmatprep.mubr.msk.bf16.mxu1 %vm421_vm0, %v12431_v18  ;;  %10314 = vmatpush3.bf16.msra.mxu1 %v11257_v49  ;;  %v5689_v18 = vld [vmem:[#allocation2 + $0x39] sm:$0xff]  ;;  %v5703_v49 = vld [vmem:[#allocation2 + $0xe1] sm:$0xff] }
 0x4ac   : > { %10315 = vmatprep.subr.bf16.mxu1 %v11258_v16 }
 0x4af   : > { %10316 = vmatpush3.bf16.msra.mxu1 %v11258_v16  ;;  %v5705_v16 = vld [vmem:[#allocation2 + $0xf9] sm:$0xff] }
 0x4b0   : > { %10349 = vmatprep.subr.bf16.mxu1 %v11259_v60 }
 0x4b2   : > { %10286 = vmatmul.mubr.msk.bf16.gmra.mrb[20].mxu1 %vm421_vm0, %v12437_v61  ;;  %v5688_v61 = vld [vmem:[#allocation2 + $0x31] sm:$0xff] }
 0x4b3   : > { %10289 = vmatprep.mubr.msk.bf16.mxu1 %vm421_vm0, %v12439_v14  ;;  %v5720_v14 = vpack.c.bf16 %v5689_v18, %v5688_v61  ;;  %v5707_v18 = vld [vmem:[#allocation2 + $0x111] sm:$0xff]  ;;  %v5709_v61 = vld [vmem:[#allocation2 + $0x129] sm:$0xff] }
 0x4ba   : > { %10290 = vmatmul.mubr.msk.bf16.gmra.mrb[24].mxu1 %vm421_vm0, %v12445_v11  ;;  %v7220_v11 = vld [vmem:[%s12772_s22] sm:$0xff] }
 0x4bb   : > { %10293 = vmatprep.mubr.msk.bf16.mxu1 %vm421_vm0, %v12447_v21  ;;  %7229 = vst.msk [vmem:[#allocation3 + $0x11] sm:$0xff] %vm421_vm0, %v7220_v11  ;;  %v7221_v21 = vld [vmem:[%s12772_s22 + $0x8] sm:$0xff] }
 0x4bc   : > { %7230 = vst.msk [vmem:[#allocation3 + $0x21] sm:$0xff] %vm421_vm0, %v7221_v21  ;;  %v5708_v21 = vld [vmem:[#allocation2 + $0x121] sm:$0xff] }
 0x4c2   : > { %10294 = vmatmul.mubr.msk.bf16.gmra.mrb[28].mxu1 %vm421_vm0, %v12453_v28  ;;  %v7222_v28 = vld [vmem:[%s12772_s22 + $0x10] sm:$0xff] }
 0x4c3   : > { %10297 = vmatprep.mubr.msk.bf16.mxu1 %vm421_vm0, %v12455_v34  ;;  %7231 = vst.msk [vmem:[#allocation3 + $0x31] sm:$0xff] %vm421_vm0, %v7222_v28  ;;  %v5691_v34 = vld [vmem:[#allocation2 + $0x51] sm:$0xff]  ;;  %v5730_v28 = vpack.c.bf16 %v5709_v61, %v5708_v21  ;;  %v12874_v61 = vld [vmem:[#allocation3 + $0x51] sm:$0xff] }
 0x4c4   : > { %v11268_v21 = vld [vmem:[%s13575_s6 + $0x8] sm:$0xff]   ;;  %v7239_v22 = vld [vmem:[#allocation3 + $0x20] sm:$0xff] }
 0x4ca   : > { %10298 = vmatmul.mubr.msk.bf16.gmra.mrb[0].mxu1 %vm421_vm0, %v12461_v53  ;;  %v5693_v53 = vld [vmem:[#allocation2 + $0x69] sm:$0xff]  ;;  %v12917_v51 = vld [vmem:[#allocation3 + $0x30] sm:$0xff] }
 0x4cb   : > { %10301 = vmatprep.mubr.msk.bf16.mxu1 %vm421_vm0, %v12463_v63  ;;  %v5690_v63 = vld [vmem:[#allocation2 + $0x49] sm:$0xff]  ;;  %v5722_v23 = vpack.c.bf16 %v5693_v53, %v5692_v8  ;;  %v5713_v53 = vld [vmem:[#allocation2 + $0x159] sm:$0xff]  ;;  %v5712_v8 = vld [vmem:[#allocation2 + $0x151] sm:$0xff] }
 0x4d2   : > { %10302 = vmatmul.mubr.msk.bf16.gmra.mrb[4].mxu1 %vm421_vm0, %v12469_v27  ;;  %v5721_v27 = vpack.c.bf16 %v5691_v34, %v5690_v63  ;;  %v5711_v34 = vld [vmem:[#allocation2 + $0x141] sm:$0xff]  ;;  %v5710_v63 = vld [vmem:[#allocation2 + $0x139] sm:$0xff] }
 0x4d3   : > { %10305 = vmatprep.mubr.msk.bf16.mxu1 %vm421_vm0, %v12628_v9  ;;  %v7226_v9 = vld [vmem:[%s12772_s22 + $0x30] sm:$0xff] }
 0x4d4   : > { %7235 = vst.msk [vmem:[#allocation3 + $0x71] sm:$0xff] %vm421_vm0, %v7226_v9  ;;  %v7227_v9 = vld [vmem:[%s12772_s22 + $0x38] sm:$0xff] }
 0x4d5   : > { %7236 = vst.msk [vmem:[#allocation3 + $0x81] sm:$0xff] %vm421_vm0, %v7227_v9 }
 0x4da   : > { %10306 = vmatmul.mubr.msk.bf16.gmra.mrb[8].mxu1 %vm421_vm0, %v5413_v6  ;;  %v5728_v6 = vpack.c.bf16 %v5705_v16, %v5704_v41  ;;  %v6019_v16 = vld [vmem:[#allocation2 + $0x9a] sm:$0xff] }
 0x4db   : > { %10317 = vmatprep.mubr.msk.bf16.mxu1 %vm421_vm0, %v5720_v14  ;;  %v5706_v14 = vld [vmem:[#allocation2 + $0x109] sm:$0xff] }
 0x4dc   : > { %v5729_v11 = vpack.c.bf16 %v5707_v18, %v5706_v14  ;;  %v12872_v18 = vld [vmem:[#allocation3 + $0x41] sm:$0xff] }
 0x4e2   : > { %10318 = vmatmul.mubr.msk.bf16.vlgmr.msra.gmra.mrb[12].mxu1 %vm421_vm0, %v5721_v27  ;;  %v5731_v27 = vpack.c.bf16 %v5711_v34, %v5710_v63  ;;  %v12893_v34 = vld [vmem:[#allocation3 + $0x71] sm:$0xff]  ;;  %v7237_v63 = vld [vmem:[#allocation3] sm:$0xff] }
 0x4e3   : > { %10321 = vmatprep.mubr.msk.bf16.mxu1 %vm421_vm0, %v5722_v23  ;;  %10350 = vmatpush3.bf16.msra.mxu1 %v11259_v60  ;;  %v5702_v60 = vld [vmem:[#allocation2 + $0xd9] sm:$0xff]  ;;  %v5715_v23 = vld [vmem:[#allocation2 + $0x171] sm:$0xff] }
 0x4e4   : > { %10351 = vmatprep.subr.bf16.mxu1 %v11260_v25  ;;  %v5727_v19 = vpack.c.bf16 %v5703_v49, %v5702_v60  ;;  %v6018_v49 = vld [vmem:[#allocation2 + $0x92] sm:$0xff] }
 0x4e5   : > { %v6046_v41 = vpack.c.bf16 %v6019_v16, %v6018_v49  ;;  %v12948_v49 = vld [vmem:[#allocation3 + $0x22] sm:$0xff]  ;;  %v12950_v16 = vld [vmem:[#allocation3 + $0x32] sm:$0xff] }
 0x4e7   : > { %10352 = vmatpush3.bf16.msra.mxu1 %v11260_v25  ;;  %v5732_v25 = vpack.c.bf16 %v5713_v53, %v5712_v8  ;;  %v11269_v53 = vld [vmem:[%s13575_s6 + $0x10] sm:$0xff]  }
 0x4e8   : > { %10353 = vmatprep.subr.bf16.mxu1 %v11261_v12 }
 0x4ea   : > { %10322 = vmatmul.mubr.msk.bf16.gmra.mrb[16].mxu1 %vm421_vm0, %v5723_v31  ;;  %v6042_v31 = vpack.c.bf16 %v6011_v56, %v6010_v40  ;;  %v7241_v40 = vld [vmem:[#allocation3 + $0x40] sm:$0xff]  ;;  %v7242_v56 = vld [vmem:[#allocation3 + $0x50] sm:$0xff] }
 0x4eb   : > { %10325 = vmatprep.mubr.msk.bf16.mxu1 %vm421_vm0, %v5724_v43  ;;  %10354 = vmatpush3.bf16.msra.mxu1 %v11261_v12  ;;  %v5733_v12 = vpack.c.bf16 %v5715_v23, %v5714_v44  ;;  %v6014_v43 = vld [vmem:[#allocation2 + $0x62] sm:$0xff]  ;;  %v11270_v23 = vld [vmem:[%s13575_s6 + $0x18] sm:$0xff]   ;;  %v6405_v44 = vld [vmem:[%s13577_s8 + $0x10] sm:$0xff] }
 0x4ec   : > { %10355 = vmatprep.subr.bf16.mxu1 %v11262_v20  ;;  %v6044_v46 = vpack.c.bf16 %v6015_v48, %v6014_v43  ;;  %v7243_v43 = vld [vmem:[#allocation3 + $0x60] sm:$0xff]  ;;  %v7244_v48 = vld [vmem:[#allocation3 + $0x70] sm:$0xff] }
 0x4ef   : > { %10356 = vmatpush3.bf16.msra.mxu1 %v11262_v20  ;;  %v6013_v20 = vld [vmem:[#allocation2 + $0x52] sm:$0xff] }
 0x4f0   : > { %10445 = vmatprep.subr.bf16.mxu1 %v11263_v58  ;;  %v6043_v62 = vpack.c.bf16 %v6013_v20, %v6012_v24  ;;  %v12925_v24 = vpack.c.bf16 %v7242_v56, %v7241_v40  ;;  %v11272_v20 = vld [vmem:[%s13575_s6 + $0x48] sm:$0xff]  }
 0x4f2   : > { %10326 = vmatmul.mubr.msk.bf16.gmra.mrb[20].mxu1 %vm421_vm0, %v5725_v7  ;;  %v11265_v7 = vld [vmem:[%s13575_s6 + $0x30] sm:$0xff]  }
 0x4f3   : > { %10329 = vmatprep.mubr.msk.bf16.mxu1 %vm421_vm0, %v5726_v50  ;;  %v6017_v50 = vld [vmem:[#allocation2 + $0x82] sm:$0xff] }
 0x4f4   : > { %v6045_v60 = vpack.c.bf16 %v6017_v50, %v6016_v32  ;;  %v11274_v50 = vld [vmem:[%s13575_s6 + $0x58] sm:$0xff]  }
 0x4fa   : > { %10330 = vmatmul.mubr.msk.bf16.gmra.mrb[24].mxu1 %vm421_vm0, %v5727_v19  ;;  %v11266_v19 = vld [vmem:[%s13575_s6 + $0x38] sm:$0xff]  }
 0x4fb   : > { %10333 = vmatprep.mubr.msk.bf16.mxu1 %vm421_vm0, %v5728_v6  ;;  %v12870_v6 = vld [vmem:[#allocation3 + $0x31] sm:$0xff] }
 0x502   : > { %10334 = vmatmul.mubr.msk.bf16.gmra.mrb[28].mxu1 %vm421_vm0, %v5729_v11  ;;  %v12882_v11 = vpack.c.bf16 %v12874_v61, %v12872_v18 }
 0x503   : > { %10337 = vmatprep.mubr.msk.bf16.mxu1 %vm421_vm0, %v5730_v28  ;;  %v12891_v28 = vld [vmem:[#allocation3 + $0x61] sm:$0xff] }
 0x504   : > { %v12902_v8 = vpack.c.bf16 %v12893_v34, %v12891_v28 }
 0x50a   : > { %10338 = vmatmul.mubr.msk.bf16.gmra.mrb[0].mxu1 %vm421_vm0, %v5731_v27  ;;  %v12898_v27 = vld [vmem:[#allocation3 + $0x10] sm:$0xff] }
 0x50b   : > { %10341 = vmatprep.mubr.msk.bf16.mxu1 %vm421_vm0, %v5732_v25  ;;  %v7245_v25 = vpack.c.bf16 %v12898_v27, %v7237_v63  ;;  %v7620_v63 = vpack.c.bf16 %v7243_v43, %v7242_v56 }
 0x512   : > { %10342 = vmatmul.mubr.msk.bf16.gmra.mrb[4].mxu1 %vm421_vm0, %v5733_v12  ;;  %v6406_v12 = vld [vmem:[%s13577_s8 + $0x18] sm:$0xff] }
 0x513   : > { %10345 = vmatprep.mubr.msk.bf16.mxu1 %vm421_vm0, %v12674_v59  ;;  %v11264_v59 = vld [vmem:[%s13575_s6 + $0x28] sm:$0xff]   ;;  %v10593_v9 = vpack.c.bf16 %v6406_v12, %v6405_v44 }
 0x51a   : > { %10346 = vmatmul.mubr.msk.bf16.gmra.mrb[8].mxu1 %vm421_vm0, %v5735_v30  ;;  %v11271_v30 = vld [vmem:[%s13575_s6 + $0x40] sm:$0xff]  }
 0x51b   : > { %10357 = vmatprep.mubr.msk.bf16.mxu1 %vm421_vm0, %v6042_v31  ;;  %v12923_v31 = vpack.c.bf16 %v12917_v51, %v7239_v22 }
 0x522   : > { %10358 = vmatmul.mubr.msk.bf16.vlgmr.msra.gmra.mrb[12].mxu1 %vm421_vm0, %v6043_v62  ;;  %v11273_v62 = vld [vmem:[%s13575_s6 + $0x50] sm:$0xff]  }
 0x523   : > { %10361 = vmatprep.mubr.msk.bf16.mxu1 %vm421_vm0, %v6044_v46  ;;  %10446 = vmatpush3.bf16.msra.mxu1 %v11263_v58  ;;  %v11267_v58 = vld [vmem:[%s13575_s6] sm:$0xff]  }
 0x524   : > { %10447 = vmatprep.subr.bf16.mxu1 %v11264_v59  ;;  %v12937_v46 = vld [vmem:[#allocation3 + $0x12] sm:$0xff] }
 0x527   : > { %10448 = vmatpush3.bf16.msra.mxu1 %v11264_v59  ;;  %v7480_v59 = vld [vmem:[#allocation3 + $0x2] sm:$0xff] }
 0x528   : > { %10449 = vmatprep.subr.bf16.mxu1 %v11265_v7  ;;  %v7488_v32 = vpack.c.bf16 %v12937_v46, %v7480_v59  ;;  %v11290_v59 = vld [vmem:[%s13575_s6 + $0xd8] sm:$0xff]  }
 0x52a   : > { %10362 = vmatmul.mubr.msk.bf16.gmra.mrb[16].mxu1 %vm421_vm0, %v6045_v60  ;;  %v11275_v60 = vld [vmem:[%s13575_s6 + $0x60] sm:$0xff]  }
 0x52b   : > { %10365 = vmatprep.mubr.msk.bf16.mxu1 %vm421_vm0, %v6046_v41  ;;  %10450 = vmatpush3.bf16.msra.mxu1 %v11265_v7  ;;  %v12939_v7 = vpack.c.bf16 %v7244_v48, %v7243_v43  ;;  %v12957_v41 = vld [vmem:[#allocation3 + $0x52] sm:$0xff]  ;;  %v7877_v43 = vld [vmem:[#allocation3 + $0x82] sm:$0xff] }
 0x52c   : > { %10451 = vmatprep.subr.bf16.mxu1 %v11266_v19 }
 0x52f   : > { %10452 = vmatpush3.bf16.msra.mxu1 %v11266_v19  ;;  %v12955_v19 = vld [vmem:[#allocation3 + $0x42] sm:$0xff] }
 0x530   : > { %10461 = vmatprep.subr.bf16.mxu1 %v11267_v58 }
 0x532   : > { %10366 = vmatmul.mubr.msk.bf16.gmra.mrb[20].mxu1 %vm421_vm0, %v12510_v37  ;;  %v6040_v37 = vld [vmem:[#allocation2 + $0x19a] sm:$0xff] }
 0x533   : > { %10369 = vmatprep.mubr.msk.bf16.mxu1 %vm421_vm0, %v12512_v38  ;;  %v6041_v38 = vld [vmem:[#allocation2 + $0x1a2] sm:$0xff] }
 0x53a   : > { %10370 = vmatmul.mubr.msk.bf16.gmra.mrb[24].mxu1 %vm421_vm0, %v12518_v17  ;;  %v7257_v17 = vld [vmem:[#allocation3 + $0x1] sm:$0xff] }
 0x53b   : > { %10373 = vmatprep.mubr.msk.bf16.mxu1 %vm421_vm0, %v12520_v26  ;;  %v12857_v26 = vld [vmem:[#allocation3 + $0x11] sm:$0xff] }
 0x542   : > { %10374 = vmatmul.mubr.msk.bf16.gmra.mrb[28].mxu1 %vm421_vm0, %v12526_v13  ;;  %v6403_v13 = vld [vmem:[%s13577_s8] sm:$0xff] }
 0x543   : > { %10377 = vmatprep.mubr.msk.bf16.mxu1 %vm421_vm0, %v12528_v33  ;;  %v6404_v33 = vld [vmem:[%s13577_s8 + $0x8] sm:$0xff] }
 0x54a   : > { %10378 = vmatmul.mubr.msk.bf16.gmra.mrb[0].mxu1 %vm421_vm0, %v12534_v29  ;;  %v10589_v29 = vpack.c.bf16 %v6404_v33, %v6403_v13  ;;  %v12976_v13 = vld [vmem:[#allocation3 + $0x72] sm:$0xff]  ;;  %v11277_v33 = vld [vmem:[%s13575_s6 + $0x70] sm:$0xff]  }
 0x54b   : > { %10381 = vmatprep.mubr.msk.bf16.mxu1 %vm421_vm0, %v12536_v0  ;;  %v6057_v0 = vpack.c.bf16 %v6041_v38, %v6040_v37  ;;  %v12965_v37 = vpack.c.bf16 %v12957_v41, %v12955_v19  ;;  %v11276_v38 = vld [vmem:[%s13575_s6 + $0x68] sm:$0xff]  }
 0x54c   : > { %10590 = vmatprep.subr.bf16.mxu0 %v10589_v29 }
 0x54d   : > { %10592 = vmatpush3.bf16.msra.mxu0 %v10589_v29 }
 0x54e   : > { %10594 = vmatprep.subr.bf16.mxu0 %v10593_v9 }
 0x551   : > { %10596 = vmatpush3.bf16.msra.mxu0 %v10593_v9  ;;  %v7749_v9 = vpack.c.bf16 %v12872_v18, %v12870_v6 }
 0x552   : > { %10382 = vmatmul.mubr.msk.bf16.gmra.mrb[4].mxu1 %vm421_vm0, %v12542_v4  ;;  %v7265_v4 = vpack.c.bf16 %v12857_v26, %v7257_v17  ;;  %v12974_v17 = vld [vmem:[#allocation3 + $0x62] sm:$0xff] }
 0x553   : > { %10385 = vmatprep.mubr.msk.bf16.mxu1 %vm421_vm0, %v12720_v52  ;;  %v12868_v52 = vld [vmem:[#allocation3 + $0x21] sm:$0xff]  ;;  %v12983_v29 = vpack.c.bf16 %v12976_v13, %v12974_v17  ;;  %v7880_v56 = vpack.c.bf16 %v12974_v17, %v12957_v41 }
 0x554   : > { %v12878_v14 = vpack.c.bf16 %v12870_v6, %v12868_v52  ;;  %v7748_v12 = vpack.c.bf16 %v12868_v52, %v12857_v26  ;;  %v7750_v26 = vpack.c.bf16 %v12891_v28, %v12874_v61  ;;  %v11284_v52 = vld [vmem:[%s13575_s6 + $0xa8] sm:$0xff]   ;;  %v11285_v6 = vld [vmem:[%s13575_s6 + $0xb0] sm:$0xff]   ;;  %v7878_v61 = vpack.c.bf16 %v12948_v49, %v12937_v46  ;;  %v11286_v28 = vld [vmem:[%s13575_s6 + $0xb8] sm:$0xff]  }
 0x555   : > { %v11291_v46 = vld [vmem:[%s13575_s6 + $0xe0] sm:$0xff]   ;;  %v11298_v41 = vld [vmem:[%s13575_s6 + $0x118] sm:$0xff]  }
 0x55a   : > { %10386 = vmatmul.mubr.msk.bf16.gmra.mrb[8].mxu1 %vm421_vm0, %v6057_v0  ;;  %v7618_v0 = vpack.c.bf16 %v7239_v22, %v12898_v27  ;;  %v11280_v27 = vld [vmem:[%s13575_s6 + $0x88] sm:$0xff]   ;;  %v11282_v22 = vld [vmem:[%s13575_s6 + $0x98] sm:$0xff]  }
 0x55b   : > { %10453 = vmatprep.mubr.msk.bf16.mxu1 %vm421_vm0, %v7265_v4  ;;  %v11278_v4 = vld [vmem:[%s13575_s6 + $0x78] sm:$0xff]  }
 0x562   : > { %10454 = vmatmul.mubr.msk.bf16.vlgmr.msra.gmra.mrb[32].mxu1 %vm421_vm0, %v12878_v14 }
 0x563   : > { %10462 = vmatpush3.bf16.msra.mxu1 %v11267_v58  ;;  %10457 = vmatprep.mubr.msk.bf16.mxu1 %vm421_vm0, %v12882_v11  ;;  %v12961_v58 = vpack.c.bf16 %v12950_v16, %v12948_v49 }
 0x564   : > { %10463 = vmatprep.subr.bf16.mxu1 %v11268_v21 }
 0x567   : > { %10464 = vmatpush3.bf16.msra.mxu1 %v11268_v21  ;;  %v11279_v21 = vld [vmem:[%s13575_s6 + $0x80] sm:$0xff]  }
 0x568   : > { %10465 = vmatprep.subr.bf16.mxu1 %v11269_v53 }
 0x56a   : > { %10458 = vmatmul.mubr.msk.bf16.gmra.mrb[36].mxu1 %vm421_vm0, %v12902_v8 }
 0x56b   : > { %10466 = vmatpush3.bf16.msra.mxu1 %v11269_v53  ;;  %10469 = vmatprep.mubr.msk.bf16.mxu1 %vm421_vm0, %v7245_v25  ;;  %v7619_v53 = vpack.c.bf16 %v7241_v40, %v12917_v51  ;;  %v13001_v25 = vld [vmem:[#allocation3 + $0x80] sm:$0xff]  ;;  %v11283_v51 = vld [vmem:[%s13575_s6 + $0xa0] sm:$0xff]  }
 0x56c   : > { %10467 = vmatprep.subr.bf16.mxu1 %v11270_v23  ;;  %v7621_v44 = vpack.c.bf16 %v13001_v25, %v7244_v48  ;;  %v11287_v40 = vld [vmem:[%s13575_s6 + $0xc0] sm:$0xff]   ;;  %v11289_v48 = vld [vmem:[%s13575_s6 + $0xd0] sm:$0xff]  }
 0x56f   : > { %10468 = vmatpush3.bf16.msra.mxu1 %v11270_v23  ;;  %v11281_v23 = vld [vmem:[%s13575_s6 + $0x90] sm:$0xff]  }
 0x570   : > { %10477 = vmatprep.subr.bf16.mxu1 %v11271_v30 }
 0x572   : > { %10470 = vmatmul.mubr.msk.bf16.vlgmr.msra.gmra.mrb[32].mxu1 %vm421_vm0, %v12923_v31 }
 0x573   : > { %10478 = vmatpush3.bf16.msra.mxu1 %v11271_v30  ;;  %10473 = vmatprep.mubr.msk.bf16.mxu1 %vm421_vm0, %v12925_v24  ;;  %v13026_v30 = vld [vmem:[#allocation3 + $0x81] sm:$0xff] }
 0x574   : > { %10479 = vmatprep.subr.bf16.mxu1 %v11272_v20  ;;  %v7751_v18 = vpack.c.bf16 %v13026_v30, %v12893_v34  ;;  %v7879_v34 = vpack.c.bf16 %v12955_v19, %v12950_v16  ;;  %v11294_v16 = vld [vmem:[%s13575_s6 + $0xf8] sm:$0xff]  }
 0x577   : > { %10480 = vmatpush3.bf16.msra.mxu1 %v11272_v20  ;;  %v11288_v20 = vld [vmem:[%s13575_s6 + $0xc8] sm:$0xff]  }
 0x578   : > { %10481 = vmatprep.subr.bf16.mxu1 %v11273_v62 }
 0x57a   : > { %10474 = vmatmul.mubr.msk.bf16.gmra.mrb[36].mxu1 %vm421_vm0, %v12939_v7 }
 0x57b   : > { %10482 = vmatpush3.bf16.msra.mxu1 %v11273_v62  ;;  %10485 = vmatprep.mubr.msk.bf16.mxu1 %vm421_vm0, %v7488_v32  ;;  %v7881_v62 = vpack.c.bf16 %v7877_v43, %v12976_v13  ;;  %v11292_v32 = vld [vmem:[%s13575_s6 + $0xe8] sm:$0xff]   ;;  %v13111_v13 = vld [vmem:[%s13574_s5] ss:$0 sm:$0xff] }
 0x57c   : > { %10483 = vmatprep.subr.bf16.mxu1 %v11274_v50 }
 0x57f   : > { %10484 = vmatpush3.bf16.msra.mxu1 %v11274_v50  ;;  %v8008_v50 = vld [vmem:[#allocation3 + $0x90] sm:$0xff] }
 0x580   : > { %10493 = vmatprep.subr.bf16.mxu1 %v11275_v60  ;;  %v8012_v49 = vpack.c.bf16 %v8008_v50, %v13001_v25 }
 0x582   : > { %10486 = vmatmul.mubr.msk.bf16.vlgmr.msra.gmra.mrb[32].mxu1 %vm421_vm0, %v12961_v58 }
 0x583   : > { %10494 = vmatpush3.bf16.msra.mxu1 %v11275_v60  ;;  %10489 = vmatprep.mubr.msk.bf16.mxu1 %vm421_vm0, %v12965_v37  ;;  %v8138_v60 = vld [vmem:[#allocation3 + $0x91] sm:$0xff] }
 0x584   : > { %10495 = vmatprep.subr.bf16.mxu1 %v11276_v38  ;;  %v8142_v19 = vpack.c.bf16 %v8138_v60, %v13026_v30 }
 0x587   : > { %10496 = vmatpush3.bf16.msra.mxu1 %v11276_v38 }
 0x588   : > { %10497 = vmatprep.subr.bf16.mxu1 %v11277_v33 }
 0x58a   : > { %10490 = vmatmul.mubr.msk.bf16.gmra.mrb[36].mxu1 %vm421_vm0, %v12983_v29 }
 0x58b   : > { %10498 = vmatpush3.bf16.msra.mxu1 %v11277_v33  ;;  %10501 = vmatprep.mubr.msk.bf16.mxu1 %vm421_vm0, %v7618_v0 }
 0x58c   : > { %10499 = vmatprep.subr.bf16.mxu1 %v11278_v4 }
 0x58f   : > { %10500 = vmatpush3.bf16.msra.mxu1 %v11278_v4 }
 0x590   : > { %10509 = vmatprep.subr.bf16.mxu1 %v11279_v21 }
 0x592   : > { %10502 = vmatmul.mubr.msk.bf16.vlgmr.msra.gmra.mrb[32].mxu1 %vm421_vm0, %v7619_v53 }
 0x593   : > { %10510 = vmatpush3.bf16.msra.mxu1 %v11279_v21  ;;  %10505 = vmatprep.mubr.msk.bf16.mxu1 %vm421_vm0, %v7620_v63 }
 0x594   : > { %10511 = vmatprep.subr.bf16.mxu1 %v11280_v27 }
 0x597   : > { %10512 = vmatpush3.bf16.msra.mxu1 %v11280_v27 }
 0x598   : > { %10513 = vmatprep.subr.bf16.mxu1 %v11281_v23 }
 0x59a   : > { %10506 = vmatmul.mubr.msk.bf16.gmra.mrb[36].mxu1 %vm421_vm0, %v7621_v44 }
 0x59b   : > { %10514 = vmatpush3.bf16.msra.mxu1 %v11281_v23  ;;  %10517 = vmatprep.mubr.msk.bf16.mxu1 %vm421_vm0, %v7748_v12 }
 0x59c   : > { %10515 = vmatprep.subr.bf16.mxu1 %v11282_v22 }
 0x59f   : > { %10516 = vmatpush3.bf16.msra.mxu1 %v11282_v22 }
 0x5a0   : > { %10525 = vmatprep.subr.bf16.mxu1 %v11283_v51 }
 0x5a2   : > { %10518 = vmatmul.mubr.msk.bf16.vlgmr.msra.gmra.mrb[32].mxu1 %vm421_vm0, %v7749_v9 }
 0x5a3   : > { %10526 = vmatpush3.bf16.msra.mxu1 %v11283_v51  ;;  %10521 = vmatprep.mubr.msk.bf16.mxu1 %vm421_vm0, %v7750_v26 }
 0x5a4   : > { %10527 = vmatprep.subr.bf16.mxu1 %v11284_v52 }
 0x5a7   : > { %10528 = vmatpush3.bf16.msra.mxu1 %v11284_v52 }
 0x5a8   : > { %10529 = vmatprep.subr.bf16.mxu1 %v11285_v6 }
 0x5aa   : > { %10522 = vmatmul.mubr.msk.bf16.gmra.mrb[36].mxu1 %vm421_vm0, %v7751_v18 }
 0x5ab   : > { %10530 = vmatpush3.bf16.msra.mxu1 %v11285_v6  ;;  %10533 = vmatprep.mubr.msk.bf16.mxu1 %vm421_vm0, %v7878_v61 }
 0x5ac   : > { %10531 = vmatprep.subr.bf16.mxu1 %v11286_v28 }
 0x5af   : > { %10532 = vmatpush3.bf16.msra.mxu1 %v11286_v28 }
 0x5b0   : > { %10541 = vmatprep.subr.bf16.mxu1 %v11287_v40 }
 0x5b2   : > { %10534 = vmatmul.mubr.msk.bf16.vlgmr.msra.gmra.mrb[32].mxu1 %vm421_vm0, %v7879_v34 }
 0x5b3   : > { %10542 = vmatpush3.bf16.msra.mxu1 %v11287_v40  ;;  %10537 = vmatprep.mubr.msk.bf16.mxu1 %vm421_vm0, %v7880_v56  ;;  %v13586_v56 = vld [vmem:[#allocation4_spill] sm:$0xff] }
 0x5b4   : > { %10543 = vmatprep.subr.bf16.mxu1 %v11288_v20 }
 0x5b7   : > { %10544 = vmatpush3.bf16.msra.mxu1 %v11288_v20 }
 0x5b8   : > { %10545 = vmatprep.subr.bf16.mxu1 %v11289_v48 }
 0x5ba   : > { %10538 = vmatmul.mubr.msk.bf16.gmra.mrb[36].mxu1 %vm421_vm0, %v7881_v62 }
 0x5bb   : > { %10546 = vmatpush3.bf16.msra.mxu1 %v11289_v48  ;;  %10549 = vmatprep.mubr.msk.bf16.mxu1 %vm421_vm0, %v12923_v31  ;;  %v11293_v31 = vld [vmem:[%s13575_s6 + $0xf0] sm:$0xff]  }
 0x5bc   : > { %10547 = vmatprep.subr.bf16.mxu1 %v11290_v59 }
 0x5bf   : > { %10548 = vmatpush3.bf16.msra.mxu1 %v11290_v59  ;;  %v13587_v59 = vld [vmem:[#allocation5_spill] sm:$0xff] }
 0x5c0   : > { %10557 = vmatprep.subr.bf16.mxu1 %v11291_v46 }
 0x5c2   : > { %10550 = vmatmul.mubr.msk.bf16.vlgmr.msra.gmra.mrb[32].mxu1 %vm421_vm0, %v12925_v24  ;;  %v11295_v24 = vld [vmem:[%s13575_s6 + $0x100] sm:$0xff]  }
 0x5c3   : > { %10558 = vmatpush3.bf16.msra.mxu1 %v11291_v46  ;;  %10553 = vmatprep.mubr.msk.bf16.mxu1 %vm421_vm0, %v12939_v7  ;;  %v11296_v7 = vld [vmem:[%s13575_s6 + $0x108] sm:$0xff]  }
 0x5c4   : > { %10559 = vmatprep.subr.bf16.mxu1 %v11292_v32 }
 0x5c7   : > { %10560 = vmatpush3.bf16.msra.mxu1 %v11292_v32 }
 0x5c8   : > { %10561 = vmatprep.subr.bf16.mxu1 %v11293_v31 }
 0x5ca   : > { %10554 = vmatmul.mubr.msk.bf16.gmra.mrb[36].mxu1 %vm421_vm0, %v8012_v49 }
 0x5cb   : > { %10562 = vmatpush3.bf16.msra.mxu1 %v11293_v31  ;;  %10565 = vmatprep.mubr.msk.bf16.mxu1 %vm421_vm0, %v12878_v14  ;;  %v11297_v14 = vld [vmem:[%s13575_s6 + $0x110] sm:$0xff]  }
 0x5cc   : > { %10563 = vmatprep.subr.bf16.mxu1 %v11294_v16 }
 0x5cf   : > { %10564 = vmatpush3.bf16.msra.mxu1 %v11294_v16 }
 0x5d0   : > { %10573 = vmatprep.subr.bf16.mxu1 %v11295_v24 }
 0x5d2   : > { %10566 = vmatmul.mubr.msk.bf16.vlgmr.msra.gmra.mrb[32].mxu1 %vm421_vm0, %v12882_v11  ;;  %v8268_v11 = vld [vmem:[#allocation3 + $0x92] sm:$0xff] }
 0x5d3   : > { %10574 = vmatpush3.bf16.msra.mxu1 %v11295_v24  ;;  %10569 = vmatprep.mubr.msk.bf16.mxu1 %vm421_vm0, %v12902_v8  ;;  %v8272_v8 = vpack.c.bf16 %v8268_v11, %v7877_v43  ;;  %v13588_v24 = vld [vmem:[#allocation6_spill] sm:$0xff] }
 0x5d4   : > { %10575 = vmatprep.subr.bf16.mxu1 %v11296_v7 }
 0x5d7   : > { %10576 = vmatpush3.bf16.msra.mxu1 %v11296_v7 }
 0x5d8   : > { %10577 = vmatprep.subr.bf16.mxu1 %v11297_v14 }
 0x5da   : > { %10570 = vmatmul.mubr.msk.bf16.gmra.mrb[36].mxu1 %vm421_vm0, %v8142_v19 }
 0x5db   : > { %10578 = vmatpush3.bf16.msra.mxu1 %v11297_v14  ;;  %10581 = vmatprep.mubr.msk.bf16.mxu1 %vm421_vm0, %v12961_v58  ;;  %v13589_v14 = vld [vmem:[#allocation7_spill] sm:$0xff] }
 0x5dc   : > { %10579 = vmatprep.subr.bf16.mxu1 %v11298_v41 }
 0x5df   : > { %10580 = vmatpush3.bf16.msra.mxu1 %v11298_v41 }
 0x5e2   : > { %10582 = vmatmul.mubr.msk.bf16.vlgmr.msra.gmra.mrb[32].mxu1 %vm421_vm0, %v12965_v37 }
 0x5e3   : > { %10585 = vmatprep.mubr.msk.bf16.mxu1 %vm421_vm0, %v12983_v29 }
 0x5ea   : > { %10586 = vmatmul.mubr.msk.bf16.gmra.mrb[36].mxu1 %vm421_vm0, %v8272_v8 }
 0x5f5   : > { %v10359_v38 = vpop.f32.mrb[12].mxu1 }
 0x5f6   : > { %v10605_v17 = vadd.f32 %v10359_v38, %v12572_v47  ;;  %v6173_v58 = vpop.f32.mrb[13].mxu1 }
 0x5f7   : > { %v10606_v33 = vadd.f32 %v6173_v58, %v12574_v36  ;;  %v10360_v0 = vpop.f32.mrb[14].mxu1 }
 0x5f8   : > { %v10607_v37 = vadd.f32 %v10360_v0, %v12576_v54  ;;  %v6176_v4 = vpop.f32.mrb[15].mxu1  ;;  %v6341_v53 = vadd.f32 %v10605_v17, %v13111_v13 }
 0x5f9   : > { %v6339_v29 = vadd.f32 %v10606_v33, %v13111_v13  ;;  %v10608_v21 = vadd.f32 %v6176_v4, %v12578_v10 }
 0x5fa   : > { %v6342_v27 = vadd.f32 %v10607_v37, %v13111_v13  ;;  %v6373_v36 = vmax.f32 %v6341_v53, 0.0  ;;  %v13590_v53 = vld [vmem:[#allocation8_spill] sm:$0xff] }
 0x5fb   : > { %v6371_v47 = vmax.f32 %v6339_v29, 0.0  ;;  %v6340_v63 = vadd.f32 %v10608_v21, %v13111_v13 }
 0x5fc   : > { %v6374_v9 = vmax.f32 %v6342_v27, 0.0 }
 0x5fd   : > { %v6372_v25 = vmax.f32 %v6340_v63, 0.0  ;;  %v10363_v23 = vpop.f32.mrb[16].mxu1  ;;  %10397 = vmatprep.mubr.msk.f32.mxu0 %vm6414_vm2, %v6371_v47 }
 0x5fe   : > { %v10609_v54 = vadd.f32 %v10363_v23, %v12584_v15  ;;  %v6189_v44 = vpop.f32.mrb[17].mxu1 }
 0x5ff   : > { %v10610_v12 = vadd.f32 %v6189_v44, %v12586_v5  ;;  %v10364_v22 = vpop.f32.mrb[18].mxu1  ;;  %10398 = vmatmul.mubr.msk.f32.vlgmr.msra.gmra.mrb[52].mxu0 %vm6414_vm2, %v6372_v25 }
 0x600   : > { %v10611_v10 = vadd.f32 %v10364_v22, %v12588_v39  ;;  %v6192_v51 = vpop.f32.mrb[19].mxu1  ;;  %10400 = vmatprep.mubr.msk.f32.mxu0 %vm6414_vm2, %v6373_v36  ;;  %v6345_v30 = vadd.f32 %v10609_v54, %v13111_v13 }
 0x601   : > { %v6343_v26 = vadd.f32 %v10610_v12, %v13111_v13  ;;  %v10612_v52 = vadd.f32 %v6192_v51, %v12590_v45 }
 0x602   : > { %v6346_v5 = vadd.f32 %v10611_v10, %v13111_v13  ;;  %v6377_v39 = vmax.f32 %v6345_v30, 0.0 }
 0x603   : > { %v6375_v6 = vmax.f32 %v6343_v26, 0.0  ;;  %v6344_v15 = vadd.f32 %v10612_v52, %v13111_v13  ;;  %10401 = vmatmul.mubr.msk.f32.gmra.mrb[54].mxu0 %vm6414_vm2, %v6374_v9 }
 0x604   : > { %v6378_v48 = vmax.f32 %v6346_v5, 0.0 }
 0x605   : > { %v6376_v18 = vmax.f32 %v6344_v15, 0.0  ;;  %v10367_v61 = vpop.f32.mrb[20].mxu1  ;;  %10403 = vmatprep.mubr.msk.f32.mxu0 %vm6414_vm2, %v6375_v6 }
 0x606   : > { %v10613_v28 = vadd.f32 %v10367_v61, %v12596_v1  ;;  %v6205_v40 = vpop.f32.mrb[21].mxu1 }
 0x607   : > { %v10614_v34 = vadd.f32 %v6205_v40, %v12598_v2  ;;  %v10368_v45 = vpop.f32.mrb[22].mxu1  ;;  %10404 = vmatmul.mubr.msk.f32.gmra.mrb[56].mxu0 %vm6414_vm2, %v6376_v18 }
 0x608   : > { %v10615_v20 = vadd.f32 %v10368_v45, %v13586_v56  ;;  %v6208_v43 = vpop.f32.mrb[23].mxu1  ;;  %10406 = vmatprep.mubr.msk.f32.mxu0 %vm6414_vm2, %v6377_v39  ;;  %v6349_v32 = vadd.f32 %v10613_v28, %v13111_v13 }
 0x609   : > { %v6347_v62 = vadd.f32 %v10614_v34, %v13111_v13  ;;  %v10616_v46 = vadd.f32 %v6208_v43, %v13587_v59 }
 0x60a   : > { %v6350_v2 = vadd.f32 %v10615_v20, %v13111_v13  ;;  %v6381_v16 = vmax.f32 %v6349_v32, 0.0 }
 0x60b   : > { %v6379_v50 = vmax.f32 %v6347_v62, 0.0  ;;  %v6348_v1 = vadd.f32 %v10616_v46, %v13111_v13  ;;  %10407 = vmatmul.mubr.msk.f32.gmra.mrb[58].mxu0 %vm6414_vm2, %v6378_v48 }
 0x60c   : > { %v6382_v38 = vmax.f32 %v6350_v2, 0.0 }
 0x60d   : > { %v6380_v31 = vmax.f32 %v6348_v1, 0.0  ;;  %v10371_v49 = vpop.f32.mrb[24].mxu1  ;;  %10409 = vmatprep.mubr.msk.f32.mxu0 %vm6414_vm2, %v6379_v50 }
 0x60e   : > { %v10617_v7 = vadd.f32 %v10371_v49, %v13588_v24  ;;  %v6221_v60 = vpop.f32.mrb[25].mxu1 }
 0x60f   : > { %v10618_v19 = vadd.f32 %v6221_v60, %v13589_v14  ;;  %v10372_v41 = vpop.f32.mrb[26].mxu1  ;;  %10410 = vmatmul.mubr.msk.f32.gmra.mrb[60].mxu0 %vm6414_vm2, %v6380_v31 }
 0x610   : > { %v10619_v11 = vadd.f32 %v10372_v41, %v12612_v57  ;;  %v6224_v8 = vpop.f32.mrb[27].mxu1  ;;  %10412 = vmatprep.mubr.msk.f32.mxu0 %vm6414_vm2, %v6381_v16  ;;  %v6353_v33 = vadd.f32 %v10617_v7, %v13111_v13 }
 0x611   : > { %v6351_v17 = vadd.f32 %v10618_v19, %v13111_v13  ;;  %v10620_v58 = vadd.f32 %v6224_v8, %v12614_v3 }
 0x612   : > { %v6354_v4 = vadd.f32 %v10619_v11, %v13111_v13  ;;  %v6385_v57 = vmax.f32 %v6353_v33, 0.0 }
 0x613   : > { %v6383_v0 = vmax.f32 %v6351_v17, 0.0  ;;  %v6352_v37 = vadd.f32 %v10620_v58, %v13111_v13  ;;  %10413 = vmatmul.mubr.msk.f32.gmra.mrb[62].mxu0 %vm6414_vm2, %v6382_v38  ;;  %v9194_v38 = vld [vmem:[%s13576_s7] ss:$0 sm:$0xff] }
 0x614   : > { %v6386_v36 = vmax.f32 %v6354_v4, 0.0 }
 0x615   : > { %v6384_v29 = vmax.f32 %v6352_v37, 0.0  ;;  %v10375_v21 = vpop.f32.mrb[28].mxu1  ;;  %10415 = vmatprep.mubr.msk.f32.mxu0 %vm6414_vm2, %v6383_v0 }
 0x616   : > { %v10621_v47 = vadd.f32 %v10375_v21, %v13590_v53  ;;  %v6237_v63 = vpop.f32.mrb[29].mxu1 }
 0x617   : > { %v10622_v27 = vadd.f32 %v6237_v63, %v12622_v35  ;;  %v10376_v3 = vpop.f32.mrb[30].mxu1  ;;  %10416 = vmatmul.mubr.msk.f32.gmra.mrb[64].mxu0 %vm6414_vm2, %v6384_v29 }
 0x618   : > { %v10623_v25 = vadd.f32 %v10376_v3, %v12624_v55  ;;  %v6240_v23 = vpop.f32.mrb[31].mxu1  ;;  %10418 = vmatprep.mubr.msk.f32.mxu0 %vm6414_vm2, %v6385_v57  ;;  %v6357_v12 = vadd.f32 %v10621_v47, %v13111_v13 }
 0x619   : > { %v6355_v54 = vadd.f32 %v10622_v27, %v13111_v13  ;;  %v10624_v44 = vadd.f32 %v6240_v23, %v12626_v42 }
 0x61a   : > { %v6358_v35 = vadd.f32 %v10623_v25, %v13111_v13  ;;  %v6389_v55 = vmax.f32 %v6357_v12, 0.0 }
 0x61b   : > { %v6387_v22 = vmax.f32 %v6355_v54, 0.0  ;;  %v6356_v10 = vadd.f32 %v10624_v44, %v13111_v13  ;;  %10419 = vmatmul.mubr.msk.f32.gmra.mrb[66].mxu0 %vm6414_vm2, %v6386_v36 }
 0x61c   : > { %v6390_v6 = vmax.f32 %v6358_v35, 0.0 }
 0x61d   : > { %v6388_v51 = vmax.f32 %v6356_v10, 0.0  ;;  %v10379_v9 = vpop.f32.mrb[0].mxu1  ;;  %10421 = vmatprep.mubr.msk.f32.mxu0 %vm6414_vm2, %v6387_v22 }
 0x61e   : > { %v6253_v26 = vpop.f32.mrb[1].mxu1  ;;  %v6361_v18 = vadd.f32 %v10379_v9, %v13111_v13 }
 0x61f   : > { %v6359_v52 = vadd.f32 %v13111_v13, %v6253_v26  ;;  %v10380_v30 = vpop.f32.mrb[2].mxu1  ;;  %10422 = vmatmul.mubr.msk.f32.gmra.mrb[68].mxu0 %vm6414_vm2, %v6388_v51  ;;  %v13215_v51 = vld [vmem:[%s13578_s9] ss:$0 sm:$0xff] }
 0x620   : > { %v6256_v42 = vpop.f32.mrb[3].mxu1  ;;  %10424 = vmatprep.mubr.msk.f32.mxu0 %vm6414_vm2, %v6389_v55  ;;  %v6362_v61 = vadd.f32 %v10380_v30, %v13111_v13  ;;  %v6393_v40 = vmax.f32 %v6361_v18, 0.0 }
 0x621   : > { %v6391_v15 = vmax.f32 %v6359_v52, 0.0  ;;  %v6360_v5 = vadd.f32 %v13111_v13, %v6256_v42 }
 0x622   : > { %v6394_v43 = vmax.f32 %v6362_v61, 0.0 }
 0x623   : > { %10425 = vmatmul.mubr.msk.f32.gmra.mrb[70].mxu0 %vm6414_vm2, %v6390_v6  ;;  %v6392_v39 = vmax.f32 %v6360_v5, 0.0 }
 0x624   : > { %10427 = vmatprep.mubr.msk.f32.mxu0 %vm6414_vm2, %v6391_v15 }
 0x625   : > { %v10383_v28 = vpop.f32.mrb[4].mxu1 }
 0x626   : > { %v6269_v34 = vpop.f32.mrb[5].mxu1  ;;  %v6365_v59 = vadd.f32 %v10383_v28, %v13111_v13 }
 0x627   : > { %v6363_v45 = vadd.f32 %v13111_v13, %v6269_v34  ;;  %v10384_v56 = vpop.f32.mrb[6].mxu1  ;;  %10428 = vmatmul.mubr.msk.f32.gmra.mrb[72].mxu0 %vm6414_vm2, %v6392_v39 }
 0x628   : > { %v6272_v20 = vpop.f32.mrb[7].mxu1  ;;  %10430 = vmatprep.mubr.msk.f32.mxu0 %vm6414_vm2, %v6393_v40  ;;  %v6366_v46 = vadd.f32 %v10384_v56, %v13111_v13  ;;  %v6397_v1 = vmax.f32 %v6365_v59, 0.0 }
 0x629   : > { %v6395_v48 = vmax.f32 %v6363_v45, 0.0  ;;  %v6364_v62 = vadd.f32 %v13111_v13, %v6272_v20 }
 0x62a   : > { %v6398_v24 = vmax.f32 %v6366_v46, 0.0 }
 0x62b   : > { %10431 = vmatmul.mubr.msk.f32.gmra.mrb[74].mxu0 %vm6414_vm2, %v6394_v43  ;;  %v6396_v32 = vmax.f32 %v6364_v62, 0.0 }
 0x62c   : > { %10433 = vmatprep.mubr.msk.f32.mxu0 %vm6414_vm2, %v6395_v48 }
 0x62d   : > { %v10387_v50 = vpop.f32.mrb[8].mxu1 }
 0x62e   : > { %v6285_v2 = vpop.f32.mrb[9].mxu1  ;;  %v6369_v14 = vadd.f32 %v10387_v50, %v13111_v13 }
 0x62f   : > { %v6367_v31 = vadd.f32 %v13111_v13, %v6285_v2  ;;  %v10388_v49 = vpop.f32.mrb[10].mxu1  ;;  %10434 = vmatmul.mubr.msk.f32.gmra.mrb[76].mxu0 %vm6414_vm2, %v6396_v32 }
 0x630   : > { %v6288_v16 = vpop.f32.mrb[11].mxu1  ;;  %10436 = vmatprep.mubr.msk.f32.mxu0 %vm6414_vm2, %v6397_v1  ;;  %v6370_v19 = vadd.f32 %v10388_v49, %v13111_v13  ;;  %v6401_v11 = vmax.f32 %v6369_v14, 0.0 }
 0x631   : > { %v6399_v7 = vmax.f32 %v6367_v31, 0.0  ;;  %v6368_v60 = vadd.f32 %v13111_v13, %v6288_v16  ;;  %v13248_v16 = vpop.permute.xlu1 %7063 }
 0x632   : > { %v6402_v8 = vmax.f32 %v6370_v19, 0.0 }
 0x633   : > { %10437 = vmatmul.mubr.msk.f32.gmra.mrb[78].mxu0 %vm6414_vm2, %v6398_v24  ;;  %v6400_v41 = vmax.f32 %v6368_v60, 0.0 }
 0x634   : > { %10439 = vmatprep.mubr.msk.f32.mxu0 %vm6414_vm2, %v6399_v7 }
 0x637   : > { %10440 = vmatmul.mubr.msk.f32.gmra.mrb[80].mxu0 %vm6414_vm2, %v6400_v41 }
 0x638   : > { %10442 = vmatprep.mubr.msk.f32.mxu0 %vm6414_vm2, %v6401_v11 }
 0x63b   : > { %10443 = vmatmul.mubr.msk.f32.gmra.mrb[82].mxu0 %vm6414_vm2, %v6402_v8  ;;  %v13254_v8 = vpop.permute.xlu0 %7059 }
 0x6b5   : > { %v10583_v17 = vpop.f32.mrb[32].mxu1 }
 0x6b6   : > { %v8400_v58 = vadd.f32 %v10583_v17, %v9194_v38  ;;  %v8352_v33 = vpop.f32.mrb[33].mxu1 }
 0x6b7   : > { %v8398_v13 = vadd.f32 %v9194_v38, %v8352_v33  ;;  %v10584_v0 = vpop.f32.mrb[34].mxu1 }
 0x6b8   : > { %v8408_v37 = vmax.f32 %v8400_v58, 0.0  ;;  %v8401_v4 = vadd.f32 %v10584_v0, %v9194_v38  ;;  %v8355_v29 = vpop.f32.mrb[35].mxu1 }
 0x6b9   : > { %v8406_v21 = vmax.f32 %v8398_v13, 0.0  ;;  %v8399_v57 = vadd.f32 %v9194_v38, %v8355_v29 }
 0x6ba   : > { %8416 = vst.msk [vmem:[%s419_s26 + $0x10] sm:$0xff] %vm6414_vm2, %v8408_v37  ;;  %v8409_v53 = vmax.f32 %v8401_v4, 0.0 }
 0x6bb   : > { %8414 = vst.msk [vmem:[%s419_s26] sm:$0xff] %vm6414_vm2, %v8406_v21  ;;  %v8407_v47 = vmax.f32 %v8399_v57, 0.0 }
 0x6bc   : > { %8417 = vst.msk [vmem:[%s419_s26 + $0x18] sm:$0xff] %vm6414_vm2, %v8409_v53 }
 0x6bd   : > { %8415 = vst.msk [vmem:[%s419_s26 + $0x8] sm:$0xff] %vm6414_vm2, %v8407_v47  ;;  %v10587_v63 = vpop.f32.mrb[36].mxu1  ;;  %v13264_v47 = vpop.permute.xlu1 %7065 }
 0x6be   : > { %v8404_v27 = vadd.f32 %v10587_v63, %v9194_v38  ;;  %v8368_v3 = vpop.f32.mrb[37].mxu1 }
 0x6bf   : > { %v8402_v25 = vadd.f32 %v9194_v38, %v8368_v3  ;;  %v10588_v23 = vpop.f32.mrb[38].mxu1 }
 0x6c0   : > { %v8412_v36 = vmax.f32 %v8404_v27, 0.0  ;;  %v8405_v54 = vadd.f32 %v10588_v23, %v9194_v38  ;;  %v8371_v44 = vpop.f32.mrb[39].mxu1 }
 0x6c1   : > { %v8410_v12 = vmax.f32 %v8402_v25, 0.0  ;;  %v8403_v22 = vadd.f32 %v9194_v38, %v8371_v44  ;;  %v6736_v25 = vlaneseq }
 0x6c2   : > { %8420 = vst.msk [vmem:[%s419_s26 + $0x30] sm:$0xff] %vm6414_vm2, %v8412_v36  ;;  %v8413_v10 = vmax.f32 %v8405_v54, 0.0  ;;  %v13270_v54 = vpop.permute.xlu0 %7061 }
 0x6c3   : > { %8418 = vst.msk [vmem:[%s419_s26 + $0x20] sm:$0xff] %vm6414_vm2, %v8410_v12  ;;  %v8411_v35 = vmax.f32 %v8403_v22, 0.0 }
 0x6c4   : > { %8421 = vst.msk [vmem:[%s419_s26 + $0x38] sm:$0xff] %vm6414_vm2, %v8413_v10 }
 0x6c5   : > { %8419 = vst.msk [vmem:[%s419_s26 + $0x28] sm:$0xff] %vm6414_vm2, %v8411_v35 }
 0x6d2   : > { %v10399_v9 = vpop.f32.mrb[52].mxu0 }
 0x6d3   : > { %v13218_v55 = vadd.f32 %v10399_v9, %v13215_v51  ;;  %v6577_v26 = vpop.f32.mrb[53].mxu0 }
 0x6d4   : > { %v13221_v52 = vadd.f32 %v13215_v51, %v6577_v26 }
 0x6d5   : > { %v6739_v30 = vsub.f32 0.0, %v13218_v55 }
 0x6d6   : > { %v6738_v42 = vsub.f32 0.0, %v13221_v52  ;;  %v10402_v6 = vpop.f32.mrb[54].mxu0 }
 0x6d7   : > { %v6772_v15 = vmul.f32 1.442695, %v6739_v30  ;;  %v13226_v5 = vadd.f32 %v10402_v6, %v13215_v51  ;;  %v6587_v18 = vpop.f32.mrb[55].mxu0  ;;  %v13276_v30 = vpop.permute.xlu1 %7073 }
 0x6d8   : > { %v6770_v61 = vmul.f32 1.442695, %v6738_v42  ;;  %v13229_v39 = vadd.f32 %v13215_v51, %v6587_v18  ;;  %v13281_v18 = vand.u32 127, %v6736_v25 }
 0x6d9   : > { %11299 = vpow2.f32 %v6772_v15  ;;  %v6741_v28 = vsub.f32 0.0, %v13226_v5 }
 0x6da   : > { %11301 = vpow2.f32 %v6770_v61  ;;  %v6740_v40 = vsub.f32 0.0, %v13229_v39  ;;  %v10405_v34 = vpop.f32.mrb[56].mxu0  ;;  %vm6994_vm3 = vcmp.lt.s32.totalorder %v13281_v18, 3 }
 0x6db   : > { %v6776_v45 = vmul.f32 1.442695, %v6741_v28  ;;  %v13234_v56 = vadd.f32 %v10405_v34, %v13215_v51  ;;  %v6597_v20 = vpop.f32.mrb[57].mxu0 }
 0x6dc   : > { %v6774_v43 = vmul.f32 1.442695, %v6740_v40  ;;  %v13237_v48 = vadd.f32 %v13215_v51, %v6597_v20 }
 0x6dd   : > { %11303 = vpow2.f32 %v6776_v45  ;;  %v6743_v62 = vsub.f32 0.0, %v13234_v56 }
 0x6de   : > { %11305 = vpow2.f32 %v6774_v43  ;;  %v6742_v59 = vsub.f32 0.0, %v13237_v48  ;;  %v10408_v46 = vpop.f32.mrb[58].mxu0 }
 0x6df   : > { %v6780_v32 = vmul.f32 1.442695, %v6743_v62  ;;  %v13242_v50 = vadd.f32 %v10408_v46, %v13215_v51  ;;  %v6607_v1 = vpop.f32.mrb[59].mxu0  ;;  %v13288_v46 = vpop.permute.xlu0 %7071 }
 0x6e0   : > { %v6778_v2 = vmul.f32 1.442695, %v6742_v59  ;;  %v13245_v31 = vadd.f32 %v13215_v51, %v6607_v1 }
 0x6e1   : > { %11307 = vpow2.f32 %v6780_v32  ;;  %v6745_v49 = vsub.f32 0.0, %v13242_v50 }
 0x6e2   : > { %11309 = vpow2.f32 %v6778_v2  ;;  %v6744_v24 = vsub.f32 0.0, %v13245_v31  ;;  %v10411_v7 = vpop.f32.mrb[60].mxu0 }
 0x6e3   : > { %v11300_v60 = vpop.eup %11299  ;;  %v6784_v14 = vmul.f32 1.442695, %v6745_v49  ;;  %v13252_v19 = vadd.f32 %v10411_v7, %v13215_v51  ;;  %v6617_v41 = vpop.f32.mrb[61].mxu0 }
 0x6e4   : > { %v11302_v11 = vpop.eup %11301  ;;  %v6835_v38 = vadd.f32 1.0, %v11300_v60  ;;  %v6782_v17 = vmul.f32 1.442695, %v6744_v24  ;;  %v13257_v58 = vadd.f32 %v13215_v51, %v6617_v41 }
 0x6e5   : > { %v6834_v33 = vadd.f32 1.0, %v11302_v11  ;;  %11311 = vpow2.f32 %v6784_v14  ;;  %v6747_v13 = vsub.f32 0.0, %v13252_v19  ;;  %v13295_v14 = vpop.permute.xlu1 %7069 }
 0x6e6   : > { %11313 = vrcp.f32 %v6835_v38  ;;  %v6746_v0 = vsub.f32 0.0, %v13257_v58  ;;  %v10414_v37 = vpop.f32.mrb[62].mxu0 }
 0x6e7   : > { %v11304_v4 = vpop.eup %11303  ;;  %11315 = vrcp.f32 %v6834_v33  ;;  %v6788_v29 = vmul.f32 1.442695, %v6747_v13  ;;  %v13262_v21 = vadd.f32 %v10414_v37, %v13215_v51  ;;  %v6627_v57 = vpop.f32.mrb[63].mxu0 }
 0x6e8   : > { %v11306_v53 = vpop.eup %11305  ;;  %v6837_v63 = vadd.f32 1.0, %v11304_v4  ;;  %11317 = vpow2.f32 %v6782_v17  ;;  %v6786_v27 = vmul.f32 1.442695, %v6746_v0  ;;  %v13267_v3 = vadd.f32 %v13215_v51, %v6627_v57 }
 0x6e9   : > { %v6836_v23 = vadd.f32 1.0, %v11306_v53  ;;  %11319 = vpow2.f32 %v6788_v29  ;;  %v6749_v36 = vsub.f32 0.0, %v13262_v21 }
 0x6ea   : > { %11321 = vrcp.f32 %v6837_v63  ;;  %v6748_v44 = vsub.f32 0.0, %v13267_v3  ;;  %v10417_v12 = vpop.f32.mrb[64].mxu0 }
 0x6eb   : > { %v11308_v22 = vpop.eup %11307  ;;  %11323 = vrcp.f32 %v6836_v23  ;;  %v6792_v10 = vmul.f32 1.442695, %v6749_v36  ;;  %v13274_v35 = vadd.f32 %v10417_v12, %v13215_v51  ;;  %v6637_v9 = vpop.f32.mrb[65].mxu0 }
 0x6ec   : > { %v11310_v26 = vpop.eup %11309  ;;  %v6839_v42 = vadd.f32 1.0, %v11308_v22  ;;  %11325 = vpow2.f32 %v6786_v27  ;;  %v6790_v6 = vmul.f32 1.442695, %v6748_v44  ;;  %v13279_v15 = vadd.f32 %v13215_v51, %v6637_v9  ;;  %v7068_v12 = vpop.permute.xlu0 %7067 }
 0x6ed   : > { %v6838_v61 = vadd.f32 1.0, %v11310_v26  ;;  %11327 = vpow2.f32 %v6792_v10  ;;  %v6751_v28 = vsub.f32 0.0, %v13274_v35 }
 0x6ee   : > { %11329 = vrcp.f32 %v6839_v42  ;;  %v6750_v40 = vsub.f32 0.0, %v13279_v15  ;;  %v10420_v34 = vpop.f32.mrb[66].mxu0 }
 0x6ef   : > { %v11312_v45 = vpop.eup %11311  ;;  %11331 = vrcp.f32 %v6838_v61  ;;  %v6796_v20 = vmul.f32 1.442695, %v6751_v28  ;;  %v13286_v43 = vadd.f32 %v10420_v34, %v13215_v51  ;;  %v6647_v62 = vpop.f32.mrb[67].mxu0 }
 0x6f0   : > { %v11314_v59 = vpop.eup %11313  ;;  %v6841_v32 = vadd.f32 1.0, %v11312_v45  ;;  %11333 = vpow2.f32 %v6790_v6  ;;  %v6794_v1 = vmul.f32 1.442695, %v6750_v40  ;;  %v13291_v2 = vadd.f32 %v13215_v51, %v6647_v62  ;;  %v13322_v34 = vpop.permute.xlu1 %7081 }
 0x6f1   : > { %v11316_v49 = vpop.eup %11315  ;;  %v6931_v24 = vmax.f32 %v11314_v59, 0.0001  ;;  %11335 = vpow2.f32 %v6796_v20  ;;  %v6753_v7 = vsub.f32 0.0, %v13286_v43 }
 0x6f2   : > { %v11318_v60 = vpop.eup %11317  ;;  %v6930_v41 = vmax.f32 %v11316_v49, 0.0001  ;;  %11337 = vrcp.f32 %v6841_v32  ;;  %v6752_v11 = vsub.f32 0.0, %v13291_v2  ;;  %v10423_v38 = vpop.f32.mrb[68].mxu0 }
 0x6f3   : > { %v11320_v17 = vpop.eup %11319  ;;  %v6963_v33 = vmin.f32 %v6931_v24, 0.9999  ;;  %v6840_v13 = vadd.f32 1.0, %v11318_v60  ;;  %11339 = vpow2.f32 %v6794_v1  ;;  %v6800_v0 = vmul.f32 1.442695, %v6753_v7  ;;  %v6657_v37 = vpop.f32.mrb[69].mxu0 }
 0x6f4   : > { %v11322_v4 = vpop.eup %11321  ;;  %v6962_v29 = vmin.f32 %v6930_v41, 0.9999  ;;  %v6843_v57 = vadd.f32 1.0, %v11320_v17  ;;  %v6798_v53 = vmul.f32 1.442695, %v6752_v11  ;;  %v13306_v63 = vadd.f32 %v10423_v38, %v13215_v51 }
 0x6f5   : > { %v11324_v27 = vpop.eup %11323  ;;  %v6996_v25 = vsel %vm6994_vm3, %v6963_v33, %v13218_v55  ;;  %v6933_v23 = vmax.f32 %v11322_v4, 0.0001  ;;  %11341 = vrcp.f32 %v6840_v13  ;;  %v13312_v36 = vadd.f32 %v13215_v51, %v6657_v37  ;;  %v13338_v13 = vpop.permute.xlu0 %7079 }
 0x6f6   : > { %v11326_v44 = vpop.eup %11325  ;;  %v7157_v22 = vsel %vm7155_vm4, %v6996_v25, %v13270_v54  ;;  %v6995_v10 = vsel %vm6994_vm3, %v6962_v29, %v13221_v52  ;;  %v6932_v9 = vmax.f32 %v11324_v27, 0.0001  ;;  %11343 = vrcp.f32 %v6843_v57  ;;  %v10426_v26 = vpop.f32.mrb[70].mxu0 }
 0x6f7   : > { %v11328_v42 = vpop.eup %11327  ;;  %7189 = vst [vmem:[%s13303_s12 + $0x8] sm:$0xff] %v7157_v22  ;;  %v7156_v55 = vsel %vm7155_vm4, %v6995_v10, %v13254_v8  ;;  %v6965_v6 = vmin.f32 %v6933_v23, 0.9999  ;;  %v6842_v61 = vadd.f32 1.0, %v11326_v44  ;;  %11345 = vpow2.f32 %v6800_v0  ;;  %v6667_v28 = vpop.f32.mrb[71].mxu0 }
 0x6f8   : > { %v11330_v40 = vpop.eup %11329  ;;  %7188 = vst [vmem:[%s13303_s12] sm:$0xff] %v7156_v55  ;;  %v6964_v54 = vmin.f32 %v6932_v9, 0.9999  ;;  %v6845_v45 = vadd.f32 1.0, %v11328_v42  ;;  %11347 = vpow2.f32 %v6798_v53  ;;  %v6755_v52 = vsub.f32 0.0, %v13306_v63  ;;  %v7078_v53 = vpop.permute.xlu1 %7077 }
 0x6f9   : > { %v11332_v20 = vpop.eup %11331  ;;  %v6998_v62 = vsel %vm6994_vm3, %v6965_v6, %v13226_v5  ;;  %v6935_v8 = vmax.f32 %v11330_v40, 0.0001  ;;  %11349 = vrcp.f32 %v6842_v61  ;;  %v6754_v59 = vsub.f32 0.0, %v13312_v36 }
 0x6fa   : > { %v11334_v32 = vpop.eup %11333  ;;  %v7159_v1 = vsel %vm7155_vm4, %v6998_v62, %v13264_v47  ;;  %v6997_v49 = vsel %vm6994_vm3, %v6964_v54, %v13229_v39  ;;  %v6934_v24 = vmax.f32 %v11332_v20, 0.0001  ;;  %11351 = vrcp.f32 %v6845_v45  ;;  %v10429_v7 = vpop.f32.mrb[72].mxu0 }
 0x6fb   : > { %v11336_v60 = vpop.eup %11335  ;;  %7191 = vst [vmem:[%s13303_s12 + $0x18] sm:$0xff] %v7159_v1  ;;  %v7158_v5 = vsel %vm7155_vm4, %v6997_v49, %v13248_v16  ;;  %v6967_v41 = vmin.f32 %v6935_v8, 0.9999  ;;  %v6844_v11 = vadd.f32 1.0, %v11334_v32  ;;  %v6804_v38 = vmul.f32 1.442695, %v6755_v52  ;;  %v7076_v54 = vpop.permute.xlu0 %7075 }
 0x6fc   : > { %v6677_v17 = vpop.f32.mrb[73].mxu0  ;;  %v11338_v33 = vpop.eup %11337  ;;  %7190 = vst [vmem:[%s13303_s12 + $0x10] sm:$0xff] %v7158_v5  ;;  %v6966_v47 = vmin.f32 %v6934_v24, 0.9999  ;;  %v6847_v0 = vadd.f32 1.0, %v11336_v60  ;;  %v13342_v37 = vadd.f32 %v10426_v26, %v13215_v51  ;;  %v13348_v57 = vadd.f32 %v13215_v51, %v6667_v28 }
 0x6fd   : > { %v6802_v39 = vmul.f32 1.442695, %v6754_v59  ;;  %v11340_v4 = vpop.eup %11339  ;;  %v7000_v16 = vsel %vm6994_vm3, %v6967_v41, %v13234_v56  ;;  %v6937_v29 = vmax.f32 %v11338_v33, 0.0001  ;;  %11353 = vrcp.f32 %v6844_v11 }
 0x6fe   : > { %v7161_v27 = vsel %vm7155_vm4, %v7000_v16, %v13295_v14  ;;  %v6999_v25 = vsel %vm6994_vm3, %v6966_v47, %v13237_v48  ;;  %11355 = vrcp.f32 %v6847_v0  ;;  %v6846_v23 = vadd.f32 1.0, %v11340_v4  ;;  %v10432_v44 = vpop.f32.mrb[74].mxu0 }
 0x6ff   : > { %v11342_v22 = vpop.eup %11341  ;;  %7193 = vst [vmem:[%s13303_s12 + $0x28] sm:$0xff] %v7161_v27  ;;  %v7160_v56 = vsel %vm7155_vm4, %v6999_v25, %v7068_v12  ;;  %v6969_v10 = vmin.f32 %v6937_v29, 0.9999  ;;  %11357 = vpow2.f32 %v6804_v38  ;;  %v6757_v9 = vsub.f32 0.0, %v13342_v37  ;;  %v6687_v26 = vpop.f32.mrb[75].mxu0 }
 0x700   : > { %v11344_v42 = vpop.eup %11343  ;;  %7192 = vst [vmem:[%s13303_s12 + $0x20] sm:$0xff] %v7160_v56  ;;  %v6936_v55 = vmax.f32 %v11342_v22, 0.0001  ;;  %11359 = vrcp.f32 %v6846_v23  ;;  %v6756_v14 = vsub.f32 0.0, %v13348_v57  ;;  %v13361_v48 = vadd.f32 %v10429_v7, %v13215_v51  ;;  %v13372_v7 = vpop.permute.xlu1 %7089 }
 0x701   : > { %v11346_v6 = vpop.eup %11345  ;;  %v7002_v12 = vsel %vm6994_vm3, %v6969_v10, %v13242_v50  ;;  %v6939_v61 = vmax.f32 %v11344_v42, 0.0001  ;;  %11361 = vpow2.f32 %v6802_v39  ;;  %v6808_v28 = vmul.f32 1.442695, %v6757_v9 }
 0x702   : > { %v11348_v40 = vpop.eup %11347  ;;  %v7163_v45 = vsel %vm7155_vm4, %v7002_v12, %v13276_v30  ;;  %v6968_v52 = vmin.f32 %v6936_v55, 0.9999  ;;  %v6849_v20 = vadd.f32 1.0, %v11346_v6  ;;  %v6806_v62 = vmul.f32 1.442695, %v6756_v14  ;;  %v10435_v8 = vpop.f32.mrb[76].mxu0 }
 0x703   : > { %v11350_v59 = vpop.eup %11349  ;;  %7195 = vst [vmem:[%s13303_s12 + $0x38] sm:$0xff] %v7163_v45  ;;  %v6971_v32 = vmin.f32 %v6939_v61, 0.9999  ;;  %v6848_v1 = vadd.f32 1.0, %v11348_v40  ;;  %11363 = vpow2.f32 %v6808_v28  ;;  %v6759_v50 = vsub.f32 0.0, %v13361_v48  ;;  %v13370_v49 = vpop.f32.mrb[77].mxu0 }
 0x704   : > { %v11352_v24 = vpop.eup %11351  ;;  %v7001_v30 = vsel %vm6994_vm3, %v6968_v52, %v13245_v31  ;;  %v6938_v60 = vmax.f32 %v11350_v59, 0.0001  ;;  %11365 = vrcp.f32 %v6849_v20  ;;  %v13378_v5 = vadd.f32 %v13215_v51, %v6677_v17  ;;  %v7086_v42 = vpop.permute.xlu1 %7085 }
 0x705   : > { %v7162_v41 = vsel %vm7155_vm4, %v7001_v30, %v13288_v46  ;;  %v7004_v11 = vsel %vm6994_vm3, %v6971_v32, %v13252_v19  ;;  %v6941_v38 = vmax.f32 %v11352_v24, 0.0001  ;;  %11367 = vrcp.f32 %v6848_v1 }
 0x706   : > { %7194 = vst [vmem:[%s13303_s12 + $0x30] sm:$0xff] %v7162_v41  ;;  %v7165_v33 = vsel %vm7155_vm4, %v7004_v11, %v7078_v53  ;;  %v6970_v47 = vmin.f32 %v6938_v60, 0.9999  ;;  %11369 = vpow2.f32 %v6806_v62  ;;  %v6812_v31 = vmul.f32 1.442695, %v6759_v50  ;;  %v13387_v0 = vpop.f32.mrb[78].mxu0  ;;  %v13399_v53 = vpop.permute.xlu0 %7087 }
 0x707   : > { %v11354_v39 = vpop.eup %11353  ;;  %7197 = vst [vmem:[%s13303_s12 + $0x48] sm:$0xff] %v7165_v33  ;;  %v6973_v17 = vmin.f32 %v6941_v38, 0.9999  ;;  %v6758_v4 = vsub.f32 0.0, %v13378_v5  ;;  %v13392_v46 = vadd.f32 %v10432_v44, %v13215_v51  ;;  %v13395_v19 = vadd.f32 %v13215_v51, %v6687_v26  ;;  %v13397_v16 = vpop.f32.mrb[79].mxu0 }
 0x708   : > { %v11356_v29 = vpop.eup %11355  ;;  %v7003_v27 = vsel %vm6994_vm3, %v6970_v47, %v13257_v58  ;;  %v6940_v25 = vmax.f32 %v11354_v39, 0.0001  ;;  %11371 = vpow2.f32 %v6812_v31  ;;  %v13405_v23 = vadd.f32 %v10435_v8, %v13215_v51  ;;  %v13436_v47 = vpop.permute.xlu1 %7097 }
 0x709   : > { %v11358_v44 = vpop.eup %11357  ;;  %v7164_v22 = vsel %vm7155_vm4, %v7003_v27, %v7076_v54  ;;  %v7006_v56 = vsel %vm6994_vm3, %v6973_v17, %v13262_v21  ;;  %v6943_v10 = vmax.f32 %v11356_v29, 0.0001  ;;  %v6810_v9 = vmul.f32 1.442695, %v6758_v4 }
 0x70a   : > { %v11360_v26 = vpop.eup %11359  ;;  %7196 = vst [vmem:[%s13303_s12 + $0x40] sm:$0xff] %v7164_v22  ;;  %v7167_v58 = vsel %vm7155_vm4, %v7006_v56, %v13322_v34  ;;  %v6972_v55 = vmin.f32 %v6940_v25, 0.9999  ;;  %v6851_v14 = vadd.f32 1.0, %v11358_v44  ;;  %v6761_v6 = vsub.f32 0.0, %v13392_v46  ;;  %v10441_v12 = vpop.f32.mrb[80].mxu0 }
 0x70b   : > { %v11362_v61 = vpop.eup %11361  ;;  %7199 = vst [vmem:[%s13303_s12 + $0x58] sm:$0xff] %v7167_v58  ;;  %v6975_v28 = vmin.f32 %v6943_v10, 0.9999  ;;  %v6942_v40 = vmax.f32 %v11360_v26, 0.0001  ;;  %11373 = vpow2.f32 %v6810_v9  ;;  %v6760_v21 = vsub.f32 0.0, %v13395_v19  ;;  %v7084_v50 = vpop.permute.xlu0 %7083 }
 0x70c   : > { %v6717_v54 = vpop.f32.mrb[81].mxu0  ;;  %v7005_v45 = vsel %vm6994_vm3, %v6972_v55, %v13267_v3  ;;  %11375 = vrcp.f32 %v6851_v14  ;;  %v6850_v34 = vadd.f32 1.0, %v11362_v61  ;;  %v6816_v52 = vmul.f32 1.442695, %v6761_v6  ;;  %v7094_v6 = vpop.permute.xlu1 %7093 }
 0x70d   : > { %v11364_v20 = vpop.eup %11363  ;;  %v7166_v62 = vsel %vm7155_vm4, %v7005_v45, %v13338_v13  ;;  %v7008_v8 = vsel %vm6994_vm3, %v6975_v28, %v13274_v35  ;;  %v6974_v59 = vmin.f32 %v6942_v40, 0.9999  ;;  %v6814_v32 = vmul.f32 1.442695, %v6760_v21 }
 0x70e   : > { %v11366_v1 = vpop.eup %11365  ;;  %7198 = vst [vmem:[%s13303_s12 + $0x50] sm:$0xff] %v7166_v62  ;;  %v7169_v24 = vsel %vm7155_vm4, %v7008_v8, %v7086_v42  ;;  %11377 = vrcp.f32 %v6850_v34  ;;  %v6853_v3 = vadd.f32 1.0, %v11364_v20  ;;  %v6763_v30 = vsub.f32 0.0, %v13405_v23  ;;  %v10444_v60 = vpop.f32.mrb[82].mxu0 }
 0x70f   : > { %v11368_v41 = vpop.eup %11367  ;;  %7201 = vst [vmem:[%s13303_s12 + $0x68] sm:$0xff] %v7169_v24  ;;  %v7007_v13 = vsel %vm6994_vm3, %v6974_v59, %v13279_v15  ;;  %v6945_v35 = vmax.f32 %v11366_v1, 0.0001  ;;  %11379 = vpow2.f32 %v6816_v52  ;;  %v13434_v11 = vadd.f32 %v13215_v51, %v13370_v49  ;;  %v6727_v38 = vpop.f32.mrb[83].mxu0 }
 0x710   : > { %v11370_v33 = vpop.eup %11369  ;;  %v7168_v31 = vsel %vm7155_vm4, %v7007_v13, %v7084_v50  ;;  %v6944_v39 = vmax.f32 %v11368_v41, 0.0001  ;;  %11381 = vrcp.f32 %v6853_v3  ;;  %v6820_v17 = vmul.f32 1.442695, %v6763_v30  ;;  %v13452_v9 = vpop.permute.xlu0 %7095 }
 0x711   : > { %7200 = vst [vmem:[%s13303_s12 + $0x60] sm:$0xff] %v7168_v31  ;;  %v6977_v4 = vmin.f32 %v6945_v35, 0.9999  ;;  %v6852_v29 = vadd.f32 1.0, %v11370_v33  ;;  %11383 = vpow2.f32 %v6814_v32  ;;  %v6762_v15 = vsub.f32 0.0, %v13434_v11  ;;  %v13483_v41 = vpop.permute.xlu1 %7105 }
 0x712   : > { %v11372_v27 = vpop.eup %11371  ;;  %v6976_v25 = vmin.f32 %v6944_v39, 0.9999  ;;  %11385 = vpow2.f32 %v6820_v17  ;;  %v13443_v49 = vadd.f32 %v13387_v0, %v13215_v51  ;;  %v13447_v44 = vadd.f32 %v13215_v51, %v13397_v16 }
 0x713   : > { %v7010_v22 = vsel %vm6994_vm3, %v6977_v4, %v13286_v43  ;;  %11387 = vrcp.f32 %v6852_v29  ;;  %v6855_v56 = vadd.f32 1.0, %v11372_v27  ;;  %v6818_v10 = vmul.f32 1.442695, %v6762_v15 }
 0x714   : > { %v7171_v26 = vsel %vm7155_vm4, %v7010_v22, %v13372_v7  ;;  %v7009_v0 = vsel %vm6994_vm3, %v6976_v25, %v13291_v2  ;;  %v6765_v16 = vsub.f32 0.0, %v13443_v49  ;;  %v6764_v42 = vsub.f32 0.0, %v13447_v44  ;;  %v7092_v59 = vpop.permute.xlu0 %7091 }
 0x715   : > { %v11374_v58 = vpop.eup %11373  ;;  %7203 = vst [vmem:[%s13303_s12 + $0x78] sm:$0xff] %v7171_v26  ;;  %v7170_v43 = vsel %vm7155_vm4, %v7009_v0, %v13399_v53  ;;  %11389 = vrcp.f32 %v6855_v56  ;;  %v13465_v55 = vadd.f32 %v10441_v12, %v13215_v51  ;;  %v13468_v14 = vadd.f32 %v13215_v51, %v6717_v54 }
 0x716   : > { %v11376_v7 = vpop.eup %11375  ;;  %7202 = vst [vmem:[%s13303_s12 + $0x70] sm:$0xff] %v7170_v43  ;;  %v6854_v2 = vadd.f32 1.0, %v11374_v58  ;;  %11391 = vpow2.f32 %v6818_v10  ;;  %v6824_v61 = vmul.f32 1.442695, %v6765_v16  ;;  %v6822_v28 = vmul.f32 1.442695, %v6764_v42  ;;  %v7102_v42 = vpop.permute.xlu1 %7101 }
 0x717   : > { %v6947_v40 = vmax.f32 %v11376_v7, 0.0001  ;;  %v6767_v21 = vsub.f32 0.0, %v13465_v55  ;;  %v6766_v45 = vsub.f32 0.0, %v13468_v14  ;;  %v13474_v53 = vadd.f32 %v10444_v60, %v13215_v51 }
 0x718   : > { %v11378_v12 = vpop.eup %11377  ;;  %11393 = vrcp.f32 %v6854_v2  ;;  %v13477_v54 = vadd.f32 %v13215_v51, %v6727_v38  ;;  %v7104_v22 = vpop.permute.xlu0 %7103 }
 0x719   : > { %v11380_v34 = vpop.eup %11379  ;;  %v6979_v52 = vmin.f32 %v6947_v40, 0.9999  ;;  %v6946_v20 = vmax.f32 %v11378_v12, 0.0001  ;;  %11395 = vpow2.f32 %v6824_v61  ;;  %v6828_v62 = vmul.f32 1.442695, %v6767_v21 }
 0x71a   : > { %v11382_v8 = vpop.eup %11381  ;;  %v6857_v32 = vadd.f32 1.0, %v11380_v34  ;;  %11397 = vpow2.f32 %v6822_v28  ;;  %v6826_v1 = vmul.f32 1.442695, %v6766_v45  ;;  %v6769_v50 = vsub.f32 0.0, %v13474_v53 }
 0x71b   : > { %v11384_v24 = vpop.eup %11383  ;;  %v7012_v3 = vsel %vm6994_vm3, %v6979_v52, %v13306_v63  ;;  %v6978_v51 = vmin.f32 %v6946_v20, 0.9999  ;;  %v6949_v30 = vmax.f32 %v11382_v8, 0.0001  ;;  %11399 = vpow2.f32 %v6828_v62  ;;  %v7114_v62 = vpop.permute.xlu1 %7113 }
 0x71c   : > { %v11386_v60 = vpop.eup %11385  ;;  %v7173_v13 = vsel %vm7155_vm4, %v7012_v3, %v7094_v6  ;;  %11401 = vrcp.f32 %v6857_v32  ;;  %v6856_v35 = vadd.f32 1.0, %v11384_v24  ;;  %v6832_v38 = vmul.f32 1.442695, %v6769_v50  ;;  %v7100_v12 = vpop.permute.xlu0 %7099 }
 0x71d   : > { %v11388_v33 = vpop.eup %11387  ;;  %7205 = vst [vmem:[%s13303_s12 + $0x88] sm:$0xff] %v7173_v13  ;;  %v7011_v31 = vsel %vm6994_vm3, %v6978_v51, %v13312_v36  ;;  %v6981_v39 = vmin.f32 %v6949_v30, 0.9999  ;;  %v6859_v63 = vadd.f32 1.0, %v11386_v60  ;;  %11403 = vpow2.f32 %v6826_v1 }
 0x71e   : > { %v7172_v17 = vsel %vm7155_vm4, %v7011_v31, %v7092_v59  ;;  %v6948_v4 = vmax.f32 %v11388_v33, 0.0001  ;;  %11405 = vrcp.f32 %v6856_v35  ;;  %v6768_v29 = vsub.f32 0.0, %v13477_v54 }
 0x71f   : > { %v11390_v15 = vpop.eup %11389  ;;  %7204 = vst [vmem:[%s13303_s12 + $0x80] sm:$0xff] %v7172_v17  ;;  %v7014_v27 = vsel %vm6994_vm3, %v6981_v39, %v13342_v37  ;;  %11407 = vrcp.f32 %v6859_v63  ;;  %v7110_v39 = vpop.permute.xlu1 %7109 }
 0x720   : > { %v11392_v25 = vpop.eup %11391  ;;  %v7175_v36 = vsel %vm7155_vm4, %v7014_v27, %v13436_v47  ;;  %v6980_v56 = vmin.f32 %v6948_v4, 0.9999  ;;  %v6951_v10 = vmax.f32 %v11390_v15, 0.0001  ;;  %11409 = vpow2.f32 %v6832_v38  ;;  %v7112_v60 = vpop.permute.xlu0 %7111 }
 0x721   : > { %7207 = vst [vmem:[%s13303_s12 + $0x98] sm:$0xff] %v7175_v36  ;;  %v6858_v26 = vadd.f32 1.0, %v11392_v25  ;;  %v6830_v0 = vmul.f32 1.442695, %v6768_v29 }
 0x722   : > { %v11394_v16 = vpop.eup %11393  ;;  %v7013_v58 = vsel %vm6994_vm3, %v6980_v56, %v13348_v57  ;;  %v6983_v37 = vmin.f32 %v6951_v10, 0.9999 }
 0x723   : > { %v11396_v43 = vpop.eup %11395  ;;  %v7174_v7 = vsel %vm7155_vm4, %v7013_v58, %v13452_v9  ;;  %v6950_v47 = vmax.f32 %v11394_v16, 0.0001  ;;  %11411 = vrcp.f32 %v6858_v26 }
 0x724   : > { %v11398_v6 = vpop.eup %11397  ;;  %7206 = vst [vmem:[%s13303_s12 + $0x90] sm:$0xff] %v7174_v7  ;;  %v7016_v2 = vsel %vm6994_vm3, %v6983_v37, %v13361_v48  ;;  %v6861_v61 = vadd.f32 1.0, %v11396_v43  ;;  %11413 = vpow2.f32 %v6830_v0  ;;  %v7108_v36 = vpop.permute.xlu0 %7107 }
 0x725   : > { %v11400_v28 = vpop.eup %11399  ;;  %v7177_v40 = vsel %vm7155_vm4, %v7016_v2, %v7102_v42  ;;  %v6982_v57 = vmin.f32 %v6950_v47, 0.9999  ;;  %v6860_v21 = vadd.f32 1.0, %v11398_v6  ;;  %v7118_v43 = vpop.permute.xlu1 %7117 }
 0x726   : > { %v11402_v45 = vpop.eup %11401  ;;  %7209 = vst [vmem:[%s13303_s12 + $0xa8] sm:$0xff] %v7177_v40  ;;  %11415 = vrcp.f32 %v6861_v61  ;;  %v6863_v9 = vadd.f32 1.0, %v11400_v28 }
 0x727   : > { %v11404_v34 = vpop.eup %11403  ;;  %v7015_v52 = vsel %vm6994_vm3, %v6982_v57, %v13378_v5  ;;  %v6953_v20 = vmax.f32 %v11402_v45, 0.0001  ;;  %11417 = vrcp.f32 %v6860_v21 }
 0x728   : > { %v11406_v48 = vpop.eup %11405  ;;  %v7176_v8 = vsel %vm7155_vm4, %v7015_v52, %v7100_v12  ;;  %11419 = vrcp.f32 %v6863_v9  ;;  %v6862_v59 = vadd.f32 1.0, %v11404_v34  ;;  %v7116_v40 = vpop.permute.xlu0 %7115 }
 0x729   : > { %v11408_v32 = vpop.eup %11407  ;;  %7208 = vst [vmem:[%s13303_s12 + $0xa0] sm:$0xff] %v7176_v8  ;;  %v6985_v1 = vmin.f32 %v6953_v20, 0.9999  ;;  %v6952_v50 = vmax.f32 %v11406_v48, 0.0001  ;;  %v7122_v12 = vpop.permute.xlu1 %7121 }
 0x72a   : > { %v11410_v24 = vpop.eup %11409  ;;  %v6955_v3 = vmax.f32 %v11408_v32, 0.0001  ;;  %11421 = vrcp.f32 %v6862_v59 }
 0x72b   : > { %v7018_v5 = vsel %vm6994_vm3, %v6985_v1, %v13392_v46  ;;  %v6984_v51 = vmin.f32 %v6952_v50, 0.9999  ;;  %v6865_v30 = vadd.f32 1.0, %v11410_v24 }
 0x72c   : > { %v7179_v13 = vsel %vm7155_vm4, %v7018_v5, %v13483_v41  ;;  %v6987_v35 = vmin.f32 %v6955_v3, 0.9999  ;;  %v7120_v20 = vpop.permute.xlu0 %7119 }
 0x72d   : > { %v11412_v38 = vpop.eup %11411  ;;  %7211 = vst [vmem:[%s13303_s12 + $0xb8] sm:$0xff] %v7179_v13  ;;  %v7017_v33 = vsel %vm6994_vm3, %v6984_v51, %v13395_v19  ;;  %11423 = vrcp.f32 %v6865_v30 }
 0x72e   : > { %v11414_v31 = vpop.eup %11413  ;;  %v7178_v63 = vsel %vm7155_vm4, %v7017_v33, %v7104_v22  ;;  %v7020_v46 = vsel %vm6994_vm3, %v6987_v35, %v13405_v23  ;;  %v6954_v17 = vmax.f32 %v11412_v38, 0.0001 }
 0x72f   : > { %7210 = vst [vmem:[%s13303_s12 + $0xb0] sm:$0xff] %v7178_v63  ;;  %v7181_v41 = vsel %vm7155_vm4, %v7020_v46, %v7110_v39  ;;  %v6864_v4 = vadd.f32 1.0, %v11414_v31 }
 0x730   : > { %v11416_v29 = vpop.eup %11415  ;;  %7213 = vst [vmem:[%s13303_s12 + $0xc8] sm:$0xff] %v7181_v41  ;;  %v6986_v15 = vmin.f32 %v6954_v17, 0.9999 }
 0x731   : > { %v11418_v27 = vpop.eup %11417  ;;  %v6957_v19 = vmax.f32 %v11416_v29, 0.0001  ;;  %11425 = vrcp.f32 %v6864_v4 }
 0x732   : > { %v11420_v25 = vpop.eup %11419  ;;  %v7019_v22 = vsel %vm6994_vm3, %v6986_v15, %v13434_v11  ;;  %v6956_v23 = vmax.f32 %v11418_v27, 0.0001 }
 0x733   : > { %v7180_v56 = vsel %vm7155_vm4, %v7019_v22, %v7108_v36  ;;  %v6989_v10 = vmin.f32 %v6957_v19, 0.9999  ;;  %v6959_v26 = vmax.f32 %v11420_v25, 0.0001 }
 0x734   : > { %v11422_v0 = vpop.eup %11421  ;;  %7212 = vst [vmem:[%s13303_s12 + $0xc0] sm:$0xff] %v7180_v56  ;;  %v6988_v16 = vmin.f32 %v6956_v23, 0.9999 }
 0x735   : > { %v7022_v42 = vsel %vm6994_vm3, %v6989_v10, %v13443_v49  ;;  %v6991_v58 = vmin.f32 %v6959_v26, 0.9999  ;;  %v6958_v37 = vmax.f32 %v11422_v0, 0.0001 }
 0x736   : > { %v7183_v7 = vsel %vm7155_vm4, %v7022_v42, %v7114_v62  ;;  %v7021_v11 = vsel %vm6994_vm3, %v6988_v16, %v13447_v44 }
 0x737   : > { %v11424_v47 = vpop.eup %11423  ;;  %7215 = vst [vmem:[%s13303_s12 + $0xd8] sm:$0xff] %v7183_v7  ;;  %v7182_v6 = vsel %vm7155_vm4, %v7021_v11, %v7112_v60  ;;  %v7024_v2 = vsel %vm6994_vm3, %v6991_v58, %v13465_v55  ;;  %v6990_v49 = vmin.f32 %v6958_v37, 0.9999 }
 0x738   : > { %7214 = vst [vmem:[%s13303_s12 + $0xd0] sm:$0xff] %v7182_v6  ;;  %v7185_v61 = vsel %vm7155_vm4, %v7024_v2, %v7118_v43  ;;  %v6961_v28 = vmax.f32 %v11424_v47, 0.0001 }
 0x739   : > { %7217 = vst [vmem:[%s13303_s12 + $0xe8] sm:$0xff] %v7185_v61  ;;  %v7023_v44 = vsel %vm6994_vm3, %v6990_v49, %v13468_v14 }
 0x73a   : > { %v7184_v57 = vsel %vm7155_vm4, %v7023_v44, %v7116_v40  ;;  %v6993_v21 = vmin.f32 %v6961_v28, 0.9999 }
 0x73b   : > { %v11426_v45 = vpop.eup %11425  ;;  %7216 = vst [vmem:[%s13303_s12 + $0xe0] sm:$0xff] %v7184_v57 }
 0x73c   : > { %v7026_v55 = vsel %vm6994_vm3, %v6993_v21, %v13474_v53  ;;  %v6960_v9 = vmax.f32 %v11426_v45, 0.0001 }
 0x73d   : > { %v7187_v34 = vsel %vm7155_vm4, %v7026_v55, %v7122_v12 }
 0x73e   : > { %7219 = vst [vmem:[%s13303_s12 + $0xf8] sm:$0xff] %v7187_v34  ;;  %v6992_v52 = vmin.f32 %v6960_v9, 0.9999 }
 0x740   : > { %v7025_v14 = vsel %vm6994_vm3, %v6992_v52, %v13477_v54 }
 0x741   : > { %v7186_v48 = vsel %vm7155_vm4, %v7025_v14, %v7120_v20 }
 0x742   : > { %7218 = vst [vmem:[%s13303_s12 + $0xf0] sm:$0xff] %v7186_v48 }
 0x743 PF: > { %s22_s17 = sadd.s32 1, %s11433_s17  }
 0x744   : > { %p19_p4 = scmp.ge.s32.totalorder %s22_s17, 4  }
 0x746   :  { %21 = sbr.rel (!%p19_p4) target bundleno = 1 (0x1), region = 133 }

</bundles_post_ra>
